<compile_context>
chip_gen: v7x
topology: tpu7x:2x2x1
jax: 0.10.0
libtpu: 0.0.40
codegen_flags: <defaults>
</compile_context>

<pallas_src>
import math

import jax
import jax.numpy as jnp
import numpy as np
from jax.experimental import pallas as pl
from jax.experimental.pallas import tpu as pltpu

# ---- problem sizes (small, consistent with the module) ----
N_GRAPHS = 16          # batch of independent graphs
N_NODES = 16           # nodes per graph
IN_DIM = 32            # in_dim
OUT_DIM = 32           # out_dim
NUM_HEADS = 4
HEAD_DIM = OUT_DIM // NUM_HEADS
BN_EPS = 1e-5
GRAPHS_PER_BLOCK = 8   # graphs processed per grid step (grid=(2,) -> megacore split)


def graph_transformer_kernel(
    h_ref, adj_ref,
    wqkv_ref, wo_ref, bo_ref,
    wf1_ref, bf1_ref, wf2_ref, bf2_ref,
    g1_ref, be1_ref, g2_ref, be2_ref,
    out_ref,
):
    GB, N, D = h_ref.shape
    H, dh = NUM_HEADS, HEAD_DIM
    h3 = h_ref[...]                          # (GB, N, D)
    adj = adj_ref[...]                       # (GB, N, N)   adj[g, dst, src]
    hf = h3.reshape(GB * N, D)               # all nodes of the block stacked on sublanes

    # ---- fused Q|K|V projection: one MXU matmul instead of three ----
    qkv = jnp.dot(hf, wqkv_ref[...], preferred_element_type=jnp.float32)   # (GB*N, 3D)
    q = qkv[:, :D].reshape(GB, N, D)
    k = qkv[:, D:2 * D].reshape(GB, N, D)
    v = qkv[:, 2 * D:].reshape(GB, N, D)

    # ---- per-head column masks (2-D iota; constant, VPU-trivial) ----
    col = jax.lax.broadcasted_iota(jnp.int32, (H, D), 1)
    row = jax.lax.broadcasted_iota(jnp.int32, (H, D), 0)
    mask01 = ((col >= row * dh) & (col < (row + 1) * dh)).astype(jnp.float32)  # (H, D)
    inv_scale = 1.0 / math.sqrt(dh)
    mask_scaled = mask01 * inv_scale          # fold 1/sqrt(dh) into the mask: free

    # ---- all-head attention in TWO batched matmuls (no per-head loop) ----
    # q_exp[g, h*N + n, d] = Q[g, n, d] * mask_h[d] / sqrt(dh)
    q_exp = (q[:, None, :, :] * mask_scaled[None, :, None, :]).reshape(GB, H * N, D)
    # s[g, h*N + n, m] = <Q_h[g, n], K_h[g, m]> / sqrt(dh)
    s = jnp.einsum("gxd,gmd->gxm", q_exp, k,
                   preferred_element_type=jnp.float32)                      # (GB, H*N, N)
    s = jnp.exp(jnp.clip(s, -5.0, 5.0)).reshape(GB, H, N, N) * adj[:, None, :, :]
    z = jnp.sum(s, axis=-1, keepdims=True)                                  # (GB, H, N, 1)
    # wv[g, h*N + n, d] = sum_m s[g, h, n, m] * V[g, m, d]  (valid where head(d)==h)
    wv = jnp.einsum("gxm,gmd->gxd", s.reshape(GB, H * N, N), v,
                    preferred_element_type=jnp.float32).reshape(GB, H, N, D)
    recip = pl.reciprocal(z + 1e-6, approx=True)                            # one EUP divide
    attn = jnp.sum(wv * recip * mask01[None, :, None, :], axis=1)           # (GB, N, D)
    attn = attn.reshape(GB * N, D)

    # ---- output projection + residual (requires IN_DIM == OUT_DIM) ----
    h1 = jnp.dot(attn, wo_ref[...], preferred_element_type=jnp.float32) + bo_ref[...]
    h1 = (hf + h1).reshape(GB, N, D)          # dropout = 0.0 -> identity

    # ---- BatchNorm1d #1 (training-mode batch stats, per graph) ----
    mu1 = jnp.mean(h1, axis=1, keepdims=True)
    var1 = jnp.mean(h1 * h1, axis=1, keepdims=True) - mu1 * mu1
    sc1 = g1_ref[...] * jax.lax.rsqrt(var1 + BN_EPS)
    h1 = h1 * sc1 + (be1_ref[...] - mu1 * sc1)
    h1f = h1.reshape(GB * N, D)

    # ---- FFN + residual ----
    f = jnp.dot(h1f, wf1_ref[...], preferred_element_type=jnp.float32) + bf1_ref[...]
    f = jnp.maximum(f, 0.0)
    f = jnp.dot(f, wf2_ref[...], preferred_element_type=jnp.float32) + bf2_ref[...]
    h2 = (h1f + f).reshape(GB, N, D)

    # ---- BatchNorm1d #2 ----
    mu2 = jnp.mean(h2, axis=1, keepdims=True)
    var2 = jnp.mean(h2 * h2, axis=1, keepdims=True) - mu2 * mu2
    sc2 = g2_ref[...] * jax.lax.rsqrt(var2 + BN_EPS)
    out_ref[...] = h2 * sc2 + (be2_ref[...] - mu2 * sc2)


def graph_transformer_layer(h, adj, params, *, graphs_per_block=GRAPHS_PER_BLOCK):
    """h: (B, N, IN_DIM) f32 node features, adj: (B, N, N) f32 mask adj[g, dst, src]."""
    B, n, d = h.shape
    assert d == IN_DIM and IN_DIM == OUT_DIM, "residual path requires in_dim == out_dim"
    gb = min(graphs_per_block, B)
    assert B % gb == 0, "batch must be divisible by graphs_per_block"

    # Fuse the three projection weights into one (IN_DIM, 3*OUT_DIM) matrix.
    wqkv = jnp.concatenate([params["Wq"], params["Wk"], params["Wv"]], axis=1)

    def graph_block(i):
        return (i, 0, 0)

    def whole(shape):
        nd = len(shape)
        return pl.BlockSpec(shape, lambda i, nd=nd: (0,) * nd)

    args = (
        h, adj, wqkv,
        params["Wo"], params["bo"],
        params["Wf1"], params["bf1"], params["Wf2"], params["bf2"],
        params["bn1_g"], params["bn1_b"], params["bn2_g"], params["bn2_b"],
    )
    in_specs = [
        pl.BlockSpec((gb, n, IN_DIM), graph_block),
        pl.BlockSpec((gb, n, n), graph_block),
    ] + [whole(a.shape) for a in args[2:]]

    return pl.pallas_call(
        graph_transformer_kernel,
        out_shape=jax.ShapeDtypeStruct((B, n, OUT_DIM), jnp.float32),
        grid=(B // gb,),
        in_specs=in_specs,
        out_specs=pl.BlockSpec((gb, n, OUT_DIM), graph_block),
        compiler_params=pltpu.CompilerParams(
            dimension_semantics=("parallel",)),   # lets v7x shard the batch over 2 TCs
    )(*args)


def init_params(key):
    ks = jax.random.split(key, 9)
    s = 0.1
    return {
        # Q/K/V: use_bias=False; stored already transposed: (in, out)
        "Wq": jax.random.normal(ks[0], (IN_DIM, OUT_DIM), jnp.float32) * s,
        "Wk": jax.random.normal(ks[1], (IN_DIM, OUT_DIM), jnp.float32) * s,
        "Wv": jax.random.normal(ks[2], (IN_DIM, OUT_DIM), jnp.float32) * s,
        "Wo": jax.random.normal(ks[3], (OUT_DIM, OUT_DIM), jnp.float32) * s,
        "bo": jax.random.normal(ks[4], (1, OUT_DIM), jnp.float32) * s,
        "Wf1": jax.random.normal(ks[5], (OUT_DIM, 2 * OUT_DIM), jnp.float32) * s,
        "bf1": jax.random.normal(ks[6], (1, 2 * OUT_DIM), jnp.float32) * s,
        "Wf2": jax.random.normal(ks[7], (2 * OUT_DIM, OUT_DIM), jnp.float32) * s,
        "bf2": jax.random.normal(ks[8], (1, OUT_DIM), jnp.float32) * s,
        # BatchNorm affine params (gamma=1, beta=0 like a fresh nn.BatchNorm1d)
        "bn1_g": jnp.ones((1, OUT_DIM), jnp.float32),
        "bn1_b": jnp.zeros((1, OUT_DIM), jnp.float32),
        "bn2_g": jnp.ones((1, OUT_DIM), jnp.float32),
        "bn2_b": jnp.zeros((1, OUT_DIM), jnp.float32),
    }


def _reference_single(h, adj, p):
    """Pure-JAX reference of the module's forward on ONE graph."""
    q = (h @ p["Wq"]).reshape(-1, NUM_HEADS, HEAD_DIM)
    k = (h @ p["Wk"]).reshape(-1, NUM_HEADS, HEAD_DIM)
    v = (h @ p["Wv"]).reshape(-1, NUM_HEADS, HEAD_DIM)
    score = jnp.einsum("dhe,she->hds", q, k) / math.sqrt(HEAD_DIM)
    score = jnp.exp(jnp.clip(score, -5.0, 5.0)) * adj[None, :, :]
    z = score.sum(-1)[..., None]
    wv = jnp.einsum("hds,she->hde", score, v)
    attn = jnp.transpose(wv / (z + 1e-6), (1, 0, 2)).reshape(-1, OUT_DIM)
    h1 = h + (attn @ p["Wo"] + p["bo"])
    mu = h1.mean(0, keepdims=True)
    var = ((h1 - mu) ** 2).mean(0, keepdims=True)
    h1 = (h1 - mu) / jnp.sqrt(var + BN_EPS) * p["bn1_g"] + p["bn1_b"]
    f = jnp.maximum(h1 @ p["Wf1"] + p["bf1"], 0.0)
    h2 = h1 + (f @ p["Wf2"] + p["bf2"])
    mu2 = h2.mean(0, keepdims=True)
    var2 = ((h2 - mu2) ** 2).mean(0, keepdims=True)
    return (h2 - mu2) / jnp.sqrt(var2 + BN_EPS) * p["bn2_g"] + p["bn2_b"]


# batched reference = module applied independently to each graph
reference_jax = jax.vmap(_reference_single, in_axes=(0, 0, None))


if __name__ == "__main__":
    key = jax.random.PRNGKey(0)
    k_h, k_adj, k_p = jax.random.split(key, 3)

    h = jax.random.normal(k_h, (N_GRAPHS, N_NODES, IN_DIM), jnp.float32)
    # random directed graphs + self loops so every node has an incoming edge
    adj = (jax.random.uniform(k_adj, (N_GRAPHS, N_NODES, N_NODES)) < 0.3).astype(jnp.float32)
    adj = jnp.maximum(adj, jnp.eye(N_NODES, dtype=jnp.float32)[None])

    params = init_params(k_p)

    out = jax.block_until_ready(graph_transformer_layer(h, adj, params))

    ref = reference_jax(h, adj, params)
    # approx reciprocal (EUP vrcp) in the kernel -> slightly looser tolerance
    np.testing.assert_allclose(np.asarray(out), np.asarray(ref), rtol=1e-2, atol=1e-2)

    print("KERNEL_OK")
</pallas_src>

<mosaic_0001>
module attributes {stable_mosaic.version = 11 : i64} {
  func.func @graph_transformer_kernel(%arg0: i32, %arg1: memref<8x16x32xf32, #tpu.memory_space<vmem>>, %arg2: memref<8x16x16xf32, #tpu.memory_space<vmem>>, %arg3: memref<32x96xf32, #tpu.memory_space<vmem>>, %arg4: memref<32x32xf32, #tpu.memory_space<vmem>>, %arg5: memref<1x32xf32, #tpu.memory_space<vmem>>, %arg6: memref<32x64xf32, #tpu.memory_space<vmem>>, %arg7: memref<1x64xf32, #tpu.memory_space<vmem>>, %arg8: memref<64x32xf32, #tpu.memory_space<vmem>>, %arg9: memref<1x32xf32, #tpu.memory_space<vmem>>, %arg10: memref<1x32xf32, #tpu.memory_space<vmem>>, %arg11: memref<1x32xf32, #tpu.memory_space<vmem>>, %arg12: memref<1x32xf32, #tpu.memory_space<vmem>>, %arg13: memref<1x32xf32, #tpu.memory_space<vmem>>, %arg14: memref<8x16x32xf32, #tpu.memory_space<vmem>>) attributes {dimension_semantics = [#tpu.dimension_semantics<parallel>], iteration_bounds = array<i64: 2>, scalar_prefetch = 0 : i64, scratch_operands = 0 : i64, tpu.core_type = #tpu.core_type<tc>, window_params = [{transform_indices = @transform_0, window_bounds = array<i64: 8, 16, 32>}, {transform_indices = @transform_1, window_bounds = array<i64: 8, 16, 16>}, {pipeline_mode = #tpu.pipeline_mode<synchronous>, transform_indices = @transform_2, window_bounds = array<i64: 32, 96>}, {pipeline_mode = #tpu.pipeline_mode<synchronous>, transform_indices = @transform_3, window_bounds = array<i64: 32, 32>}, {pipeline_mode = #tpu.pipeline_mode<synchronous>, transform_indices = @transform_4, window_bounds = array<i64: 1, 32>}, {pipeline_mode = #tpu.pipeline_mode<synchronous>, transform_indices = @transform_5, window_bounds = array<i64: 32, 64>}, {pipeline_mode = #tpu.pipeline_mode<synchronous>, transform_indices = @transform_6, window_bounds = array<i64: 1, 64>}, {pipeline_mode = #tpu.pipeline_mode<synchronous>, transform_indices = @transform_7, window_bounds = array<i64: 64, 32>}, {pipeline_mode = #tpu.pipeline_mode<synchronous>, transform_indices = @transform_8, window_bounds = array<i64: 1, 32>}, {pipeline_mode = #tpu.pipeline_mode<synchronous>, transform_indices = @transform_9, window_bounds = array<i64: 1, 32>}, {pipeline_mode = #tpu.pipeline_mode<synchronous>, transform_indices = @transform_10, window_bounds = array<i64: 1, 32>}, {pipeline_mode = #tpu.pipeline_mode<synchronous>, transform_indices = @transform_11, window_bounds = array<i64: 1, 32>}, {pipeline_mode = #tpu.pipeline_mode<synchronous>, transform_indices = @transform_12, window_bounds = array<i64: 1, 32>}, {transform_indices = @transform_13, window_bounds = array<i64: 8, 16, 32>}]} {
    %c0 = arith.constant 0 : index
    %c0_0 = arith.constant 0 : index
    %c0_1 = arith.constant 0 : index
    %0 = vector.load %arg1[%c0, %c0_0, %c0_1] : memref<8x16x32xf32, #tpu.memory_space<vmem>>, vector<8x16x32xf32>
    %c0_2 = arith.constant 0 : index
    %c0_3 = arith.constant 0 : index
    %c0_4 = arith.constant 0 : index
    %1 = vector.load %arg2[%c0_2, %c0_3, %c0_4] : memref<8x16x16xf32, #tpu.memory_space<vmem>>, vector<8x16x16xf32>
    %2 = vector.shape_cast %0 : vector<8x16x32xf32> to vector<128x32xf32>
    %c0_5 = arith.constant 0 : index
    %c0_6 = arith.constant 0 : index
    %3 = vector.load %arg3[%c0_5, %c0_6] : memref<32x96xf32, #tpu.memory_space<vmem>>, vector<32x96xf32>
    %cst = arith.constant dense<0.000000e+00> : vector<128x96xf32>
    %4 = tpu.matmul %2, %3, %cst {dimension_numbers = #tpu.dot_dimension_numbers<[1], [0], [0], [1], [0, 0, 1, 1], [], []>} : vector<128x32xf32>, vector<32x96xf32>, vector<128x96xf32> -> vector<128x96xf32>
    %5 = vector.extract_strided_slice %4 {offsets = [0, 0], sizes = [128, 32], strides = [1, 1]} : vector<128x96xf32> to vector<128x32xf32>
    %6 = vector.shape_cast %5 : vector<128x32xf32> to vector<8x16x32xf32>
    %7 = vector.extract_strided_slice %4 {offsets = [0, 32], sizes = [128, 32], strides = [1, 1]} : vector<128x96xf32> to vector<128x32xf32>
    %8 = vector.shape_cast %7 : vector<128x32xf32> to vector<8x16x32xf32>
    %9 = vector.extract_strided_slice %4 {offsets = [0, 64], sizes = [128, 32], strides = [1, 1]} : vector<128x96xf32> to vector<128x32xf32>
    %10 = vector.shape_cast %9 : vector<128x32xf32> to vector<8x16x32xf32>
    %11 = tpu.iota {dimensions = array<i32: 1>} : vector<4x32xi32>
    %12 = tpu.iota {dimensions = array<i32: 0>} : vector<4x32xi32>
    %c8_i32 = arith.constant 8 : i32
    %13 = vector.broadcast %c8_i32 : i32 to vector<4x32xi32>
    %14 = arith.muli %12, %13 : vector<4x32xi32>
    %15 = arith.cmpi sge, %11, %14 : vector<4x32xi32>
    %c1_i32 = arith.constant 1 : i32
    %16 = vector.broadcast %c1_i32 : i32 to vector<4x32xi32>
    %17 = arith.addi %12, %16 : vector<4x32xi32>
    %c8_i32_7 = arith.constant 8 : i32
    %18 = vector.broadcast %c8_i32_7 : i32 to vector<4x32xi32>
    %19 = arith.muli %17, %18 : vector<4x32xi32>
    %20 = arith.cmpi slt, %11, %19 : vector<4x32xi32>
    %21 = arith.andi %15, %20 : vector<4x32xi1>
    %22 = arith.extui %21 : vector<4x32xi1> to vector<4x32xi32>
    %23 = arith.sitofp %22 : vector<4x32xi32> to vector<4x32xf32>
    %cst_8 = arith.constant 0.353553385 : f32
    %24 = vector.broadcast %cst_8 : f32 to vector<4x32xf32>
    %25 = arith.mulf %23, %24 : vector<4x32xf32>
    %26 = vector.shape_cast %6 : vector<8x16x32xf32> to vector<8x1x16x32xf32>
    %27 = vector.shape_cast %25 : vector<4x32xf32> to vector<1x4x1x32xf32>
    %28 = vector.broadcast %26 : vector<8x1x16x32xf32> to vector<8x4x16x32xf32>
    %29 = vector.broadcast %27 : vector<1x4x1x32xf32> to vector<8x4x16x32xf32>
    %30 = arith.mulf %28, %29 : vector<8x4x16x32xf32>
    %31 = vector.shape_cast %30 : vector<8x4x16x32xf32> to vector<8x64x32xf32>
    "tpu.trace_start"() <{level = 10 : i32, message = "gxd,gmd->gxm"}> : () -> ()
    %cst_9 = arith.constant dense<0.000000e+00> : vector<8x64x16xf32>
    %32 = tpu.matmul %31, %8, %cst_9 {dimension_numbers = #tpu.dot_dimension_numbers<[2], [2], [1], [1], [0, 0, 0, 1, 1, 1], [0], [0]>} : vector<8x64x32xf32>, vector<8x16x32xf32>, vector<8x64x16xf32> -> vector<8x64x16xf32>
    %cst_10 = arith.constant -5.000000e+00 : f32
    %cst_11 = arith.constant 5.000000e+00 : f32
    "tpu.trace_stop"() : () -> ()
    %33 = vector.broadcast %cst_10 : f32 to vector<8x64x16xf32>
    %34 = arith.maximumf %33, %32 : vector<8x64x16xf32>
    %35 = vector.broadcast %cst_11 : f32 to vector<8x64x16xf32>
    %36 = arith.minimumf %35, %34 : vector<8x64x16xf32>
    %37 = math.exp %36 : vector<8x64x16xf32>
    %38 = vector.shape_cast %37 : vector<8x64x16xf32> to vector<8x4x16x16xf32>
    %39 = vector.shape_cast %1 : vector<8x16x16xf32> to vector<8x1x16x16xf32>
    %40 = vector.broadcast %39 : vector<8x1x16x16xf32> to vector<8x4x16x16xf32>
    %41 = arith.mulf %38, %40 : vector<8x4x16x16xf32>
    %cst_12 = arith.constant dense<0.000000e+00> : vector<8x4x16xf32>
    %42 = vector.multi_reduction <add>, %41, %cst_12 [3] : vector<8x4x16x16xf32> to vector<8x4x16xf32>
    %43 = vector.shape_cast %42 : vector<8x4x16xf32> to vector<8x4x16x1xf32>
    %44 = vector.shape_cast %41 : vector<8x4x16x16xf32> to vector<8x64x16xf32>
    "tpu.trace_start"() <{level = 10 : i32, message = "gxm,gmd->gxd"}> : () -> ()
    %cst_13 = arith.constant dense<0.000000e+00> : vector<8x64x32xf32>
    %45 = tpu.matmul %44, %10, %cst_13 {dimension_numbers = #tpu.dot_dimension_numbers<[2], [1], [1], [2], [0, 0, 0, 1, 1, 2], [0], [0]>} : vector<8x64x16xf32>, vector<8x16x32xf32>, vector<8x64x32xf32> -> vector<8x64x32xf32>
    "tpu.trace_stop"() : () -> ()
    %46 = vector.shape_cast %45 : vector<8x64x32xf32> to vector<8x4x16x32xf32>
    %cst_14 = arith.constant 9.99999997E-7 : f32
    %47 = vector.broadcast %cst_14 : f32 to vector<8x4x16x1xf32>
    %48 = arith.addf %43, %47 : vector<8x4x16x1xf32>
    %49 = tpu.reciprocal %48 {approx = true} : vector<8x4x16x1xf32> -> vector<8x4x16x1xf32>
    %50 = vector.broadcast %49 : vector<8x4x16x1xf32> to vector<8x4x16x32xf32>
    %51 = arith.mulf %46, %50 : vector<8x4x16x32xf32>
    %52 = vector.shape_cast %23 : vector<4x32xf32> to vector<1x4x1x32xf32>
    %53 = vector.broadcast %52 : vector<1x4x1x32xf32> to vector<8x4x16x32xf32>
    %54 = arith.mulf %51, %53 : vector<8x4x16x32xf32>
    %cst_15 = arith.constant dense<0.000000e+00> : vector<8x16x32xf32>
    %55 = vector.multi_reduction <add>, %54, %cst_15 [1] : vector<8x4x16x32xf32> to vector<8x16x32xf32>
    %56 = vector.shape_cast %55 : vector<8x16x32xf32> to vector<128x32xf32>
    %c0_16 = arith.constant 0 : index
    %c0_17 = arith.constant 0 : index
    %57 = vector.load %arg4[%c0_16, %c0_17] : memref<32x32xf32, #tpu.memory_space<vmem>>, vector<32x32xf32>
    %cst_18 = arith.constant dense<0.000000e+00> : vector<128x32xf32>
    %58 = tpu.matmul %56, %57, %cst_18 {dimension_numbers = #tpu.dot_dimension_numbers<[1], [0], [0], [1], [0, 0, 1, 1], [], []>} : vector<128x32xf32>, vector<32x32xf32>, vector<128x32xf32> -> vector<128x32xf32>
    %c0_19 = arith.constant 0 : index
    %c0_20 = arith.constant 0 : index
    %59 = vector.load %arg5[%c0_19, %c0_20] : memref<1x32xf32, #tpu.memory_space<vmem>>, vector<1x32xf32>
    %60 = vector.broadcast %59 : vector<1x32xf32> to vector<128x32xf32>
    %61 = arith.addf %58, %60 : vector<128x32xf32>
    %62 = arith.addf %2, %61 : vector<128x32xf32>
    %63 = vector.shape_cast %62 : vector<128x32xf32> to vector<8x16x32xf32>
    %cst_21 = arith.constant dense<0.000000e+00> : vector<8x32xf32>
    %64 = vector.multi_reduction <add>, %63, %cst_21 [1] : vector<8x16x32xf32> to vector<8x32xf32>
    %65 = vector.shape_cast %64 : vector<8x32xf32> to vector<8x1x32xf32>
    %cst_22 = arith.constant 1.600000e+01 : f32
    %66 = vector.broadcast %cst_22 : f32 to vector<8x1x32xf32>
    %67 = arith.divf %65, %66 : vector<8x1x32xf32>
    %68 = arith.mulf %63, %63 : vector<8x16x32xf32>
    %cst_23 = arith.constant dense<0.000000e+00> : vector<8x32xf32>
    %69 = vector.multi_reduction <add>, %68, %cst_23 [1] : vector<8x16x32xf32> to vector<8x32xf32>
    %70 = vector.shape_cast %69 : vector<8x32xf32> to vector<8x1x32xf32>
    %cst_24 = arith.constant 1.600000e+01 : f32
    %71 = vector.broadcast %cst_24 : f32 to vector<8x1x32xf32>
    %72 = arith.divf %70, %71 : vector<8x1x32xf32>
    %73 = arith.mulf %67, %67 : vector<8x1x32xf32>
    %74 = arith.subf %72, %73 : vector<8x1x32xf32>
    %c0_25 = arith.constant 0 : index
    %c0_26 = arith.constant 0 : index
    %75 = vector.load %arg10[%c0_25, %c0_26] : memref<1x32xf32, #tpu.memory_space<vmem>>, vector<1x32xf32>
    %cst_27 = arith.constant 9.99999974E-6 : f32
    %76 = vector.broadcast %cst_27 : f32 to vector<8x1x32xf32>
    %77 = arith.addf %74, %76 : vector<8x1x32xf32>
    %78 = math.rsqrt %77 : vector<8x1x32xf32>
    %79 = vector.shape_cast %75 : vector<1x32xf32> to vector<1x1x32xf32>
    %80 = vector.broadcast %79 : vector<1x1x32xf32> to vector<8x1x32xf32>
    %81 = arith.mulf %80, %78 : vector<8x1x32xf32>
    %82 = vector.broadcast %81 : vector<8x1x32xf32> to vector<8x16x32xf32>
    %83 = arith.mulf %63, %82 : vector<8x16x32xf32>
    %c0_28 = arith.constant 0 : index
    %c0_29 = arith.constant 0 : index
    %84 = vector.load %arg11[%c0_28, %c0_29] : memref<1x32xf32, #tpu.memory_space<vmem>>, vector<1x32xf32>
    %85 = arith.mulf %67, %81 : vector<8x1x32xf32>
    %86 = vector.shape_cast %84 : vector<1x32xf32> to vector<1x1x32xf32>
    %87 = vector.broadcast %86 : vector<1x1x32xf32> to vector<8x1x32xf32>
    %88 = arith.subf %87, %85 : vector<8x1x32xf32>
    %89 = vector.broadcast %88 : vector<8x1x32xf32> to vector<8x16x32xf32>
    %90 = arith.addf %83, %89 : vector<8x16x32xf32>
    %91 = vector.shape_cast %90 : vector<8x16x32xf32> to vector<128x32xf32>
    %c0_30 = arith.constant 0 : index
    %c0_31 = arith.constant 0 : index
    %92 = vector.load %arg6[%c0_30, %c0_31] : memref<32x64xf32, #tpu.memory_space<vmem>>, vector<32x64xf32>
    %cst_32 = arith.constant dense<0.000000e+00> : vector<128x64xf32>
    %93 = tpu.matmul %91, %92, %cst_32 {dimension_numbers = #tpu.dot_dimension_numbers<[1], [0], [0], [1], [0, 0, 1, 1], [], []>} : vector<128x32xf32>, vector<32x64xf32>, vector<128x64xf32> -> vector<128x64xf32>
    %c0_33 = arith.constant 0 : index
    %c0_34 = arith.constant 0 : index
    %94 = vector.load %arg7[%c0_33, %c0_34] : memref<1x64xf32, #tpu.memory_space<vmem>>, vector<1x64xf32>
    %95 = vector.broadcast %94 : vector<1x64xf32> to vector<128x64xf32>
    %96 = arith.addf %93, %95 : vector<128x64xf32>
    %cst_35 = arith.constant 0.000000e+00 : f32
    %97 = vector.broadcast %cst_35 : f32 to vector<128x64xf32>
    %98 = arith.maximumf %96, %97 : vector<128x64xf32>
    %c0_36 = arith.constant 0 : index
    %c0_37 = arith.constant 0 : index
    %99 = vector.load %arg8[%c0_36, %c0_37] : memref<64x32xf32, #tpu.memory_space<vmem>>, vector<64x32xf32>
    %cst_38 = arith.constant dense<0.000000e+00> : vector<128x32xf32>
    %100 = tpu.matmul %98, %99, %cst_38 {dimension_numbers = #tpu.dot_dimension_numbers<[1], [0], [0], [1], [0, 0, 1, 1], [], []>} : vector<128x64xf32>, vector<64x32xf32>, vector<128x32xf32> -> vector<128x32xf32>
    %c0_39 = arith.constant 0 : index
    %c0_40 = arith.constant 0 : index
    %101 = vector.load %arg9[%c0_39, %c0_40] : memref<1x32xf32, #tpu.memory_space<vmem>>, vector<1x32xf32>
    %102 = vector.broadcast %101 : vector<1x32xf32> to vector<128x32xf32>
    %103 = arith.addf %100, %102 : vector<128x32xf32>
    %104 = arith.addf %91, %103 : vector<128x32xf32>
    %105 = vector.shape_cast %104 : vector<128x32xf32> to vector<8x16x32xf32>
    %cst_41 = arith.constant dense<0.000000e+00> : vector<8x32xf32>
    %106 = vector.multi_reduction <add>, %105, %cst_41 [1] : vector<8x16x32xf32> to vector<8x32xf32>
    %107 = vector.shape_cast %106 : vector<8x32xf32> to vector<8x1x32xf32>
    %cst_42 = arith.constant 1.600000e+01 : f32
    %108 = vector.broadcast %cst_42 : f32 to vector<8x1x32xf32>
    %109 = arith.divf %107, %108 : vector<8x1x32xf32>
    %110 = arith.mulf %105, %105 : vector<8x16x32xf32>
    %cst_43 = arith.constant dense<0.000000e+00> : vector<8x32xf32>
    %111 = vector.multi_reduction <add>, %110, %cst_43 [1] : vector<8x16x32xf32> to vector<8x32xf32>
    %112 = vector.shape_cast %111 : vector<8x32xf32> to vector<8x1x32xf32>
    %cst_44 = arith.constant 1.600000e+01 : f32
    %113 = vector.broadcast %cst_44 : f32 to vector<8x1x32xf32>
    %114 = arith.divf %112, %113 : vector<8x1x32xf32>
    %115 = arith.mulf %109, %109 : vector<8x1x32xf32>
    %116 = arith.subf %114, %115 : vector<8x1x32xf32>
    %c0_45 = arith.constant 0 : index
    %c0_46 = arith.constant 0 : index
    %117 = vector.load %arg12[%c0_45, %c0_46] : memref<1x32xf32, #tpu.memory_space<vmem>>, vector<1x32xf32>
    %cst_47 = arith.constant 9.99999974E-6 : f32
    %118 = vector.broadcast %cst_47 : f32 to vector<8x1x32xf32>
    %119 = arith.addf %116, %118 : vector<8x1x32xf32>
    %120 = math.rsqrt %119 : vector<8x1x32xf32>
    %121 = vector.shape_cast %117 : vector<1x32xf32> to vector<1x1x32xf32>
    %122 = vector.broadcast %121 : vector<1x1x32xf32> to vector<8x1x32xf32>
    %123 = arith.mulf %122, %120 : vector<8x1x32xf32>
    %124 = vector.broadcast %123 : vector<8x1x32xf32> to vector<8x16x32xf32>
    %125 = arith.mulf %105, %124 : vector<8x16x32xf32>
    %c0_48 = arith.constant 0 : index
    %c0_49 = arith.constant 0 : index
    %126 = vector.load %arg13[%c0_48, %c0_49] : memref<1x32xf32, #tpu.memory_space<vmem>>, vector<1x32xf32>
    %127 = arith.mulf %109, %123 : vector<8x1x32xf32>
    %128 = vector.shape_cast %126 : vector<1x32xf32> to vector<1x1x32xf32>
    %129 = vector.broadcast %128 : vector<1x1x32xf32> to vector<8x1x32xf32>
    %130 = arith.subf %129, %127 : vector<8x1x32xf32>
    %131 = vector.broadcast %130 : vector<8x1x32xf32> to vector<8x16x32xf32>
    %132 = arith.addf %125, %131 : vector<8x16x32xf32>
    %c0_50 = arith.constant 0 : index
    %c0_51 = arith.constant 0 : index
    %c0_52 = arith.constant 0 : index
    %133 = vector.load %arg14[%c0_50, %c0_51, %c0_52] : memref<8x16x32xf32, #tpu.memory_space<vmem>>, vector<8x16x32xf32>
    tpu.vector_store %arg14[%c0_50, %c0_51, %c0_52], %132 {strides = array<i32>} : memref<8x16x32xf32, #tpu.memory_space<vmem>>, vector<8x16x32xf32>,
    return
  }
  func.func @transform_0(%arg0: i32) -> (i32, i32, i32) {
    %c0_i32 = arith.constant 0 : i32
    %c0_i32_0 = arith.constant 0 : i32
    %c0_i32_1 = arith.constant 0 : i32
    return %arg0, %c0_i32, %c0_i32_0 : i32, i32, i32
  }
  func.func @transform_1(%arg0: i32) -> (i32, i32, i32) {
    %c0_i32 = arith.constant 0 : i32
    %c0_i32_0 = arith.constant 0 : i32
    %c0_i32_1 = arith.constant 0 : i32
    return %arg0, %c0_i32, %c0_i32_0 : i32, i32, i32
  }
  func.func @transform_2(%arg0: i32) -> (i32, i32) {
    %c0_i32 = arith.constant 0 : i32
    %c0_i32_0 = arith.constant 0 : i32
    %c0_i32_1 = arith.constant 0 : i32
    return %c0_i32, %c0_i32_0 : i32, i32
  }
  func.func @transform_3(%arg0: i32) -> (i32, i32) {
    %c0_i32 = arith.constant 0 : i32
    %c0_i32_0 = arith.constant 0 : i32
    %c0_i32_1 = arith.constant 0 : i32
    return %c0_i32, %c0_i32_0 : i32, i32
  }
  func.func @transform_4(%arg0: i32) -> (i32, i32) {
    %c0_i32 = arith.constant 0 : i32
    %c0_i32_0 = arith.constant 0 : i32
    %c0_i32_1 = arith.constant 0 : i32
    return %c0_i32, %c0_i32_0 : i32, i32
  }
  func.func @transform_5(%arg0: i32) -> (i32, i32) {
    %c0_i32 = arith.constant 0 : i32
    %c0_i32_0 = arith.constant 0 : i32
    %c0_i32_1 = arith.constant 0 : i32
    return %c0_i32, %c0_i32_0 : i32, i32
  }
  func.func @transform_6(%arg0: i32) -> (i32, i32) {
    %c0_i32 = arith.constant 0 : i32
    %c0_i32_0 = arith.constant 0 : i32
    %c0_i32_1 = arith.constant 0 : i32
    return %c0_i32, %c0_i32_0 : i32, i32
  }
  func.func @transform_7(%arg0: i32) -> (i32, i32) {
    %c0_i32 = arith.constant 0 : i32
    %c0_i32_0 = arith.constant 0 : i32
    %c0_i32_1 = arith.constant 0 : i32
    return %c0_i32, %c0_i32_0 : i32, i32
  }
  func.func @transform_8(%arg0: i32) -> (i32, i32) {
    %c0_i32 = arith.constant 0 : i32
    %c0_i32_0 = arith.constant 0 : i32
    %c0_i32_1 = arith.constant 0 : i32
    return %c0_i32, %c0_i32_0 : i32, i32
  }
  func.func @transform_9(%arg0: i32) -> (i32, i32) {
    %c0_i32 = arith.constant 0 : i32
    %c0_i32_0 = arith.constant 0 : i32
    %c0_i32_1 = arith.constant 0 : i32
    return %c0_i32, %c0_i32_0 : i32, i32
  }
  func.func @transform_10(%arg0: i32) -> (i32, i32) {
    %c0_i32 = arith.constant 0 : i32
    %c0_i32_0 = arith.constant 0 : i32
    %c0_i32_1 = arith.constant 0 : i32
    return %c0_i32, %c0_i32_0 : i32, i32
  }
  func.func @transform_11(%arg0: i32) -> (i32, i32) {
    %c0_i32 = arith.constant 0 : i32
    %c0_i32_0 = arith.constant 0 : i32
    %c0_i32_1 = arith.constant 0 : i32
    return %c0_i32, %c0_i32_0 : i32, i32
  }
  func.func @transform_12(%arg0: i32) -> (i32, i32) {
    %c0_i32 = arith.constant 0 : i32
    %c0_i32_0 = arith.constant 0 : i32
    %c0_i32_1 = arith.constant 0 : i32
    return %c0_i32, %c0_i32_0 : i32, i32
  }
  func.func @transform_13(%arg0: i32) -> (i32, i32, i32) {
    %c0_i32 = arith.constant 0 : i32
    %c0_i32_0 = arith.constant 0 : i32
    %c0_i32_1 = arith.constant 0 : i32
    return %arg0, %c0_i32, %c0_i32_0 : i32, i32, i32
  }
}

</mosaic_0001>

<bundles_post_ra>
// kernel: tpu_custom_call.1
= control target key start
LH: loop header
LB: loop body
LE: loop exit
PB: predicated region body
PF: predicated region fallthrough
CT: control target
= control target key end

     0   :  { %s9399_s0 = inlined_call_operand.hbm [shape: f32[16,16,32], index: 0, kind: input, shape index: {}]   ;;  %s9400_s1 = inlined_call_operand.hbm [shape: f32[16,16,16], index: 1, kind: input, shape index: {}]   ;;  %s9401_s2 = inlined_call_operand.vmem [shape: f32[32,96], index: 2, kind: input, shape index: {}]   ;;  %s9402_s3 = inlined_call_operand.vmem [shape: f32[32,32], index: 3, kind: input, shape index: {}]   ;;  %s9403_s4 = inlined_call_operand.vmem [shape: f32[1,32], index: 4, kind: input, shape index: {}]   ;;  %s9404_s5 = inlined_call_operand.vmem [shape: f32[32,64], index: 5, kind: input, shape index: {}]   ;;  %s9405_s6 = inlined_call_operand.vmem [shape: f32[1,64], index: 6, kind: input, shape index: {}]   ;;  %s9406_s7 = inlined_call_operand.vmem [shape: f32[64,32], index: 7, kind: input, shape index: {}]   ;;  %s9407_s8 = inlined_call_operand.vmem [shape: f32[1,32], index: 8, kind: input, shape index: {}]   ;;  %s9408_s9 = inlined_call_operand.vmem [shape: f32[1,32], index: 9, kind: input, shape index: {}]   ;;  %s9409_s10 = inlined_call_operand.vmem [shape: f32[1,32], index: 10, kind: input, shape index: {}]   ;;  %s9410_s11 = inlined_call_operand.vmem [shape: f32[1,32], index: 11, kind: input, shape index: {}]   ;;  %s9411_s12 = inlined_call_operand.vmem [shape: f32[1,32], index: 12, kind: input, shape index: {}]   ;;  %s9412_s13 = inlined_call_operand.hbm [shape: f32[16,16,32], index: 13, kind: output, shape index: {}]  }
   0x1   :  { %9431 = sst [smem:[#allocation34_spill]] %s9399_s0 }
   0x2   :  { %9432 = sst [smem:[#allocation35_spill]] %s9412_s13 }
   0x3   :  { %18 = vsyncpa [#allocation3], 0 }
   0x4   :  { %20 = vsyncpa [#allocation3 + $0x1], 0 }
   0x5   :  { %21 = vsyncpa [#allocation6], 0 }
   0x6   :  { %23 = vsyncpa [#allocation6 + $0x1], 0 }
   0x7   :  { %24 = vsyncpa [#allocation4], 0 }
   0x8   :  { %26 = vsyncpa [#allocation4 + $0x1], 0  ;;  %s7210_s25 = smov 0   ;;  %s7212_s26 = smov 0  }
   0x9   :  { %s7214_s27 = smov 0   ;;  %s7216_s28 = smov 0  }
   0xa LB: > { %9433 = sst [smem:[#allocation11_spill]] %s7115_s25  ;;  %s7231_s29 = sadd.s32 4294967295, %s7127_s28   ;;  %s7127_s28 = sphi %s7216_s28, %s9494_s28   ;;  %s7123_s27 = sphi %s7214_s27, %s9496_s27   ;;  %s7119_s26 = sphi %s7212_s26, %s9498_s26   ;;  %s7115_s25 = sphi %s7210_s25, %s9497_s25  }
   0xb   : > { %9434 = sst [smem:[#allocation12_spill]] %s7123_s27  ;;  %s5491_s30 = sadd.s32 4294967294, %s7127_s28  }
   0xc   : > { %s7235_s14 = sadd.s32 1, %s7127_s28   ;;  %s39_s15 = sadd.s32 1, %s7123_s27 }
   0xd   : > { %9435 = sst [smem:[#allocation13_spill]] %s7235_s14  ;;  %s36_s16 = ssub.s32 %s7127_s28, %s7235_s14 }
   0xe   : > { %p46_p0 = scmp.ne.s32.totalorder %s7123_s27, %s7119_s26  ;;  %p37_p1 = scmp.eq.s32.totalorder %s36_s16, 0 }
   0xf   : > { %p47_p2 = scmp.eq.s32.totalorder %s7127_s28, 0  ;;  %p52_p3 = scmp.ne.s32.totalorder %s7119_s26, %s7115_s25 }
  0x10   : > { %p53_p4 = scmp.eq.s32.totalorder %s7231_s29, 0  ;;  %p333_p7 = scmp.eq.s32.totalorder %s7231_s29, 1 }
  0x11   : > { %s7247_s17 = scalar_select %p37_p1, %s7123_s27, %s39_s15  }
  0x12   : > { %p7249_p5 = por %p47_p2, %p46_p0  ;;  %p7253_p6 = por %p53_p4, %p52_p3 }
  0x13   : > { %9436 = sst [smem:[#allocation14_spill]] %s7247_s17  ;;  %p339_p8 = scmp.eq.s32.totalorder %s5491_s30, 1 }
  0x14   : > { %s9438_s19 = scalar_select %p7253_p6, 1, 0 }
  0x15   : > { %p6571_p10 = scmp.lt.s32.totalorder %s7127_s28, 2  ;;  %p7260_p11 = por %p333_p7, %p46_p0 }
  0x16   : > { %p7264_p12 = por %p339_p8, %p52_p3  ;;  %s7269_s22 = sand.u32 1, %s7123_s27  }
  0x17   : > { %s9439_s20 = scalar_select %p7260_p11, 1, 0 }
  0x18   : > { %s9441_s21 = scalar_select %p7264_p12, 1, 0 }
  0x19   : > { %9440 = sst [smem:[#allocation15_spill]] %s9439_s20  ;;  %s9418_s23 = sshll.u32 %s7127_s28, 11 }
  0x1a   : > { %9442 = sst [smem:[#allocation16_spill]] %s9441_s21  ;;  %s9417_s24 = sshll.u32 %s7269_s22, 7 }
  0x1b   : > { %s9443_s0 = sld [smem:[#allocation34_spill]]  ;;  %s396_s17 = scalar_lea.vmem [#allocation2], %s9417_s24 }
  0x1c   : > { %s404_s14 = sshll.u32 %s396_s17, 4  ;;  %p7284_p13 = pnand %p6571_p10, %p7249_p5  ;;  %s7288_s14 = int_to_ptr.vmem [resolvable:$true] %s404_s14 }
  0x1e   : > { %p6999_p1 = pneg %p7284_p13 }
  0x21   : > { %s7278_s16 = scalar_lea.hbm %s9443_s0, %s9418_s23  ;;  %s7002_s18 = scalar_lea.hbm %s9443_s0, 4096 }
  0x22   : > { %s6997_s15 = scalar_lea.hbm %s7278_s16, 2048  ;;  %p7003_p4 = scmp.lt.u32.totalorder %s7278_s16, %s9443_s0 }
  0x23   : > { %p6998_p0 = scmp.ne.s32.totalorder %s7278_s16, %s6997_s15  ;;  %p7004_p5 = scmp.lt.u32.totalorder %s7002_s18, %s6997_s15 }
  0x24   : > { %p7006_p8 = scmp.lt.u32.totalorder %s6997_s15, %s7278_s16 }
  0x25   : > { %p7000_p2 = pnand %p6999_p1, %p6998_p0  ;;  %p7005_p7 = por %p7004_p5, %p7003_p4 }
  0x27   : > { %p7001_p3 = pneg %p7000_p2  ;;  %p7007_p10 = por %p7006_p8, %p7005_p7 }
  0x29   : > { %p7008_p9 = pnand %p7007_p10, %p7001_p3 }
  0x2b   : > { %7011 = shalt.err (!%p7008_p9)
}
  0x2c   : > { %s7012_s21 = scalar_lea.vmem %s7288_s14, 2048  ;;  %s7129_s30 = smov [#allocation2]  }
  0x2d   : > { %p7013_p0 = scmp.ne.s32.totalorder %s7288_s14, %s7012_s21  ;;  %s7017_s17 = sshll.u32 %s7129_s30, 4  ;;  %s7018_s17 = int_to_ptr.vmem [resolvable:$false] %s7017_s17 }
  0x2e   : > { %s7019_s23 = scalar_lea.vmem %s7018_s17, 4096  ;;  %p7020_p11 = scmp.lt.s32.totalorder %s7288_s14, %s7018_s17 }
  0x2f   : > { %p7015_p2 = pnand %p7013_p0, %p6999_p1  ;;  %p7021_p4 = scmp.lt.s32.totalorder %s7019_s23, %s7012_s21 }
  0x31   : > { %p7016_p12 = pneg %p7015_p2  ;;  %p7022_p5 = por %p7021_p4, %p7020_p11 }
  0x33   : > { %p7023_p7 = pnand %p7022_p5, %p7016_p12 }
  0x35   : > { %7026 = shalt.err (!%p7023_p7)
}
  0x36   : > { %s9424_s24 = smov 128   ;;  %s7131_s15 = smov 8  }
  0x37   : > { %s9445_s21 = scalar_lea.sflag [#allocation3], %s7269_s22  ;;  %p5502_p9 = scmp.ge.s32.totalorder %s7127_s28, 1 }
  0x38   : > { %6563 = dma.hbm_to_vmem [thread:$0]  (!%p7284_p13), %s7278_s16, 2048, %s7288_s14, %s9445_s21, %s9424_s24, %s9424_s24, %s7131_s15  }
  0x39   : > { %p434_p11 = scmp.lt.s32.totalorder %s7127_s28, 3  ;;  %s9447_s30 = sshll.u32 %s7127_s28, 11 }
  0x3a   : > { %s7332_s0 = scalar_lea.hbm %s9400_s1, %s9447_s30  ;;  %s9448_s25 = sshll.u32 %s7269_s22, 7 }
  0x3b   : > { %p7323_p12 = pnand %p5502_p9, %p434_p11  ;;  %s418_s13 = scalar_lea.vmem [#allocation5], %s9448_s25 }
  0x3c   : > { %s426_s20 = sshll.u32 %s418_s13, 4  ;;  %s415_s14 = scalar_lea.sflag [#allocation6], %s7269_s22  ;;  %s7336_s20 = int_to_ptr.vmem [resolvable:$true] %s426_s20 }
  0x3d   : > { %s7027_s16 = scalar_lea.hbm %s7332_s0, 2048  ;;  %s7032_s30 = scalar_lea.hbm %s9400_s1, 4096 }
  0x3e   : > { %p7028_p3 = scmp.ne.s32.totalorder %s7332_s0, %s7027_s16  ;;  %p7033_p0 = scmp.lt.u32.totalorder %s7332_s0, %s9400_s1 }
  0x3f   : > { %p7034_p2 = scmp.lt.u32.totalorder %s7032_s30, %s7027_s16  ;;  %p7036_p5 = scmp.lt.u32.totalorder %s7027_s16, %s7332_s0 }
  0x40   : > { %p7030_p8 = pnand %p7028_p3, %p6999_p1 }
  0x41   : > { %p7035_p4 = por %p7034_p2, %p7033_p0 }
  0x42   : > { %p7031_p10 = pneg %p7030_p8 }
  0x43   : > { %p7037_p7 = por %p7036_p5, %p7035_p4 }
  0x45   : > { %p7038_p9 = pnand %p7037_p7, %p7031_p10 }
  0x47   : > { %7041 = shalt.err (!%p7038_p9)
}
  0x48   : > { %s7042_s13 = scalar_lea.vmem %s7336_s20, 2048  ;;  %s7132_s25 = smov [#allocation5]  }
  0x49   : > { %p7043_p11 = scmp.ne.s32.totalorder %s7336_s20, %s7042_s13  ;;  %s7047_s21 = sshll.u32 %s7132_s25, 4  ;;  %s7048_s21 = int_to_ptr.vmem [resolvable:$false] %s7047_s21 }
  0x4a   : > { %s7049_s24 = scalar_lea.vmem %s7048_s21, 4096  ;;  %p7050_p6 = scmp.lt.s32.totalorder %s7336_s20, %s7048_s21 }
  0x4b   : > { %p7045_p3 = pnand %p7043_p11, %p6999_p1  ;;  %p7051_p0 = scmp.lt.s32.totalorder %s7049_s24, %s7042_s13 }
  0x4d   : > { %p7046_p8 = pneg %p7045_p3  ;;  %p7052_p2 = por %p7051_p0, %p7050_p6 }
  0x4f   : > { %p7053_p4 = pnand %p7052_p2, %p7046_p8 }
  0x51   : > { %7056 = shalt.err (!%p7053_p4)
}
  0x52   : > { %s9449_s16 = smov 128   ;;  %438 = sbr.rel (%p7323_p12) target bundleno = 1756 (0x6dc), region = 72 }
  0x53   : > { %6566 = dma.hbm_to_vmem [thread:$0]  (!%p7284_p13), %s7332_s0, 2048, %s7336_s20, %s415_s14, %s9449_s16, %s9449_s16, %s7131_s15  }
  0x59   : > { %s7370_s17 = sand.u32 1, %s7119_s26   ;;  %p9450_p6 = scmp.ne.s32.totalorder %s9438_s19, 0 }
  0x5a   : > { %s7373_s30 = sshll.u32 %s7370_s17, 7  ;;  %s441_s27 = scalar_lea.sflag [#allocation3], %s7370_s17 }
  0x5b   : > { %s7377_s23 = scalar_lea.vmem [#allocation2], %s7373_s30 }
  0x5c   : > { %7102 = dma.done.wait (%p9450_p6), %s441_s27, 2048  }
  0x5d   : > { %7104 = vsyncadd (%p9450_p6), %s441_s27, 4294965248  ;;  %s450_s0 = scalar_lea.sflag [#allocation6], %s7370_s17  ;;  %s7385_s20 = scalar_lea.vmem [#allocation5], %s7373_s30 }
  0x5e   : > { %7106 = dma.done.wait (%p9450_p6), %s450_s0, 2048  }
  0x5f   : > { %7108 = vsyncadd (%p9450_p6), %s450_s0, 4294965248  ;;  %vm540_vm0 = vcmask 261120   ;;  %v536_v0 = vld [vmem:[%s9401_s2] sm:$0xff]  ;;  %v537_v1 = vld [vmem:[%s9401_s2 + $0x8] sm:$0xff]  ;;  %v734_v22 = vlaneseq  ;;  %v7133_v28 = vmov 1966171168  }
  0x60   : > { %v538_v2 = vld [vmem:[%s9401_s2 + $0x10] sm:$0xff]  ;;  %v6430_v3 = vpack.c.bf16 %v537_v1, %v536_v0  ;;  %v539_v4 = vld [vmem:[%s9401_s2 + $0x18] sm:$0xff]  ;;  %v504_v5 = vld [vmem:[%s7377_s23] sm:$0xff]  ;;  %v749_v29 = vunpack.c.l.s4 %v7133_v28  ;;  %v7134_v31 = vmov 0.0   ;;  %s7135_s24 = smov 96   ;;  %s7136_s16 = smov 64  }
  0x61   : > { %v6434_v6 = vpack.c.bf16 %v539_v4, %v538_v2  ;;  %6046 = vmatprep.mubr.msk.f32.mxu0 %vm540_vm0, %v504_v5  ;;  %v512_v7 = vld [vmem:[%s7377_s23 + $0x40] sm:$0xff]  ;;  %v505_v8 = vld [vmem:[%s7377_s23 + $0x8] sm:$0xff]  ;;  %v506_v10 = vld [vmem:[%s7377_s23 + $0x10] sm:$0xff]  ;;  %v737_v23 = vshrl.u32 %v734_v22, 7  ;;  %v735_v25 = vand.u32 127, %v734_v22  ;;  %vm2288_vm5 = vcmask 130048  }
  0x62   : > { %6431 = vmatprep.subr.bf16.mxu0 %v6430_v3  ;;  %6550 = vmatprep.subr.bf16.mxu1 %v6430_v3  ;;  %v513_v9 = vld [vmem:[%s7377_s23 + $0x48] sm:$0xff]  ;;  %v514_v11 = vld [vmem:[%s7377_s23 + $0x50] sm:$0xff]  ;;  %v507_v12 = vld [vmem:[%s7377_s23 + $0x18] sm:$0xff]  ;;  %v750_v30 = vunpack.c.0.s8 %v749_v29  ;;  %vm4792_vm6 = vcmask 523264   ;;  %s9178_s14 = scalar_lea.vmem [#allocation7], %s7373_s30  ;;  %s9487_s30 = sld [smem:[#allocation15_spill]] }
  0x63   : > { %6433 = vmatpush3.bf16.msra.mxu0 %v6430_v3  ;;  %6552 = vmatpush3.bf16.msra.mxu1 %v6430_v3  ;;  %v515_v13 = vld [vmem:[%s7377_s23 + $0x58] sm:$0xff]  ;;  %v508_v14 = vld [vmem:[%s7377_s23 + $0x20] sm:$0xff]  ;;  %v509_v16 = vld [vmem:[%s7377_s23 + $0x28] sm:$0xff]  ;;  %v740_v24 = vadd.s32 1, %v737_v23  ;;  %v738_v26 = vmul.u32 8, %v737_v23  ;;  %v7443_v39 = vsub.s32 0, %v737_v23 }
  0x64   : > { %6435 = vmatprep.subr.bf16.mxu0 %v6434_v6  ;;  %6551 = vmatprep.subr.bf16.mxu1 %v6434_v6  ;;  %v516_v15 = vld [vmem:[%s7377_s23 + $0x60] sm:$0xff]  ;;  %v517_v17 = vld [vmem:[%s7377_s23 + $0x68] sm:$0xff]  ;;  %v510_v18 = vld [vmem:[%s7377_s23 + $0x30] sm:$0xff]  ;;  %v7438_v34 = vsub.s32 %v750_v30, %v737_v23  ;;  %s5793_s13 = sshll.u32 %s7231_s29, 11  ;;  %s9488_s19 = sld [smem:[#allocation35_spill]] }
  0x65   : > { %6058 = vmatprep.mubr.msk.f32.mxu1 %vm540_vm0, %v512_v7  ;;  %v518_v19 = vld [vmem:[%s7377_s23 + $0x70] sm:$0xff]  ;;  %v511_v20 = vld [vmem:[%s7377_s23 + $0x38] sm:$0xff]  ;;  %v741_v27 = vmul.u32 8, %v740_v24  ;;  %vm739_vm1 = vcmp.ge.s32.totalorder %v735_v25, %v738_v26  ;;  %9453 = vst [vmem:[#allocation19_spill] sm:$0xff] %v7443_v39  ;;  %vm7687_vm4 = vmpackc.low %vm540_vm0, %vm540_vm0  ;;  %s5381_s29 = scalar_lea.sflag [#allocation4], %s7370_s17  ;;  %s7137_s27 = smov [#allocation7]  }
  0x66   : > { %v519_v21 = vld [vmem:[%s7377_s23 + $0x78] sm:$0xff]  ;;  %9452 = vst [vmem:[#allocation18_spill] sm:$0xff] %v7438_v34  ;;  %s7061_s0 = sshll.u32 %s7137_s27, 4  ;;  %s7062_s0 = int_to_ptr.vmem [resolvable:$false] %s7061_s0 }
  0x67   : > { %6437 = vmatpush3.bf16.msra.mxu0 %v6434_v6  ;;  %6553 = vmatpush3.bf16.msra.mxu1 %v6434_v6  ;;  %vm742_vm2 = vcmp.lt.s32.totalorder %v735_v25, %v741_v27 }
  0x68   : > { %vm743_vm3 = vmand %vm739_vm1, %vm742_vm2  ;;  %p9489_p1 = scmp.ne.s32.totalorder %s9487_s30, 0 }
  0x69   : > { %v7435_v32 = vsel %vm743_vm3, 1.0, %v7134_v31 }
  0x6a   : > { %6047 = vmatmul.mubr.msk.f32.vlgmr.msra.gmra.mrb[0].mxu0 %vm540_vm0, %v505_v8  ;;  %6059 = vmatmul.mubr.msk.f32.vlgmr.msra.gmra.mrb[0].mxu1 %vm540_vm0, %v513_v9  ;;  %9451 = vst [vmem:[#allocation17_spill] sm:$0xff] %v7435_v32  ;;  %v746_v33 = vmul.f32 0.35355338, %v7435_v32 }
  0x6b   : > { %6049 = vmatprep.mubr.msk.f32.mxu0 %vm540_vm0, %v506_v10  ;;  %6061 = vmatprep.mubr.msk.f32.mxu1 %vm540_vm0, %v514_v11 }
  0x6c   : > { %v754_v35 = vrot.slane %v746_v33, %v7438_v34 }
  0x6e   : > { %6050 = vmatmul.mubr.msk.f32.gmra.mrb[2].mxu0 %vm540_vm0, %v507_v12  ;;  %6062 = vmatmul.mubr.msk.f32.gmra.mrb[2].mxu1 %vm540_vm0, %v515_v13  ;;  %v755_v36 = vcombine.high %v754_v35, %v754_v35  ;;  %v762_v37 = vrot.slane %v754_v35, %v7438_v34 }
  0x6f   : > { %6052 = vmatprep.mubr.msk.f32.mxu0 %vm540_vm0, %v508_v14  ;;  %6064 = vmatprep.mubr.msk.f32.mxu1 %vm540_vm0, %v516_v15 }
  0x70   : > { %v769_v38 = vrot.slane %v755_v36, %v7438_v34  ;;  %v770_v40 = vcombine.high %v762_v37, %v762_v37  ;;  %v7446_v42 = vrot.slane %v762_v37, %v7443_v39 }
  0x72   : > { %6053 = vmatmul.mubr.msk.f32.gmra.mrb[4].mxu0 %vm540_vm0, %v509_v16  ;;  %6065 = vmatmul.mubr.msk.f32.gmra.mrb[4].mxu1 %vm540_vm0, %v517_v17  ;;  %v771_v41 = vcombine.high %v769_v38, %v769_v38  ;;  %v7449_v43 = vrot.slane %v769_v38, %v7443_v39  ;;  %v7452_v44 = vrot.slane %v770_v40, %v7443_v39 }
  0x73   : > { %6055 = vmatprep.mubr.msk.f32.mxu0 %vm540_vm0, %v510_v18  ;;  %6067 = vmatprep.mubr.msk.f32.mxu1 %vm540_vm0, %v518_v19 }
  0x74   : > { %v7455_v45 = vrot.slane %v771_v41, %v7443_v39 }
  0x76   : > { %6056 = vmatmul.mubr.msk.f32.gmra.mrb[6].mxu0 %vm540_vm0, %v511_v20  ;;  %6068 = vmatmul.mubr.msk.f32.gmra.mrb[6].mxu1 %vm540_vm0, %v519_v21 }
 0x13d   : > { %v6048_v46 = vpop.f32.mrb[0].mxu0  ;;  %v6060_v47 = vpop.f32.mrb[0].mxu1 }
 0x13e   : > { %v7458_v48 = vmul.f32 %v6048_v46, %v7446_v42  ;;  %v655_v49 = vpop.f32.mrb[1].mxu0  ;;  %v7461_v50 = vmul.f32 %v6060_v47, %v7446_v42  ;;  %v695_v51 = vpop.f32.mrb[1].mxu1  ;;  %v7464_v52 = vmul.f32 %v6048_v46, %v7449_v43  ;;  %v7467_v53 = vmul.f32 %v6048_v46, %v7452_v44 }
 0x13f   : > { %v7469_v54 = vpack.i.bf16 %v6048_v46, %v655_v49  ;;  %v792_v55 = vmul.f32 %v7446_v42, %v655_v49  ;;  %v7472_v56 = vpack.i.bf16 %v6060_v47, %v695_v51  ;;  %v7475_v57 = vmul.f32 %v7449_v43, %v655_v49 }
 0x140   : > { %v7478_v58 = vmul.f32 %v7452_v44, %v655_v49  ;;  %v7481_v59 = vmul.f32 %v7455_v45, %v655_v49  ;;  %v7489_v62 = vmul.f32 %v6048_v46, %v7455_v45  ;;  %v7492_v63 = vmul.f32 %v7446_v42, %v695_v51 }
 0x141   : > { %6614 = vrot.lane.b32.xlu0 %v7469_v54, %s7135_s24  ;;  %v6051_v60 = vpop.f32.mrb[2].mxu0  ;;  %6074 = vmatprep.mubr.msk.f32.mxu1 %vm540_vm0, %v792_v55  ;;  %v7486_v61 = vpop.f32.mrb[2].mxu1  ;;  %v7495_v0 = vmul.f32 %v7449_v43, %v695_v51  ;;  %v7536_v16 = vmul.f32 %v6060_v47, %v7449_v43  ;;  %v7539_v17 = vmul.f32 %v7452_v44, %v695_v51 }
 0x142   : > { %v7498_v1 = vmul.f32 %v6051_v60, %v7446_v42  ;;  %v665_v2 = vpop.f32.mrb[3].mxu0  ;;  %v7502_v3 = vmul.f32 %v7486_v61, %v7446_v42  ;;  %v7504_v4 = vpop.f32.mrb[3].mxu1  ;;  %v7507_v5 = vmul.f32 %v6051_v60, %v7449_v43  ;;  %v7510_v6 = vmul.f32 %v6051_v60, %v7452_v44 }
 0x143   : > { %v7512_v7 = vpack.i.bf16 %v6051_v60, %v665_v2  ;;  %v7516_v8 = vpack.i.bf16 %v7486_v61, %v7504_v4  ;;  %v7519_v9 = vmul.f32 %v7446_v42, %v665_v2  ;;  %v7522_v10 = vmul.f32 %v7449_v43, %v665_v2 }
 0x144   : > { %9454 = vst [vmem:[#allocation20_spill] sm:$0xff] %v7502_v3  ;;  %v7525_v11 = vmul.f32 %v7452_v44, %v665_v2  ;;  %v7528_v12 = vmul.f32 %v7455_v45, %v665_v2  ;;  %v7533_v15 = vmul.f32 %v6051_v60, %v7455_v45  ;;  %v7542_v18 = vmul.f32 %v6060_v47, %v7452_v44 }
 0x145   : > { %6619 = vrot.lane.b32.xlu0 %v7512_v7, %s7135_s24  ;;  %v6054_v13 = vpop.f32.mrb[4].mxu0  ;;  %v6066_v14 = vpop.f32.mrb[4].mxu1  ;;  %v7573_v36 = vmul.f32 %v7455_v45, %v695_v51  ;;  %v7576_v37 = vmul.f32 %v6060_v47, %v7455_v45 }
 0x146   : > { %v7545_v19 = vmul.f32 %v6054_v13, %v7446_v42  ;;  %v675_v20 = vpop.f32.mrb[5].mxu0  ;;  %v7548_v21 = vmul.f32 %v6066_v14, %v7446_v42  ;;  %v715_v22 = vpop.f32.mrb[5].mxu1  ;;  %v7551_v23 = vmul.f32 %v6054_v13, %v7449_v43  ;;  %v7554_v24 = vmul.f32 %v6054_v13, %v7452_v44 }
 0x147   : > { %v6623_v25 = vpack.i.bf16 %v6054_v13, %v675_v20  ;;  %v6643_v26 = vpack.i.bf16 %v6066_v14, %v715_v22  ;;  %v808_v27 = vmul.f32 %v7446_v42, %v675_v20  ;;  %v7558_v28 = vmul.f32 %v7449_v43, %v675_v20 }
 0x148   : > { %9455 = vst [vmem:[#allocation21_spill] sm:$0xff] %v7548_v21  ;;  %v7561_v29 = vmul.f32 %v7452_v44, %v675_v20  ;;  %v7564_v30 = vmul.f32 %v7455_v45, %v675_v20  ;;  %v7570_v35 = vmul.f32 %v6054_v13, %v7455_v45  ;;  %v7589_v55 = vmul.f32 %v7446_v42, %v715_v22 }
 0x149   : > { %6634 = vrot.lane.b32.xlu0 %v7472_v56, %s7135_s24  ;;  %6624 = vrot.lane.b32.xlu1 %v6623_v25, %s7135_s24  ;;  %v6057_v31 = vpop.f32.mrb[6].mxu0  ;;  %v6069_v33 = vpop.f32.mrb[6].mxu1  ;;  %v7609_v39 = vmul.f32 %v7449_v43, %v715_v22  ;;  %v7615_v34 = vmul.f32 %v6066_v14, %v7449_v43  ;;  %v7622_v3 = vmul.f32 %v7452_v44, %v715_v22 }
 0x14a   : > { %v7579_v38 = vmul.f32 %v6057_v31, %v7446_v42  ;;  %v685_v40 = vpop.f32.mrb[7].mxu0  ;;  %v7582_v41 = vmul.f32 %v6069_v33, %v7446_v42  ;;  %v725_v46 = vpop.f32.mrb[7].mxu1  ;;  %6106 = vmatprep.mubr.msk.f32.mxu0 %vm540_vm0, %v808_v27  ;;  %v7586_v49 = vmul.f32 %v6057_v31, %v7449_v43  ;;  %v7601_v20 = vmul.f32 %v6057_v31, %v7452_v44 }
 0x14b   : > { %v6628_v51 = vpack.i.bf16 %v6057_v31, %v685_v40  ;;  %v6648_v60 = vpack.i.bf16 %v6069_v33, %v725_v46  ;;  %v7592_v47 = vmul.f32 %v7446_v42, %v685_v40  ;;  %v7595_v2 = vmul.f32 %v7449_v43, %v685_v40  ;;  %9458 = vst [vmem:[#allocation24_spill] sm:$0xff] %v7615_v34 }
 0x14c   : > { %9456 = vst [vmem:[#allocation22_spill] sm:$0xff] %v7582_v41  ;;  %v7598_v13 = vmul.f32 %v7452_v44, %v685_v40  ;;  %v7606_v27 = vmul.f32 %v7455_v45, %v685_v40  ;;  %v7612_v32 = vmul.f32 %v6057_v31, %v7455_v45  ;;  %v7619_v41 = vmul.f32 %v7446_v42, %v7504_v4 }
 0x14d   : > { %6644 = vrot.lane.b32.xlu0 %v6643_v26, %s7135_s24  ;;  %6629 = vrot.lane.b32.xlu1 %v6628_v51, %s7135_s24  ;;  %9459 = vst [vmem:[#allocation25_spill] sm:$0xff] %v7622_v3  ;;  %v7625_v21 = vmul.f32 %v6066_v14, %v7452_v44  ;;  %v7629_v40 = vmul.f32 %v7449_v43, %v7504_v4 }
 0x14e   : > { %9457 = vst [vmem:[#allocation23_spill] sm:$0xff] %v7612_v32  ;;  %v7632_v31 = vmul.f32 %v7455_v45, %v715_v22  ;;  %v7636_v34 = vmul.f32 %v7486_v61, %v7449_v43  ;;  %v7639_v32 = vmul.f32 %v6066_v14, %v7455_v45  ;;  %v7643_v3 = vmul.f32 %v7452_v44, %v7504_v4 }
 0x14f   : > { %9460 = vst [vmem:[#allocation26_spill] sm:$0xff] %v7625_v21  ;;  %9461 = vst [vmem:[#allocation27_spill] sm:$0xff] %v7629_v40  ;;  %v7647_v21 = vmul.f32 %v7486_v61, %v7452_v44  ;;  %v7651_v40 = vmul.f32 %v7455_v45, %v7504_v4  ;;  %v7655_v22 = vmul.f32 %v7486_v61, %v7455_v45 }
 0x150   : > { %9462 = vst [vmem:[#allocation28_spill] sm:$0xff] %v7643_v3  ;;  %v7661_v14 = vmul.f32 %v7446_v42, %v725_v46  ;;  %v7664_v3 = vmul.f32 %v7449_v43, %v725_v46  ;;  %v7670_v4 = vmul.f32 %v7452_v44, %v725_v46  ;;  %v7673_v61 = vmul.f32 %v6069_v33, %v7452_v44 }
 0x151   : > { %9463 = vst [vmem:[#allocation29_spill] sm:$0xff] %v7647_v21  ;;  %9464 = vst [vmem:[#allocation30_spill] sm:$0xff] %v7655_v22  ;;  %6654 = vrot.lane.b32.xlu0 %v7469_v54, %s7136_s16  ;;  %6639 = vrot.lane.b32.xlu1 %v7516_v8, %s7135_s24  ;;  %v7667_v21 = vmul.f32 %v6069_v33, %v7449_v43  ;;  %v7676_v54 = vmul.f32 %v7455_v45, %v725_v46 }
 0x152   : > { %9465 = vst [vmem:[#allocation31_spill] sm:$0xff] %v7673_v61  ;;  %v7679_v22 = vmul.f32 %v6069_v33, %v7455_v45 }
 0x153   : > { %9466 = vst [vmem:[#allocation32_spill] sm:$0xff] %v7676_v54 }
 0x154   : > { %9467 = vst [vmem:[#allocation33_spill] sm:$0xff] %v7679_v22 }
 0x155   : > { %6664 = vrot.lane.b32.xlu0 %v6623_v25, %s7136_s16  ;;  %6649 = vrot.lane.b32.xlu1 %v6648_v60, %s7135_s24  ;;  %s9349_s24 = scalar_lea.hbm %s9488_s19, %s5793_s13 }
 0x159   : > { %6659 = vrot.lane.b32.xlu1 %v7512_v7, %s7136_s16  ;;  %6674 = vrot.lane.b32.xlu0 %v7472_v56, %s7136_s16 }
 0x15d   : > { %6669 = vrot.lane.b32.xlu1 %v6628_v51, %s7136_s16  ;;  %6684 = vrot.lane.b32.xlu0 %v6643_v26, %s7136_s16 }
 0x161   : > { %6679 = vrot.lane.b32.xlu1 %v7516_v8, %s7136_s16 }
 0x165   : > { %6689 = vrot.lane.b32.xlu1 %v6648_v60, %s7136_s16 }
 0x1b3   : > { %v6615_v42 = vpop.permute.xlu0 %6614 }
 0x1b4   : > { %v6617_v43 = vunpack.i.h.bf16 %v6615_v42  ;;  %v6616_v44 = vunpack.i.l.bf16 %v6615_v42 }
 0x1b6   : > { %v6438_v25 = vpack.c.bf16 %v6617_v43, %v6616_v44 }
 0x1b7   : > { %v6620_v33 = vpop.permute.xlu0 %6619 }
 0x1b8   : > { %v6622_v46 = vunpack.i.h.bf16 %v6620_v33  ;;  %v6621_v7 = vunpack.i.l.bf16 %v6620_v33  ;;  %6440 = vmatprep.subr.msk.bf16.mxu1 %vm7687_vm4, %v6438_v25 }
 0x1b9   : > { %6443 = vmatpush3.bf16.xpose.msk.msra.mxu1 %vm7687_vm4, %v6438_v25 }
 0x1ba   : > { %v6444_v56 = vpack.c.bf16 %v6622_v46, %v6621_v7 }
 0x1bb   : > { %v6635_v8 = vpop.permute.xlu0 %6634  ;;  %v6625_v26 = vpop.permute.xlu1 %6624 }
 0x1bc   : > { %v6637_v51 = vunpack.i.h.bf16 %v6635_v8  ;;  %v6636_v60 = vunpack.i.l.bf16 %v6635_v8  ;;  %v6627_v42 = vunpack.i.h.bf16 %v6625_v26  ;;  %v6626_v22 = vunpack.i.l.bf16 %v6625_v26  ;;  %6446 = vmatprep.subr.msk.bf16.mxu1 %vm7687_vm4, %v6444_v56 }
 0x1be   : > { %v6462_v43 = vpack.c.bf16 %v6637_v51, %v6636_v60  ;;  %v6450_v44 = vpack.c.bf16 %v6627_v42, %v6626_v22 }
 0x1bf   : > { %v6630_v54 = vpop.permute.xlu1 %6629  ;;  %v6645_v25 = vpop.permute.xlu0 %6644 }
 0x1c0   : > { %v6632_v33 = vunpack.i.h.bf16 %v6630_v54  ;;  %v6631_v61 = vunpack.i.l.bf16 %v6630_v54  ;;  %6075 = vmatmul.mubr.msk.f32.vlgmr.msra.gmra.mrb[8].mxu1 %vm540_vm0, %v7458_v48  ;;  %6452 = vmatprep.subr.msk.bf16.mxu0 %vm7687_vm4, %v6450_v44  ;;  %v6647_v22 = vunpack.i.h.bf16 %v6645_v25  ;;  %v6646_v54 = vunpack.i.l.bf16 %v6645_v25 }
 0x1c1   : > { %6077 = vmatprep.mubr.msk.f32.mxu1 %vm540_vm0, %v7475_v57  ;;  %6455 = vmatpush3.bf16.xpose.msk.msra.mxu0 %vm7687_vm4, %v6450_v44 }
 0x1c2   : > { %v6456_v46 = vpack.c.bf16 %v6632_v33, %v6631_v61  ;;  %6449 = vmatpush3.bf16.xpose.msk.msra.mxu1 %vm7687_vm4, %v6444_v56  ;;  %6464 = vmatprep.subr.msk.bf16.mxu0 %vm7687_vm4, %v6462_v43  ;;  %v6474_v48 = vpack.c.bf16 %v6647_v22, %v6646_v54 }
 0x1c4   : > { %6078 = vmatmul.mubr.msk.f32.gmra.mrb[10].mxu1 %vm540_vm0, %v7464_v52  ;;  %6458 = vmatprep.subr.msk.bf16.mxu1 %vm7687_vm4, %v6456_v46  ;;  %v6640_v52 = vpop.permute.xlu1 %6639 }
 0x1c5   : > { %6080 = vmatprep.mubr.msk.f32.mxu1 %vm540_vm0, %v7478_v58  ;;  %v6642_v57 = vunpack.i.h.bf16 %v6640_v52  ;;  %v6641_v61 = vunpack.i.l.bf16 %v6640_v52  ;;  %v6655_v58 = vpop.permute.xlu0 %6654 }
 0x1c8   : > { %6081 = vmatmul.mubr.msk.f32.gmra.mrb[12].mxu1 %vm540_vm0, %v7467_v53  ;;  %6107 = vmatmul.mubr.msk.f32.vlgmr.msra.gmra.mrb[8].mxu0 %vm540_vm0, %v7545_v19  ;;  %v6468_v53 = vpack.c.bf16 %v6642_v57, %v6641_v61  ;;  %v9472_v19 = vld [vmem:[#allocation24_spill] sm:$0xff] }
 0x1c9   : > { %6083 = vmatprep.mubr.msk.f32.mxu1 %vm540_vm0, %v7481_v59  ;;  %6109 = vmatprep.mubr.msk.f32.mxu0 %vm540_vm0, %v7558_v28  ;;  %v6657_v59 = vunpack.i.h.bf16 %v6655_v58  ;;  %v9474_v28 = vld [vmem:[#allocation20_spill] sm:$0xff] }
 0x1ca   : > { %6467 = vmatpush3.bf16.xpose.msk.msra.mxu0 %vm7687_vm4, %v6462_v43 }
 0x1cb   : > { %6476 = vmatprep.subr.msk.bf16.mxu0 %vm7687_vm4, %v6474_v48 }
 0x1cc   : > { %6084 = vmatmul.mubr.msk.f32.gmra.mrb[14].mxu1 %vm540_vm0, %v7489_v62  ;;  %6110 = vmatmul.mubr.msk.f32.gmra.mrb[10].mxu0 %vm540_vm0, %v7551_v23  ;;  %v6656_v62 = vunpack.i.l.bf16 %v6655_v58  ;;  %v9473_v23 = vld [vmem:[#allocation25_spill] sm:$0xff] }
 0x1cd   : > { %6090 = vmatprep.mubr.msk.f32.mxu1 %vm540_vm0, %v7519_v9  ;;  %6112 = vmatprep.mubr.msk.f32.mxu0 %vm540_vm0, %v7561_v29  ;;  %v9476_v29 = vld [vmem:[#allocation27_spill] sm:$0xff] }
 0x1d0   : > { %6091 = vmatmul.mubr.msk.f32.vlgmr.msra.gmra.mrb[16].mxu1 %vm540_vm0, %v7498_v1  ;;  %6113 = vmatmul.mubr.msk.f32.gmra.mrb[12].mxu0 %vm540_vm0, %v7554_v24  ;;  %v6486_v1 = vpack.c.bf16 %v6657_v59, %v6656_v62 }
 0x1d1   : > { %6093 = vmatprep.mubr.msk.f32.mxu1 %vm540_vm0, %v7522_v10  ;;  %6115 = vmatprep.mubr.msk.f32.mxu0 %vm540_vm0, %v7564_v30  ;;  %v9477_v30 = vld [vmem:[#allocation28_spill] sm:$0xff] }
 0x1d2   : > { %6461 = vmatpush3.bf16.xpose.msk.msra.mxu1 %vm7687_vm4, %v6456_v46 }
 0x1d3   : > { %6470 = vmatprep.subr.msk.bf16.mxu1 %vm7687_vm4, %v6468_v53 }
 0x1d4   : > { %6094 = vmatmul.mubr.msk.f32.gmra.mrb[18].mxu1 %vm540_vm0, %v7507_v5  ;;  %6116 = vmatmul.mubr.msk.f32.gmra.mrb[14].mxu0 %vm540_vm0, %v7570_v35  ;;  %v6650_v5 = vpop.permute.xlu1 %6649  ;;  %v9478_v35 = vld [vmem:[#allocation29_spill] sm:$0xff] }
 0x1d5   : > { %6096 = vmatprep.mubr.msk.f32.mxu1 %vm540_vm0, %v7525_v11  ;;  %6138 = vmatprep.mubr.msk.f32.mxu0 %vm540_vm0, %v7492_v63  ;;  %v6652_v9 = vunpack.i.h.bf16 %v6650_v5  ;;  %v6651_v63 = vunpack.i.l.bf16 %v6650_v5 }
 0x1d8   : > { %6097 = vmatmul.mubr.msk.f32.gmra.mrb[20].mxu1 %vm540_vm0, %v7510_v6  ;;  %6139 = vmatmul.mubr.msk.f32.vlgmr.msra.gmra.mrb[16].mxu0 %vm540_vm0, %v7461_v50  ;;  %v6480_v50 = vpack.c.bf16 %v6652_v9, %v6651_v63 }
 0x1d9   : > { %6479 = vmatpush3.bf16.xpose.msk.msra.mxu0 %vm7687_vm4, %v6474_v48  ;;  %6099 = vmatprep.mubr.msk.f32.mxu1 %vm540_vm0, %v7528_v12  ;;  %v9470_v12 = vld [vmem:[#allocation21_spill] sm:$0xff] }
 0x1da   : > { %6141 = vmatprep.mubr.msk.f32.mxu0 %vm540_vm0, %v7495_v0  ;;  %6487 = vmatprep.subr.bf16.mxu0 %v6486_v1  ;;  %v6665_v0 = vpop.permute.xlu0 %6664 }
 0x1db   : > { %v6667_v6 = vunpack.i.h.bf16 %v6665_v0  ;;  %v6666_v10 = vunpack.i.l.bf16 %v6665_v0 }
 0x1dc   : > { %6100 = vmatmul.mubr.msk.f32.gmra.mrb[22].mxu1 %vm540_vm0, %v7533_v15  ;;  %6142 = vmatmul.mubr.msk.f32.gmra.mrb[18].mxu0 %vm540_vm0, %v7536_v16  ;;  %v6660_v15 = vpop.permute.xlu1 %6659 }
 0x1dd   : > { %6122 = vmatprep.mubr.msk.f32.mxu1 %vm540_vm0, %v7592_v47  ;;  %6144 = vmatprep.mubr.msk.f32.mxu0 %vm540_vm0, %v7539_v17  ;;  %v7793_v11 = vpack.c.bf16 %v6667_v6, %v6666_v10  ;;  %v6662_v16 = vunpack.i.h.bf16 %v6660_v15  ;;  %v6661_v17 = vunpack.i.l.bf16 %v6660_v15  ;;  %v9483_v47 = vld [vmem:[#allocation33_spill] sm:$0xff]  ;;  %v7861_v10 = vld [vmem:[%s7385_s20 + $0x8] sm:$0xff] }
 0x1df   : > { %v6490_v24 = vpack.c.bf16 %v6662_v16, %v6661_v17  ;;  %v7865_v17 = vld [vmem:[%s7385_s20] sm:$0xff] }
 0x1e0   : > { %6123 = vmatmul.mubr.msk.f32.vlgmr.msra.gmra.mrb[24].mxu1 %vm540_vm0, %v7579_v38  ;;  %6145 = vmatmul.mubr.msk.f32.gmra.mrb[20].mxu0 %vm540_vm0, %v7542_v18  ;;  %v9471_v18 = vld [vmem:[#allocation23_spill] sm:$0xff] }
 0x1e1   : > { %6125 = vmatprep.mubr.msk.f32.mxu1 %vm540_vm0, %v7595_v2  ;;  %6147 = vmatprep.mubr.msk.f32.mxu0 %vm540_vm0, %v7573_v36  ;;  %v6670_v36 = vpop.permute.xlu1 %6669 }
 0x1e2   : > { %6473 = vmatpush3.bf16.xpose.msk.msra.mxu1 %vm7687_vm4, %v6468_v53  ;;  %v6671_v38 = vunpack.i.l.bf16 %v6670_v36 }
 0x1e3   : > { %6482 = vmatprep.subr.msk.bf16.mxu1 %vm7687_vm4, %v6480_v50 }
 0x1e4   : > { %6126 = vmatmul.mubr.msk.f32.gmra.mrb[26].mxu1 %vm540_vm0, %v7586_v49  ;;  %6148 = vmatmul.mubr.msk.f32.gmra.mrb[22].mxu0 %vm540_vm0, %v7576_v37  ;;  %v6672_v37 = vunpack.i.h.bf16 %v6670_v36  ;;  %v9481_v49 = vld [vmem:[#allocation31_spill] sm:$0xff] }
 0x1e5   : > { %6128 = vmatprep.mubr.msk.f32.mxu1 %vm540_vm0, %v7598_v13  ;;  %6170 = vmatprep.mubr.msk.f32.mxu0 %vm540_vm0, %v7589_v55  ;;  %v9482_v55 = vld [vmem:[#allocation32_spill] sm:$0xff]  ;;  %v6675_v13 = vpop.permute.xlu0 %6674  ;;  %v7853_v54 = vpop.permute.xlu1 %6679 }
 0x1e6   : > { %v6677_v56 = vunpack.i.h.bf16 %v6675_v13  ;;  %v6676_v26 = vunpack.i.l.bf16 %v6675_v13  ;;  %v6682_v9 = vunpack.i.h.bf16 %v7853_v54 }
 0x1e8   : > { %6129 = vmatmul.mubr.msk.f32.gmra.mrb[28].mxu1 %vm540_vm0, %v7601_v20  ;;  %6171 = vmatmul.mubr.msk.f32.vlgmr.msra.gmra.mrb[24].mxu0 %vm540_vm0, %v9470_v12  ;;  %v7855_v53 = vpack.c.bf16 %v6677_v56, %v6676_v26  ;;  %v6681_v12 = vunpack.i.l.bf16 %v7853_v54 }
 0x1e9   : > { %6489 = vmatpush3.bf16.msra.mxu0 %v6486_v1  ;;  %6131 = vmatprep.mubr.msk.f32.mxu1 %vm540_vm0, %v7606_v27 }
 0x1ea   : > { %6173 = vmatprep.mubr.msk.f32.mxu0 %vm540_vm0, %v7609_v39  ;;  %6495 = vmatprep.subr.bf16.mxu0 %v7793_v11  ;;  %v9475_v39 = vld [vmem:[#allocation26_spill] sm:$0xff] }
 0x1ec   : > { %6132 = vmatmul.mubr.msk.f32.gmra.mrb[30].mxu1 %vm540_vm0, %v9471_v18  ;;  %6174 = vmatmul.mubr.msk.f32.gmra.mrb[26].mxu0 %vm540_vm0, %v9472_v19 }
 0x1ed   : > { %6154 = vmatprep.mubr.msk.f32.mxu1 %vm540_vm0, %v7619_v41  ;;  %6176 = vmatprep.mubr.msk.f32.mxu0 %vm540_vm0, %v9473_v23  ;;  %v9479_v41 = vld [vmem:[#allocation30_spill] sm:$0xff] }
 0x1f0   : > { %6155 = vmatmul.mubr.msk.f32.vlgmr.msra.gmra.mrb[32].mxu1 %vm540_vm0, %v9474_v28  ;;  %6177 = vmatmul.mubr.msk.f32.gmra.mrb[28].mxu0 %vm540_vm0, %v9475_v39 }
 0x1f1   : > { %6485 = vmatpush3.bf16.xpose.msk.msra.mxu1 %vm7687_vm4, %v6480_v50  ;;  %6157 = vmatprep.mubr.msk.f32.mxu1 %vm540_vm0, %v9476_v29 }
 0x1f2   : > { %6179 = vmatprep.mubr.msk.f32.mxu0 %vm540_vm0, %v7632_v31  ;;  %6491 = vmatprep.subr.bf16.mxu1 %v6490_v24 }
 0x1f4   : > { %6158 = vmatmul.mubr.msk.f32.gmra.mrb[34].mxu1 %vm540_vm0, %v7636_v34  ;;  %6180 = vmatmul.mubr.msk.f32.gmra.mrb[30].mxu0 %vm540_vm0, %v7639_v32  ;;  %v7836_v34 = vpack.c.bf16 %v6672_v37, %v6671_v38  ;;  %v9480_v32 = vld [vmem:[#allocation22_spill] sm:$0xff] }
 0x1f5   : > { %6160 = vmatprep.mubr.msk.f32.mxu1 %vm540_vm0, %v9477_v30 }
 0x1f8   : > { %6161 = vmatmul.mubr.msk.f32.gmra.mrb[36].mxu1 %vm540_vm0, %v9478_v35 }
 0x1f9   : > { %6163 = vmatprep.mubr.msk.f32.mxu1 %vm540_vm0, %v7651_v40 }
 0x1fc   : > { %6164 = vmatmul.mubr.msk.f32.gmra.mrb[38].mxu1 %vm540_vm0, %v9479_v41 }
 0x1fd   : > { %6186 = vmatprep.mubr.msk.f32.mxu1 %vm540_vm0, %v7661_v14  ;;  %v6685_v14 = vpop.permute.xlu0 %6684 }
 0x1fe   : > { %v6687_v51 = vunpack.i.h.bf16 %v6685_v14  ;;  %v6686_v60 = vunpack.i.l.bf16 %v6685_v14 }
 0x200   : > { %6187 = vmatmul.mubr.msk.f32.vlgmr.msra.gmra.mrb[40].mxu1 %vm540_vm0, %v9480_v32  ;;  %v7857_v58 = vpack.c.bf16 %v6687_v51, %v6686_v60 }
 0x201   : > { %6493 = vmatpush3.bf16.msra.mxu1 %v6490_v24  ;;  %6189 = vmatprep.mubr.msk.f32.mxu1 %vm540_vm0, %v7664_v3 }
 0x202   : > { %6499 = vmatprep.subr.bf16.mxu1 %v7836_v34 }
 0x204   : > { %6190 = vmatmul.mubr.msk.f32.gmra.mrb[42].mxu1 %vm540_vm0, %v7667_v21 }
 0x205   : > { %6192 = vmatprep.mubr.msk.f32.mxu1 %vm540_vm0, %v7670_v4 }
 0x208   : > { %6193 = vmatmul.mubr.msk.f32.gmra.mrb[44].mxu1 %vm540_vm0, %v9481_v49 }
 0x209   : > { %6195 = vmatprep.mubr.msk.f32.mxu1 %vm540_vm0, %v9482_v55 }
 0x20c   : > { %6196 = vmatmul.mubr.msk.f32.gmra.mrb[46].mxu1 %vm540_vm0, %v9483_v47 }
 0x293   : > { %v6076_v2 = vpop.f32.mrb[8].mxu1 }
 0x294   : > { %v5604_v3 = vclamps-f32 %v6076_v2, 5.0  ;;  %v956_v20 = vpop.f32.mrb[9].mxu1 }
 0x295   : > { %v5603_v27 = vclamps-f32 %v956_v20, 5.0 }
 0x296   : > { %v2098_v40 = vmul.f32 1.442695, %v5604_v3 }
 0x297   : > { %v2096_v31 = vmul.f32 1.442695, %v5603_v27  ;;  %v6079_v21 = vpop.f32.mrb[10].mxu1 }
 0x298   : > { %6693 = vpow2.f32 %v2098_v40  ;;  %v5606_v4 = vclamps-f32 %v6079_v21, 5.0  ;;  %v966_v45 = vpop.f32.mrb[11].mxu1 }
 0x299   : > { %6695 = vpow2.f32 %v2096_v31  ;;  %v5605_v7 = vclamps-f32 %v966_v45, 5.0 }
 0x29a   : > { %v2102_v8 = vmul.f32 1.442695, %v5606_v4 }
 0x29b   : > { %v2100_v42 = vmul.f32 1.442695, %v5605_v7  ;;  %v6082_v43 = vpop.f32.mrb[12].mxu1  ;;  %v6108_v44 = vpop.f32.mrb[8].mxu0 }
 0x29c   : > { %6697 = vpow2.f32 %v2102_v8  ;;  %v5608_v33 = vclamps-f32 %v6082_v43, 5.0  ;;  %v5620_v25 = vclamps-f32 %v6108_v44, 5.0  ;;  %v976_v46 = vpop.f32.mrb[13].mxu1  ;;  %v1234_v22 = vpop.f32.mrb[9].mxu0  ;;  %v7879_v43 = vld [vmem:[%s7385_s20 + $0x28] sm:$0xff] }
 0x29d   : > { %6699 = vpow2.f32 %v2100_v42  ;;  %v5607_v48 = vclamps-f32 %v976_v46, 5.0  ;;  %v5619_v52 = vclamps-f32 %v1234_v22, 5.0 }
 0x29e   : > { %v2106_v57 = vmul.f32 1.442695, %v5608_v33  ;;  %v2130_v61 = vmul.f32 1.442695, %v5620_v25 }
 0x29f   : > { %v2104_v59 = vmul.f32 1.442695, %v5607_v48  ;;  %v2128_v62 = vmul.f32 1.442695, %v5619_v52  ;;  %v6085_v1 = vpop.f32.mrb[14].mxu1  ;;  %v6111_v5 = vpop.f32.mrb[10].mxu0 }
 0x2a0   : > { %6701 = vpow2.f32 %v2106_v57  ;;  %v5610_v63 = vclamps-f32 %v6085_v1, 5.0  ;;  %v5622_v50 = vclamps-f32 %v6111_v5, 5.0  ;;  %v986_v0 = vpop.f32.mrb[15].mxu1  ;;  %v1244_v6 = vpop.f32.mrb[11].mxu0 }
 0x2a1   : > { %6703 = vpow2.f32 %v2130_v61  ;;  %v5609_v15 = vclamps-f32 %v986_v0, 5.0  ;;  %v5621_v16 = vclamps-f32 %v1244_v6, 5.0 }
 0x2a2   : > { %v6694_v18 = vpop.eup %6693  ;;  %6705 = vpow2.f32 %v2104_v59  ;;  %v2110_v19 = vmul.f32 1.442695, %v5610_v63  ;;  %v2134_v23 = vmul.f32 1.442695, %v5622_v50 }
 0x2a3   : > { %v6696_v24 = vpop.eup %6695  ;;  %6707 = vpow2.f32 %v2128_v62  ;;  %v2108_v28 = vmul.f32 1.442695, %v5609_v15  ;;  %v2132_v39 = vmul.f32 1.442695, %v5621_v16  ;;  %v6092_v29 = vpop.f32.mrb[16].mxu1  ;;  %v2225_v35 = vmul.f32 %v6694_v18, %v7861_v10 }
 0x2a4   : > { %v6114_v30 = vpop.f32.mrb[12].mxu0  ;;  %6709 = vpow2.f32 %v2110_v19  ;;  %v5612_v36 = vclamps-f32 %v6092_v29, 5.0  ;;  %v1095_v38 = vpop.f32.mrb[17].mxu1  ;;  %v2224_v32 = vmul.f32 %v6696_v24, %v7865_v17 }
 0x2a5   : > { %v5624_v37 = vclamps-f32 %v6114_v30, 5.0  ;;  %v1254_v41 = vpop.f32.mrb[13].mxu0  ;;  %6711 = vpow2.f32 %v2134_v23  ;;  %v5611_v49 = vclamps-f32 %v1095_v38, 5.0  ;;  %v2292_v47 = vsel %vm2288_vm5, %v2225_v35, 0.0  ;;  %v7898_v38 = vld [vmem:[%s7385_s20 + $0x18] sm:$0xff] }
 0x2a6   : > { %v5623_v55 = vclamps-f32 %v1254_v41, 5.0  ;;  %v6698_v2 = vpop.eup %6697  ;;  %6713 = vpow2.f32 %v2108_v28  ;;  %v2114_v13 = vmul.f32 1.442695, %v5612_v36  ;;  %2293 = vadd.xlane.f32.xlu0 %v2292_v47  ;;  %6202 = vmatprep.mubr.msk.f32.mxu0 %vm2288_vm5, %v2224_v32  ;;  %v2289_v20 = vsel %vm2288_vm5, %v2224_v32, 0.0 }
 0x2a7   : > { %v2138_v3 = vmul.f32 1.442695, %v5624_v37  ;;  %v6700_v27 = vpop.eup %6699  ;;  %6715 = vpow2.f32 %v2132_v39  ;;  %v2112_v40 = vmul.f32 1.442695, %v5611_v49  ;;  %v6095_v21 = vpop.f32.mrb[18].mxu1  ;;  %6203 = vmatmul.mubr.msk.f32.vlgmr.msra.gmra.mrb[32].mxu0 %vm2288_vm5, %v2225_v35  ;;  %v2227_v4 = vmul.f32 %v6698_v2, %v7861_v10 }
 0x2a8   : > { %v2136_v31 = vmul.f32 1.442695, %v5623_v55  ;;  %v6117_v14 = vpop.f32.mrb[14].mxu0  ;;  %6717 = vpow2.f32 %v2114_v13  ;;  %v5614_v45 = vclamps-f32 %v6095_v21, 5.0  ;;  %6497 = vmatpush3.bf16.msra.mxu0 %v7793_v11  ;;  %v1105_v56 = vpop.f32.mrb[19].mxu1  ;;  %v2226_v26 = vmul.f32 %v6700_v27, %v7865_v17 }
 0x2a9   : > { %v5626_v7 = vclamps-f32 %v6117_v14, 5.0  ;;  %v1264_v8 = vpop.f32.mrb[15].mxu0  ;;  %6719 = vpow2.f32 %v2138_v3  ;;  %v5613_v51 = vclamps-f32 %v1105_v56, 5.0  ;;  %6503 = vmatprep.subr.bf16.mxu0 %v7855_v53  ;;  %v2298_v42 = vsel %vm2288_vm5, %v2227_v4, 0.0  ;;  %v7908_v14 = vld [vmem:[%s7385_s20 + $0x10] sm:$0xff] }
 0x2aa   : > { %v5625_v60 = vclamps-f32 %v1264_v8, 5.0  ;;  %v6702_v44 = vpop.eup %6701  ;;  %6721 = vpow2.f32 %v2112_v40  ;;  %v2118_v33 = vmul.f32 1.442695, %v5614_v45  ;;  %2290 = vadd.xlane.f32.xlu0 %v2289_v20  ;;  %6205 = vmatprep.mubr.msk.f32.mxu0 %vm2288_vm5, %v2226_v26  ;;  %v2295_v11 = vsel %vm2288_vm5, %v2226_v26, 0.0  ;;  %v7904_v20 = vld [vmem:[%s7385_s20 + $0x20] sm:$0xff] }
 0x2ab   : > { %v2142_v25 = vmul.f32 1.442695, %v5626_v7  ;;  %v6704_v46 = vpop.eup %6703  ;;  %6723 = vpow2.f32 %v2136_v31  ;;  %v2116_v22 = vmul.f32 1.442695, %v5613_v51  ;;  %v6098_v52 = vpop.f32.mrb[20].mxu1  ;;  %6206 = vmatmul.mubr.msk.f32.gmra.mrb[34].mxu0 %vm2288_vm5, %v2227_v4  ;;  %2296 = vadd.xlane.f32.xlu1 %v2295_v11  ;;  %v2229_v61 = vmul.f32 %v6702_v44, %v7861_v10 }
 0x2ac   : > { %v2140_v48 = vmul.f32 1.442695, %v5625_v60  ;;  %v6140_v57 = vpop.f32.mrb[16].mxu0  ;;  %v6706_v59 = vpop.eup %6705  ;;  %6725 = vpow2.f32 %v2118_v33  ;;  %v5616_v62 = vclamps-f32 %v6098_v52, 5.0  ;;  %v7886_v50 = vmul.f32 %v6704_v46, %v7879_v43 }
 0x2ad   : > { %v5636_v1 = vclamps-f32 %v6140_v57, 5.0  ;;  %v1115_v5 = vpop.f32.mrb[21].mxu1  ;;  %v1512_v63 = vpop.f32.mrb[17].mxu0  ;;  %6727 = vpow2.f32 %v2142_v25  ;;  %v2228_v16 = vmul.f32 %v6706_v59, %v7865_v17  ;;  %v2304_v47 = vsel %vm2288_vm5, %v2229_v61, 0.0 }
 0x2ae   : > { %v6708_v0 = vpop.eup %6707  ;;  %v5615_v6 = vclamps-f32 %v1115_v5, 5.0  ;;  %v5635_v15 = vclamps-f32 %v1512_v63, 5.0  ;;  %6729 = vpow2.f32 %v2116_v22  ;;  %v2122_v19 = vmul.f32 1.442695, %v5616_v62  ;;  %2299 = vadd.xlane.f32.xlu0 %v2298_v42 }
 0x2af   : > { %v6710_v18 = vpop.eup %6709  ;;  %v2162_v23 = vmul.f32 1.442695, %v5636_v1  ;;  %v2340_v24 = vsel %vm2288_vm5, %v7886_v50, 0.0  ;;  %6731 = vpow2.f32 %v2140_v48  ;;  %6208 = vmatprep.mubr.msk.f32.mxu0 %vm2288_vm5, %v2228_v16  ;;  %v6101_v30 = vpop.f32.mrb[22].mxu1  ;;  %v2301_v21 = vsel %vm2288_vm5, %v2228_v16, 0.0 }
 0x2b0   : > { %v7891_v28 = vpop.eup %6711  ;;  %v2120_v39 = vmul.f32 1.442695, %v5615_v6  ;;  %v2160_v29 = vmul.f32 1.442695, %v5635_v15  ;;  %2341 = vadd.xlane.f32.xlu1 %v2340_v24  ;;  %v6143_v35 = vpop.f32.mrb[18].mxu0  ;;  %v7895_v36 = vmul.f32 %v6710_v18, %v7861_v10  ;;  %6733 = vpow2.f32 %v2122_v19  ;;  %6209 = vmatmul.mubr.msk.f32.gmra.mrb[36].mxu0 %vm2288_vm5, %v2229_v61 }
 0x2b1   : > { %v6714_v37 = vpop.eup %6713  ;;  %v5618_v41 = vclamps-f32 %v6101_v30, 5.0  ;;  %v5638_v32 = vclamps-f32 %v6143_v35, 5.0  ;;  %v1125_v49 = vpop.f32.mrb[23].mxu1  ;;  %6735 = vpow2.f32 %v2162_v23  ;;  %v2240_v33 = vmul.f32 %v6708_v0, %v7904_v20 }
 0x2b2   : > { %v1522_v55 = vpop.f32.mrb[19].mxu0  ;;  %v6716_v2 = vpop.eup %6715  ;;  %v5617_v13 = vclamps-f32 %v1125_v49, 5.0  ;;  %v2230_v10 = vmul.f32 %v6714_v37, %v7865_v17  ;;  %6737 = vpow2.f32 %v2120_v39  ;;  %2305 = vadd.xlane.f32.xlu0 %v2304_v47  ;;  %v7935_v6 = vpack.c.bf16 %v6682_v9, %v6681_v12 }
 0x2b3   : > { %v5637_v3 = vclamps-f32 %v1522_v55, 5.0  ;;  %v6718_v27 = vpop.eup %6717  ;;  %v2126_v40 = vmul.f32 1.442695, %v5618_v41  ;;  %v2166_v31 = vmul.f32 1.442695, %v5638_v32  ;;  %6739 = vpow2.f32 %v2160_v29  ;;  %v6124_v17 = vpop.f32.mrb[24].mxu1 }
 0x2b4   : > { %v7910_v4 = vpop.eup %6719  ;;  %v7913_v45 = vmul.f32 %v6718_v27, %v7898_v38  ;;  %v2124_v7 = vmul.f32 1.442695, %v5617_v13  ;;  %6211 = vmatprep.mubr.msk.f32.mxu0 %vm2288_vm5, %v2230_v10  ;;  %2302 = vadd.xlane.f32.xlu1 %v2301_v21  ;;  %v6146_v8 = vpop.f32.mrb[20].mxu0  ;;  %v5628_v51 = vclamps-f32 %v6124_v17, 5.0  ;;  %v2337_v61 = vsel %vm2288_vm5, %v2240_v33, 0.0 }
 0x2b5   : > { %v2164_v56 = vmul.f32 1.442695, %v5637_v3  ;;  %v6722_v26 = vpop.eup %6721  ;;  %6741 = vpow2.f32 %v2126_v40  ;;  %6212 = vmatmul.mubr.msk.f32.gmra.mrb[38].mxu0 %vm2288_vm5, %v7895_v36  ;;  %v5640_v60 = vclamps-f32 %v6146_v8, 5.0  ;;  %v1373_v42 = vpop.f32.mrb[25].mxu1  ;;  %v2307_v5 = vsel %vm2288_vm5, %v2230_v10, 0.0 }
 0x2b6   : > { %v1532_v44 = vpop.f32.mrb[21].mxu0  ;;  %v7919_v25 = vpop.eup %6723  ;;  %6743 = vpow2.f32 %v2166_v31  ;;  %v5627_v11 = vclamps-f32 %v1373_v42, 5.0  ;;  %v7922_v22 = vmul.f32 %v6722_v26, %v7908_v14  ;;  %v2146_v52 = vmul.f32 1.442695, %v5628_v51  ;;  %6234 = vmatprep.mubr.msk.f32.mxu0 %vm2288_vm5, %v2240_v33  ;;  %2338 = vadd.xlane.f32.xlu0 %v2337_v61 }
 0x2b7   : > { %v5639_v46 = vclamps-f32 %v1532_v44, 5.0  ;;  %v6726_v48 = vpop.eup %6725  ;;  %6745 = vpow2.f32 %v2124_v7  ;;  %v2170_v57 = vmul.f32 1.442695, %v5640_v60  ;;  %v6127_v63 = vpop.f32.mrb[26].mxu1  ;;  %v2242_v19 = vmul.f32 %v6716_v2, %v7904_v20 }
 0x2b8   : > { %v7926_v59 = vpop.eup %6727  ;;  %6747 = vpow2.f32 %v2164_v56  ;;  %v2144_v62 = vmul.f32 1.442695, %v5627_v11  ;;  %6218 = vmatprep.mubr.msk.f32.mxu1 %vm2288_vm5, %v7922_v22  ;;  %2308 = vadd.xlane.f32.xlu1 %v2307_v5  ;;  %v5630_v15 = vclamps-f32 %v6127_v63, 5.0  ;;  %v6149_v16 = vpop.f32.mrb[22].mxu0  ;;  %v2310_v35 = vsel %vm2288_vm5, %v7895_v36, 0.0 }
 0x2b9   : > { %v2168_v1 = vmul.f32 1.442695, %v5639_v46  ;;  %v6730_v0 = vpop.eup %6729  ;;  %6749 = vpow2.f32 %v2146_v52  ;;  %6219 = vmatmul.mubr.msk.f32.vlgmr.msra.gmra.mrb[48].mxu1 %vm2288_vm5, %v7913_v45  ;;  %v1383_v18 = vpop.f32.mrb[27].mxu1  ;;  %v5642_v24 = vclamps-f32 %v6149_v16, 5.0  ;;  %6235 = vmatmul.mubr.msk.f32.vlgmr.msra.gmra.mrb[40].mxu0 %vm2288_vm5, %v7886_v50  ;;  %v2243_v41 = vmul.f32 %v7891_v28, %v7879_v43 }
 0x2ba   : > { %v7940_v23 = vpop.eup %6731  ;;  %6751 = vpow2.f32 %v2170_v57  ;;  %6501 = vmatpush3.bf16.msra.mxu1 %v7836_v34  ;;  %v5629_v54 = vclamps-f32 %v1383_v18, 5.0  ;;  %v1542_v9 = vpop.f32.mrb[23].mxu0  ;;  %v7946_v12 = vmul.f32 %v6730_v0, %v7908_v14  ;;  %v2150_v29 = vmul.f32 1.442695, %v5630_v15  ;;  %6505 = vmatpush3.bf16.msra.mxu0 %v7855_v53  ;;  %v7998_v18 = vld [vmem:[%s7385_s20 + $0x48] sm:$0xff] }
 0x2bb   : > { %v6734_v39 = vpop.eup %6733  ;;  %6753 = vpow2.f32 %v2144_v62  ;;  %v5641_v30 = vclamps-f32 %v1542_v9, 5.0  ;;  %6237 = vmatprep.mubr.msk.f32.mxu0 %vm2288_vm5, %v2242_v19  ;;  %v2174_v34 = vmul.f32 1.442695, %v5642_v24  ;;  %6507 = vmatprep.subr.bf16.mxu1 %v7935_v6  ;;  %v6130_v32 = vpop.f32.mrb[28].mxu1  ;;  %v2343_v36 = vsel %vm2288_vm5, %v2242_v19, 0.0  ;;  %v8001_v19 = vld [vmem:[%s7385_s20 + $0x38] sm:$0xff] }
 0x2bc   : > { %v7952_v37 = vpop.eup %6735  ;;  %6755 = vpow2.f32 %v2168_v1  ;;  %v2148_v50 = vmul.f32 1.442695, %v5629_v54  ;;  %6511 = vmatprep.subr.bf16.mxu0 %v7857_v58  ;;  %2311 = vadd.xlane.f32.xlu0 %v2310_v35  ;;  %v5632_v55 = vclamps-f32 %v6130_v32, 5.0  ;;  %v6172_v47 = vpop.f32.mrb[24].mxu0  ;;  %v7965_v3 = vmul.f32 %v6726_v48, %v7898_v38 }
 0x2bd   : > { %v6738_v53 = vpop.eup %6737  ;;  %6757 = vpow2.f32 %v2150_v29  ;;  %v2172_v49 = vmul.f32 1.442695, %v5641_v30  ;;  %6221 = vmatprep.mubr.msk.f32.mxu1 %vm2288_vm5, %v7946_v12  ;;  %v1393_v2 = vpop.f32.mrb[29].mxu1  ;;  %6238 = vmatmul.mubr.msk.f32.gmra.mrb[42].mxu0 %vm2288_vm5, %v2243_v41  ;;  %v5652_v28 = vclamps-f32 %v6172_v47, 5.0  ;;  %v2244_v7 = vmul.f32 %v7919_v25, %v7904_v20 }
 0x2be   : > { %v7961_v13 = vpop.eup %6739  ;;  %6759 = vpow2.f32 %v2174_v34  ;;  %2344 = vadd.xlane.f32.xlu1 %v2343_v36  ;;  %v5631_v10 = vclamps-f32 %v1393_v2, 5.0  ;;  %v1790_v27 = vpop.f32.mrb[25].mxu0  ;;  %v2154_v31 = vmul.f32 1.442695, %v5632_v55  ;;  %6222 = vmatmul.mubr.msk.f32.gmra.mrb[50].mxu1 %vm2288_vm5, %v7965_v3  ;;  %v2346_v51 = vsel %vm2288_vm5, %v2243_v41, 0.0  ;;  %v8018_v36 = vld [vmem:[%s7385_s20 + $0x40] sm:$0xff] }
 0x2bf   : > { %v7967_v40 = vpop.eup %6741  ;;  %6761 = vpow2.f32 %v2148_v50  ;;  %v5651_v21 = vclamps-f32 %v1790_v27, 5.0  ;;  %v7973_v17 = vpop.permute.xlu1 %6689  ;;  %v2194_v8 = vmul.f32 1.442695, %v5652_v28  ;;  %6240 = vmatprep.mubr.msk.f32.mxu0 %vm2288_vm5, %v2244_v7  ;;  %v7980_v33 = vmul.f32 %v6738_v53, %v7908_v14  ;;  %v8033_v2 = vld [vmem:[%s7385_s20 + $0x30] sm:$0xff] }
 0x2c0   : > { %v7971_v56 = vpop.eup %6743  ;;  %6763 = vpow2.f32 %v2172_v49  ;;  %v2152_v26 = vmul.f32 1.442695, %v5631_v10  ;;  %v6133_v60 = vpop.f32.mrb[30].mxu1  ;;  %2347 = vadd.xlane.f32.xlu0 %v2346_v51  ;;  %v2316_v25 = vsel %vm2288_vm5, %v7913_v45, 0.0  ;;  %v7987_v61 = vmul.f32 %v6734_v39, %v7898_v38 }
 0x2c1   : > { %v6746_v42 = vpop.eup %6745  ;;  %6765 = vpow2.f32 %v2154_v31  ;;  %v2192_v44 = vmul.f32 1.442695, %v5651_v21  ;;  %v6175_v11 = vpop.f32.mrb[26].mxu0  ;;  %v5634_v52 = vclamps-f32 %v6133_v60, 5.0  ;;  %6224 = vmatprep.mubr.msk.f32.mxu1 %vm2288_vm5, %v7980_v33  ;;  %v2245_v45 = vmul.f32 %v7910_v4, %v7879_v43 }
 0x2c2   : > { %v1403_v46 = vpop.f32.mrb[31].mxu1  ;;  %v7984_v48 = vpop.eup %6747  ;;  %6767 = vpow2.f32 %v2194_v8  ;;  %2317 = vadd.xlane.f32.xlu1 %v2316_v25  ;;  %v5654_v57 = vclamps-f32 %v6175_v11, 5.0  ;;  %v6692_v15 = vunpack.i.h.bf16 %v7973_v17  ;;  %v6691_v16 = vunpack.i.l.bf16 %v7973_v17  ;;  %6225 = vmatmul.mubr.msk.f32.gmra.mrb[52].mxu1 %vm2288_vm5, %v7987_v61 }
 0x2c3   : > { %v1800_v62 = vpop.f32.mrb[27].mxu0  ;;  %v6750_v1 = vpop.eup %6749  ;;  %6769 = vpow2.f32 %v2152_v26  ;;  %v5633_v5 = vclamps-f32 %v1403_v46, 5.0  ;;  %v2158_v9 = vmul.f32 1.442695, %v5634_v52  ;;  %6241 = vmatmul.mubr.msk.f32.gmra.mrb[44].mxu0 %vm2288_vm5, %v2245_v45  ;;  %v8008_v29 = vmul.f32 %v7940_v23, %v7904_v20 }
 0x2c4   : > { %v5653_v63 = vclamps-f32 %v1800_v62, 5.0  ;;  %v7993_v0 = vpop.eup %6751  ;;  %6771 = vpow2.f32 %v2192_v44  ;;  %v6156_v24 = vpop.f32.mrb[32].mxu1  ;;  %v2352_v30 = vsel %vm2288_vm5, %v2245_v45, 0.0  ;;  %v2198_v50 = vmul.f32 1.442695, %v5654_v57 }
 0x2c5   : > { %v6178_v54 = vpop.f32.mrb[28].mxu0  ;;  %v6754_v4 = vpop.eup %6753  ;;  %v2156_v39 = vmul.f32 1.442695, %v5633_v5  ;;  %2353 = vadd.xlane.f32.xlu0 %v2352_v30  ;;  %v8014_v41 = vmul.f32 %v6746_v42, %v7908_v14  ;;  %v2349_v32 = vsel %vm2288_vm5, %v2244_v7, 0.0  ;;  %v5644_v53 = vclamps-f32 %v6156_v24, 5.0  ;;  %6243 = vmatprep.mubr.msk.f32.mxu0 %vm2288_vm5, %v8008_v29 }
 0x2c6   : > { %v1651_v35 = vpop.f32.mrb[33].mxu1  ;;  %v8011_v34 = vpop.eup %6755  ;;  %v2196_v20 = vmul.f32 1.442695, %v5653_v63  ;;  %2350 = vadd.xlane.f32.xlu1 %v2349_v32  ;;  %v5656_v23 = vclamps-f32 %v6178_v54, 5.0  ;;  %v8026_v47 = vmul.f32 %v7967_v40, %v7898_v38  ;;  %v8030_v14 = vmul.f32 %v7926_v59, %v7879_v43 }
 0x2c7   : > { %v1810_v49 = vpop.f32.mrb[29].mxu0  ;;  %v8020_v55 = vpop.eup %6757  ;;  %v8039_v10 = vmul.f32 %v7952_v37, %v7998_v18  ;;  %v8042_v27 = vmul.f32 %v6750_v1, %v8001_v19  ;;  %6773 = vpow2.f32 %v2156_v39  ;;  %6227 = vmatprep.mubr.msk.f32.mxu1 %vm2288_vm5, %v8014_v41  ;;  %v5643_v38 = vclamps-f32 %v1651_v35, 5.0 }
 0x2c8   : > { %v8035_v28 = vpop.eup %6759  ;;  %v6159_v40 = vpop.f32.mrb[34].mxu1  ;;  %6775 = vpow2.f32 %v2158_v9  ;;  %v2178_v59 = vmul.f32 1.442695, %v5644_v53  ;;  %6228 = vmatmul.mubr.msk.f32.gmra.mrb[54].mxu1 %vm2288_vm5, %v8026_v47  ;;  %6244 = vmatmul.mubr.msk.f32.gmra.mrb[46].mxu0 %vm2288_vm5, %v8030_v14  ;;  %v8052_v37 = vmul.f32 %v7961_v13, %v8018_v36  ;;  %v2313_v21 = vsel %vm2288_vm5, %v7922_v22, 0.0 }
 0x2c9   : > { %v6181_v31 = vpop.f32.mrb[30].mxu0  ;;  %v6762_v43 = vpop.eup %6761  ;;  %6777 = vpow2.f32 %v2198_v50  ;;  %v2176_v51 = vmul.f32 1.442695, %v5643_v38  ;;  %v5655_v60 = vclamps-f32 %v1810_v49, 5.0  ;;  %2314 = vadd.xlane.f32.xlu0 %v2313_v21  ;;  %v8061_v42 = vmul.f32 %v6754_v4, %v8033_v2 }
 0x2ca   : > { %v1661_v7 = vpop.f32.mrb[35].mxu1  ;;  %v8056_v8 = vpop.f32.mrb[31].mxu0  ;;  %6779 = vpow2.f32 %v2196_v20  ;;  %v2202_v25 = vmul.f32 1.442695, %v5656_v23  ;;  %6266 = vmatprep.mubr.msk.f32.mxu0 %vm2288_vm5, %v8052_v37  ;;  %v2319_v22 = vsel %vm2288_vm5, %v7946_v12, 0.0  ;;  %v5646_v13 = vclamps-f32 %v6159_v40, 5.0 }
 0x2cb   : > { %v8058_v26 = vpop.eup %6763  ;;  %6781 = vpow2.f32 %v2176_v51  ;;  %6250 = vmatprep.mubr.msk.f32.mxu1 %vm2288_vm5, %v8061_v42  ;;  %2320 = vadd.xlane.f32.xlu1 %v2319_v22  ;;  %v5645_v46 = vclamps-f32 %v1661_v7, 5.0  ;;  %v6162_v52 = vpop.f32.mrb[36].mxu1  ;;  %v8075_v62 = vpack.c.bf16 %v6692_v15, %v6691_v16  ;;  %v5658_v1 = vclamps-f32 %v6181_v31, 5.0  ;;  %v8165_v22 = vld [vmem:[%s7385_s20 + $0x68] sm:$0xff] }
 0x2cc   : > { %v6766_v44 = vpop.eup %6765  ;;  %6783 = vpow2.f32 %v2178_v59  ;;  %6251 = vmatmul.mubr.msk.f32.vlgmr.msra.gmra.mrb[56].mxu1 %vm2288_vm5, %v8042_v27  ;;  %6267 = vmatmul.mubr.msk.f32.vlgmr.msra.gmra.mrb[48].mxu0 %vm2288_vm5, %v8039_v10  ;;  %v8083_v12 = vmul.f32 %v7984_v48, %v8018_v36  ;;  %v1671_v45 = vpop.f32.mrb[37].mxu1  ;;  %v2200_v63 = vmul.f32 1.442695, %v5655_v60  ;;  %v2182_v24 = vmul.f32 1.442695, %v5646_v13  ;;  %v8168_v13 = vld [vmem:[%s7385_s20 + $0x58] sm:$0xff] }
 0x2cd   : > { %v8067_v11 = vpop.eup %6767  ;;  %6509 = vmatpush3.bf16.msra.mxu1 %v7935_v6  ;;  %6513 = vmatpush3.bf16.msra.mxu0 %v7857_v58  ;;  %v2180_v17 = vmul.f32 1.442695, %v5645_v46  ;;  %v8090_v15 = vmul.f32 %v6762_v43, %v8033_v2  ;;  %6785 = vpow2.f32 %v2202_v25  ;;  %v2322_v48 = vsel %vm2288_vm5, %v7965_v3, 0.0 }
 0x2ce   : > { %v6770_v57 = vpop.eup %6769  ;;  %6269 = vmatprep.mubr.msk.f32.mxu0 %vm2288_vm5, %v8083_v12  ;;  %6515 = vmatprep.subr.bf16.mxu1 %v8075_v62  ;;  %v5648_v16 = vclamps-f32 %v6162_v52, 5.0  ;;  %v8099_v54 = vmul.f32 %v8020_v55, %v8001_v19  ;;  %v5657_v58 = vclamps-f32 %v8056_v8, 5.0  ;;  %v2355_v6 = vsel %vm2288_vm5, %v8008_v29, 0.0 }
 0x2cf   : > { %v8085_v5 = vpop.eup %6771  ;;  %2323 = vadd.xlane.f32.xlu0 %v2322_v48  ;;  %6253 = vmatprep.mubr.msk.f32.mxu1 %vm2288_vm5, %v8090_v15  ;;  %v8108_v4 = vmul.f32 %v7971_v56, %v7998_v18  ;;  %v5647_v9 = vclamps-f32 %v1671_v45, 5.0  ;;  %v6165_v3 = vpop.f32.mrb[38].mxu1  ;;  %v2206_v39 = vmul.f32 1.442695, %v5658_v1  ;;  %6787 = vpow2.f32 %v2180_v17 }
 0x2d0   : > { %2356 = vadd.xlane.f32.xlu1 %v2355_v6  ;;  %6254 = vmatmul.mubr.msk.f32.gmra.mrb[58].mxu1 %vm2288_vm5, %v8099_v54  ;;  %v8114_v30 = vmul.f32 %v8011_v34, %v8018_v36  ;;  %v8117_v35 = vmul.f32 %v6770_v57, %v8033_v2  ;;  %v1681_v29 = vpop.f32.mrb[39].mxu1  ;;  %6789 = vpow2.f32 %v2182_v24  ;;  %v2186_v56 = vmul.f32 1.442695, %v5648_v16 }
 0x2d1   : > { %v6774_v50 = vpop.eup %6773  ;;  %6270 = vmatmul.mubr.msk.f32.gmra.mrb[50].mxu0 %vm2288_vm5, %v8108_v4  ;;  %v2184_v32 = vmul.f32 1.442695, %v5647_v9  ;;  %v5650_v53 = vclamps-f32 %v6165_v3, 5.0  ;;  %6791 = vpow2.f32 %v2200_v63  ;;  %v2358_v34 = vsel %vm2288_vm5, %v8030_v14, 0.0 }
 0x2d2   : > { %v6776_v49 = vpop.eup %6775  ;;  %6272 = vmatprep.mubr.msk.f32.mxu0 %vm2288_vm5, %v8114_v30  ;;  %6256 = vmatprep.mubr.msk.f32.mxu1 %vm2288_vm5, %v8117_v35  ;;  %v8128_v55 = vmul.f32 %v6766_v44, %v8001_v19  ;;  %v5649_v20 = vclamps-f32 %v1681_v29, 5.0  ;;  %v2204_v38 = vmul.f32 1.442695, %v5657_v58  ;;  %v2388_v40 = vsel %vm2288_vm5, %v8039_v10, 0.0  ;;  %v8153_v44 = vld [vmem:[%s7385_s20 + $0x60] sm:$0xff] }
 0x2d3   : > { %v8130_v23 = vpop.eup %6777  ;;  %6793 = vpow2.f32 %v2184_v32  ;;  %2359 = vadd.xlane.f32.xlu0 %v2358_v34  ;;  %v8136_v31 = vmul.f32 %v7993_v0, %v7998_v18  ;;  %v6188_v14 = vpop.f32.mrb[40].mxu1  ;;  %v8142_v21 = vmul.f32 %v8058_v26, %v8018_v36  ;;  %v8145_v7 = vmul.f32 %v6774_v50, %v8033_v2  ;;  %v8148_v0 = vld [vmem:[%s7385_s20 + $0x50] sm:$0xff] }
 0x2d4   : > { %v6780_v43 = vpop.eup %6779  ;;  %6795 = vpow2.f32 %v2206_v39  ;;  %2389 = vadd.xlane.f32.xlu1 %v2388_v40  ;;  %6257 = vmatmul.mubr.msk.f32.gmra.mrb[60].mxu1 %vm2288_vm5, %v8128_v55  ;;  %v2188_v59 = vmul.f32 1.442695, %v5649_v20  ;;  %v1929_v10 = vpop.f32.mrb[41].mxu1  ;;  %v2190_v51 = vmul.f32 1.442695, %v5650_v53  ;;  %v5660_v60 = vclamps-f32 %v6188_v14, 5.0 }
 0x2d5   : > { %v6782_v8 = vpop.eup %6781  ;;  %6797 = vpow2.f32 %v2186_v56  ;;  %6273 = vmatmul.mubr.msk.f32.gmra.mrb[52].mxu0 %vm2288_vm5, %v8136_v31  ;;  %v2328_v36 = vsel %vm2288_vm5, %v7987_v61, 0.0  ;;  %6259 = vmatprep.mubr.msk.f32.mxu1 %vm2288_vm5, %v8145_v7  ;;  %v8162_v2 = vmul.f32 %v6776_v49, %v8001_v19  ;;  %v5659_v26 = vclamps-f32 %v1929_v10, 5.0 }
 0x2d6   : > { %v6784_v25 = vpop.eup %6783  ;;  %6799 = vpow2.f32 %v2188_v59  ;;  %6275 = vmatprep.mubr.msk.f32.mxu0 %vm2288_vm5, %v8142_v21  ;;  %v2325_v46 = vsel %vm2288_vm5, %v7980_v33, 0.0  ;;  %v8174_v52 = vmul.f32 %v8035_v28, %v7998_v18  ;;  %v8177_v61 = vmul.f32 %v6782_v8, %v8148_v0 }
 0x2d7   : > { %6801 = vpow2.f32 %v2204_v38  ;;  %2329 = vadd.xlane.f32.xlu0 %v2328_v36  ;;  %v6191_v57 = vpop.f32.mrb[42].mxu1  ;;  %v8179_v19 = vpop.eup %6785  ;;  %v2210_v1 = vmul.f32 1.442695, %v5660_v60  ;;  %v2208_v45 = vmul.f32 1.442695, %v5659_v26  ;;  %v8185_v63 = vmul.f32 %v8085_v5, %v8153_v44  ;;  %v534_v36 = vld [vmem:[%s7385_s20 + $0x70] sm:$0xff] }
 0x2d8   : > { %2326 = vadd.xlane.f32.xlu1 %v2325_v46  ;;  %6260 = vmatmul.mubr.msk.f32.gmra.mrb[62].mxu1 %vm2288_vm5, %v8162_v2  ;;  %v5662_v33 = vclamps-f32 %v6191_v57, 5.0  ;;  %v1939_v24 = vpop.f32.mrb[43].mxu1  ;;  %6803 = vpow2.f32 %v2190_v51  ;;  %v8192_v17 = vmul.f32 %v6784_v25, %v8168_v13  ;;  %v2385_v5 = vsel %vm2288_vm5, %v8052_v37, 0.0 }
 0x2d9   : > { %6276 = vmatmul.mubr.msk.f32.gmra.mrb[54].mxu0 %vm2288_vm5, %v8174_v52  ;;  %6282 = vmatprep.mubr.msk.f32.mxu1 %vm2288_vm5, %v8177_v61  ;;  %v5661_v18 = vclamps-f32 %v1939_v24, 5.0  ;;  %v6788_v28 = vpop.eup %6787  ;;  %6805 = vpow2.f32 %v2208_v45  ;;  %v8200_v16 = vmul.f32 %v8067_v11, %v8165_v22  ;;  %v2331_v58 = vsel %vm2288_vm5, %v8014_v41, 0.0 }
 0x2da   : > { %6298 = vmatprep.mubr.msk.f32.mxu0 %vm2288_vm5, %v8185_v63  ;;  %v6790_v48 = vpop.eup %6789  ;;  %v8205_v9 = vmul.f32 %v6788_v28, %v8148_v0  ;;  %6807 = vpow2.f32 %v2210_v1  ;;  %v2214_v29 = vmul.f32 1.442695, %v5662_v33  ;;  %v8210_v37 = vmul.f32 %v6780_v43, %v8153_v44 }
 0x2db   : > { %2386 = vadd.xlane.f32.xlu0 %v2385_v5  ;;  %v2212_v6 = vmul.f32 1.442695, %v5661_v18  ;;  %v6194_v3 = vpop.f32.mrb[44].mxu1  ;;  %v6792_v39 = vpop.eup %6791  ;;  %v2334_v53 = vsel %vm2288_vm5, %v8026_v47, 0.0  ;;  %v8222_v49 = vmul.f32 %v6790_v48, %v8168_v13  ;;  %v8231_v38 = vmul.f32 %v8130_v23, %v8165_v22  ;;  %v535_v18 = vld [vmem:[%s7385_s20 + $0x78] sm:$0xff]  ;;  %s7063_s20 = scalar_lea.vmem %s7062_s0, 4096 }
 0x2dc   : > { %2332 = vadd.xlane.f32.xlu1 %v2331_v58  ;;  %6283 = vmatmul.mubr.msk.f32.vlgmr.msra.gmra.mrb[64].mxu1 %vm2288_vm5, %v8192_v17  ;;  %v5664_v11 = vclamps-f32 %v6194_v3, 5.0  ;;  %v1949_v50 = vpop.f32.mrb[45].mxu1  ;;  %v8236_v59 = vmul.f32 %v6792_v39, %v8153_v44  ;;  %v2394_v60 = vsel %vm2288_vm5, %v8108_v4, 0.0  ;;  %v8255_v46 = vmul.f32 %v8179_v19, %v8165_v22 }
 0x2dd   : > { %v6794_v56 = vpop.eup %6793  ;;  %6299 = vmatmul.mubr.msk.f32.vlgmr.msra.gmra.mrb[56].mxu0 %vm2288_vm5, %v8200_v16  ;;  %6517 = vmatpush3.bf16.msra.mxu1 %v8075_v62  ;;  %6809 = vpow2.f32 %v2212_v6  ;;  %v5663_v41 = vclamps-f32 %v1949_v50, 5.0  ;;  %v2391_v62 = vsel %vm2288_vm5, %v8083_v12, 0.0  ;;  %v2400_v33 = vsel %vm2288_vm5, %v8136_v31, 0.0 }
 0x2de   : > { %v6796_v32 = vpop.eup %6795  ;;  %6301 = vmatprep.mubr.msk.f32.mxu0 %vm2288_vm5, %v8210_v37  ;;  %6285 = vmatprep.mubr.msk.f32.mxu1 %vm2288_vm5, %v8205_v9  ;;  %v8225_v34 = vmul.f32 %v6794_v56, %v8148_v0  ;;  %6811 = vpow2.f32 %v2214_v29  ;;  %v2218_v43 = vmul.f32 1.442695, %v5664_v11  ;;  %v2397_v5 = vsel %vm2288_vm5, %v8114_v30, 0.0 }
 0x2df   : > { %v6798_v20 = vpop.eup %6797  ;;  %2335 = vadd.xlane.f32.xlu0 %v2334_v53  ;;  %v2216_v40 = vmul.f32 1.442695, %v5663_v41  ;;  %v6197_v47 = vpop.f32.mrb[46].mxu1  ;;  %v8279_v28 = vmul.f32 %v6796_v32, %v8165_v22  ;;  %v2361_v22 = vsel %vm2288_vm5, %v8061_v42, 0.0  ;;  %v2367_v58 = vsel %vm2288_vm5, %v8090_v15, 0.0 }
 0x2e0   : > { %v6800_v14 = vpop.eup %6799  ;;  %2392 = vadd.xlane.f32.xlu1 %v2391_v62  ;;  %6286 = vmatmul.mubr.msk.f32.gmra.mrb[66].mxu1 %vm2288_vm5, %v8222_v49  ;;  %v1959_v10 = vpop.f32.mrb[47].mxu1  ;;  %v5666_v12 = vclamps-f32 %v6197_v47, 5.0  ;;  %v8250_v25 = vmul.f32 %v6798_v20, %v8168_v13  ;;  %v2370_v39 = vsel %vm2288_vm5, %v8099_v54, 0.0  ;;  %v2403_v15 = vsel %vm2288_vm5, %v8142_v21, 0.0 }
 0x2e1   : > { %v6802_v8 = vpop.eup %6801  ;;  %6302 = vmatmul.mubr.msk.f32.gmra.mrb[58].mxu0 %vm2288_vm5, %v8231_v38  ;;  %6813 = vpow2.f32 %v2216_v40  ;;  %6288 = vmatprep.mubr.msk.f32.mxu1 %vm2288_vm5, %v8225_v34  ;;  %v5665_v23 = vclamps-f32 %v1959_v10, 5.0  ;;  %v8243_v51 = vmul.f32 %v6800_v14, %v8148_v0  ;;  %v2364_v0 = vsel %vm2288_vm5, %v8042_v27, 0.0  ;;  %v3974_v40 = vld [vmem:[%s9402_s3] sm:$0xff]  ;;  %v3976_v14 = vld [vmem:[%s9402_s3 + $0x10] sm:$0xff] }
 0x2e2   : > { %6304 = vmatprep.mubr.msk.f32.mxu0 %vm2288_vm5, %v8236_v59  ;;  %v6804_v26 = vpop.eup %6803  ;;  %6815 = vpow2.f32 %v2218_v43  ;;  %v8262_v4 = vmul.f32 %v6802_v8, %v8153_v44  ;;  %v2222_v45 = vmul.f32 1.442695, %v5666_v12  ;;  %v2406_v50 = vsel %vm2288_vm5, %v8174_v52, 0.0  ;;  %v3977_v43 = vld [vmem:[%s9402_s3 + $0x18] sm:$0xff] }
 0x2e3   : > { %2395 = vadd.xlane.f32.xlu0 %v2394_v60  ;;  %v2220_v57 = vmul.f32 1.442695, %v5665_v23  ;;  %v6806_v1 = vpop.eup %6805  ;;  %v8275_v44 = vmul.f32 %v6804_v26, %v8168_v13  ;;  %v2436_v41 = vsel %vm2288_vm5, %v8200_v16, 0.0  ;;  %v2376_v21 = vsel %vm2288_vm5, %v8128_v55, 0.0 }
 0x2e4   : > { %2365 = vadd.xlane.f32.xlu1 %v2364_v0  ;;  %6289 = vmatmul.mubr.msk.f32.gmra.mrb[68].mxu1 %vm2288_vm5, %v8250_v25  ;;  %v8268_v27 = vmul.f32 %v6806_v1, %v534_v36  ;;  %v6808_v19 = vpop.eup %6807  ;;  %v2373_v52 = vsel %vm2288_vm5, %v8117_v35, 0.0  ;;  %v2433_v16 = vsel %vm2288_vm5, %v8185_v63, 0.0  ;;  %v2379_v53 = vsel %vm2288_vm5, %v8145_v7, 0.0 }
 0x2e5   : > { %6305 = vmatmul.mubr.msk.f32.gmra.mrb[60].mxu0 %vm2288_vm5, %v8255_v46  ;;  %6817 = vpow2.f32 %v2220_v57  ;;  %6291 = vmatprep.mubr.msk.f32.mxu1 %vm2288_vm5, %v8243_v51  ;;  %v8291_v48 = vmul.f32 %v6808_v19, %v535_v18  ;;  %v2382_v55 = vsel %vm2288_vm5, %v8162_v2, 0.0  ;;  %v2439_v20 = vsel %vm2288_vm5, %v8210_v37, 0.0 }
 0x2e6   : > { %6307 = vmatprep.mubr.msk.f32.mxu0 %vm2288_vm5, %v8262_v4  ;;  %6819 = vpow2.f32 %v2222_v45  ;;  %v2442_v35 = vsel %vm2288_vm5, %v8231_v38, 0.0  ;;  %v2412_v63 = vsel %vm2288_vm5, %v8192_v17, 0.0  ;;  %v2448_v7 = vsel %vm2288_vm5, %v8255_v46, 0.0 }
 0x2e7   : > { %v6810_v24 = vpop.eup %6809  ;;  %2401 = vadd.xlane.f32.xlu0 %v2400_v33  ;;  %v2445_v2 = vsel %vm2288_vm5, %v8236_v59, 0.0  ;;  %v2409_v37 = vsel %vm2288_vm5, %v8177_v61, 0.0  ;;  %v2415_v62 = vsel %vm2288_vm5, %v8205_v9, 0.0  ;;  %v2418_v17 = vsel %vm2288_vm5, %v8222_v49, 0.0  ;;  %v3975_v61 = vld [vmem:[%s9402_s3 + $0x8] sm:$0xff] }
 0x2e8   : > { %2398 = vadd.xlane.f32.xlu1 %v2397_v5  ;;  %6292 = vmatmul.mubr.msk.f32.gmra.mrb[70].mxu1 %vm2288_vm5, %v8275_v44  ;;  %v8289_v31 = vmul.f32 %v6810_v24, %v534_v36  ;;  %v6812_v13 = vpop.eup %6811  ;;  %v2451_v38 = vsel %vm2288_vm5, %v8262_v4, 0.0  ;;  %v6518_v47 = vpack.c.bf16 %v3975_v61, %v3974_v40  ;;  %v2454_v9 = vsel %vm2288_vm5, %v8279_v28, 0.0 }
 0x2e9   : > { %6308 = vmatmul.mubr.msk.f32.gmra.mrb[62].mxu0 %vm2288_vm5, %v8279_v28  ;;  %6314 = vmatprep.mubr.msk.f32.mxu1 %vm2288_vm5, %v8268_v27  ;;  %v8305_v29 = vmul.f32 %v6812_v13, %v535_v18  ;;  %v2421_v49 = vsel %vm2288_vm5, %v8225_v34, 0.0  ;;  %v6522_v59 = vpack.c.bf16 %v3977_v43, %v3976_v14  ;;  %v2424_v10 = vsel %vm2288_vm5, %v8250_v25, 0.0 }
 0x2ea   : > { %6519 = vmatprep.subr.bf16.mxu0 %v6518_v47  ;;  %v2427_v8 = vsel %vm2288_vm5, %v8243_v51, 0.0  ;;  %v2430_v34 = vsel %vm2288_vm5, %v8275_v44, 0.0  ;;  %v2460_v12 = vsel %vm2288_vm5, %v8291_v48, 0.0  ;;  %v2457_v23 = vsel %vm2288_vm5, %v8268_v27, 0.0 }
 0x2eb   : > { %v6814_v30 = vpop.eup %6813  ;;  %2362 = vadd.xlane.f32.xlu0 %v2361_v22  ;;  %6521 = vmatpush3.bf16.msra.mxu0 %v6518_v47  ;;  %v2463_v60 = vsel %vm2288_vm5, %v8289_v31, 0.0  ;;  %v2466_v51 = vsel %vm2288_vm5, %v8305_v29, 0.0 }
 0x2ec   : > { %2368 = vadd.xlane.f32.xlu1 %v2367_v58  ;;  %6315 = vmatmul.mubr.msk.f32.vlgmr.msra.gmra.mrb[72].mxu1 %vm2288_vm5, %v8291_v48  ;;  %v8301_v6 = vmul.f32 %v6814_v30, %v534_v36  ;;  %v6816_v3 = vpop.eup %6815 }
 0x2ed   : > { %6317 = vmatprep.mubr.msk.f32.mxu1 %vm2288_vm5, %v8289_v31  ;;  %v8317_v54 = vmul.f32 %v6816_v3, %v535_v18  ;;  %6523 = vmatprep.subr.bf16.mxu0 %v6522_v59 }
 0x2ee   : > { %v2469_v25 = vsel %vm2288_vm5, %v8301_v6, 0.0 }
 0x2ef   : > { %v6818_v42 = vpop.eup %6817  ;;  %2371 = vadd.xlane.f32.xlu0 %v2370_v39  ;;  %6525 = vmatpush3.bf16.msra.mxu0 %v6522_v59 }
 0x2f0   : > { %2404 = vadd.xlane.f32.xlu1 %v2403_v15  ;;  %6318 = vmatmul.mubr.msk.f32.gmra.mrb[74].mxu1 %vm2288_vm5, %v8305_v29  ;;  %v8313_v11 = vmul.f32 %v6818_v42, %v534_v36  ;;  %v6820_v56 = vpop.eup %6819  ;;  %v2472_v36 = vsel %vm2288_vm5, %v8317_v54, 0.0 }
 0x2f1   : > { %6320 = vmatprep.mubr.msk.f32.mxu1 %vm2288_vm5, %v8301_v6  ;;  %v8327_v32 = vmul.f32 %v6820_v56, %v535_v18 }
 0x2f2   : > { %v2475_v26 = vsel %vm2288_vm5, %v8313_v11, 0.0 }
 0x2f3   : > { %2407 = vadd.xlane.f32.xlu0 %v2406_v50  ;;  %v2478_v46 = vsel %vm2288_vm5, %v8327_v32, 0.0 }
 0x2f4   : > { %2437 = vadd.xlane.f32.xlu1 %v2436_v41  ;;  %6321 = vmatmul.mubr.msk.f32.gmra.mrb[76].mxu1 %vm2288_vm5, %v8317_v54 }
 0x2f5   : > { %6323 = vmatprep.mubr.msk.f32.mxu1 %vm2288_vm5, %v8313_v11 }
 0x2f7   : > { %2377 = vadd.xlane.f32.xlu0 %v2376_v21 }
 0x2f8   : > { %2374 = vadd.xlane.f32.xlu1 %v2373_v52  ;;  %6324 = vmatmul.mubr.msk.f32.gmra.mrb[78].mxu1 %vm2288_vm5, %v8327_v32 }
 0x2fb   : > { %2434 = vadd.xlane.f32.xlu0 %v2433_v16 }
 0x2fc   : > { %2380 = vadd.xlane.f32.xlu1 %v2379_v53 }
 0x2ff   : > { %2383 = vadd.xlane.f32.xlu0 %v2382_v55 }
 0x300   : > { %2440 = vadd.xlane.f32.xlu1 %v2439_v20 }
 0x303   : > { %2443 = vadd.xlane.f32.xlu0 %v2442_v35 }
 0x304   : > { %2413 = vadd.xlane.f32.xlu1 %v2412_v63 }
 0x307   : > { %2449 = vadd.xlane.f32.xlu0 %v2448_v7 }
 0x308   : > { %2446 = vadd.xlane.f32.xlu1 %v2445_v2 }
 0x30b   : > { %2410 = vadd.xlane.f32.xlu0 %v2409_v37 }
 0x30c   : > { %2416 = vadd.xlane.f32.xlu1 %v2415_v62 }
 0x30f   : > { %2419 = vadd.xlane.f32.xlu0 %v2418_v17 }
 0x310   : > { %2452 = vadd.xlane.f32.xlu1 %v2451_v38 }
 0x313   : > { %2455 = vadd.xlane.f32.xlu0 %v2454_v9 }
 0x314   : > { %2422 = vadd.xlane.f32.xlu1 %v2421_v49 }
 0x317   : > { %2425 = vadd.xlane.f32.xlu0 %v2424_v10  ;;  %v9484_v10 = vld [vmem:[#allocation18_spill] sm:$0xff] }
 0x318   : > { %2428 = vadd.xlane.f32.xlu1 %v2427_v8  ;;  %v9485_v8 = vld [vmem:[#allocation17_spill] sm:$0xff] }
 0x31b   : > { %2431 = vadd.xlane.f32.xlu0 %v2430_v34  ;;  %v3760_v34 = vrot.slane %v9485_v8, %v9484_v10 }
 0x31c   : > { %2461 = vadd.xlane.f32.xlu1 %v2460_v12 }
 0x31f   : > { %2458 = vadd.xlane.f32.xlu0 %v2457_v23 }
 0x320   : > { %2464 = vadd.xlane.f32.xlu1 %v2463_v60 }
 0x323   : > { %2467 = vadd.xlane.f32.xlu0 %v2466_v51 }
 0x324   : > { %2470 = vadd.xlane.f32.xlu1 %v2469_v25 }
 0x327   : > { %2473 = vadd.xlane.f32.xlu0 %v2472_v36 }
 0x328   : > { %2476 = vadd.xlane.f32.xlu1 %v2475_v26  ;;  %v3761_v26 = vcombine.high %v3760_v34, %v3760_v34 }
 0x32b   : > { %2479 = vadd.xlane.f32.xlu0 %v2478_v46 }
 0x333   : > { %v2294_v0 = vpop.xlane.xlu0 %2293 }
 0x334   : > { %v3562_v3 = vadd.f32 1e-06, %v2294_v0 }
 0x336   : > { %6821 = vrcp.f32 %v3562_v3 }
 0x337   : > { %v2291_v57 = vpop.xlane.xlu0 %2290 }
 0x338   : > { %v2297_v1 = vpop.xlane.xlu1 %2296  ;;  %v3561_v29 = vadd.f32 1e-06, %v2291_v57 }
 0x339   : > { %v3563_v42 = vadd.f32 1e-06, %v2297_v1 }
 0x33a   : > { %6823 = vrcp.f32 %v3561_v29 }
 0x33b   : > { %v2300_v4 = vpop.xlane.xlu0 %2299  ;;  %6825 = vrcp.f32 %v3563_v42 }
 0x33c   : > { %v3564_v15 = vadd.f32 1e-06, %v2300_v4  ;;  %v3768_v4 = vrot.slane %v3760_v34, %v9484_v10 }
 0x33d   : > { %v2342_v45 = vpop.xlane.xlu1 %2341 }
 0x33e   : > { %v3578_v50 = vadd.f32 1e-06, %v2342_v45  ;;  %6827 = vrcp.f32 %v3564_v15  ;;  %v3776_v15 = vcombine.high %v3768_v4, %v3768_v4 }
 0x33f   : > { %v2306_v27 = vpop.xlane.xlu0 %2305 }
 0x340   : > { %v3566_v56 = vadd.f32 1e-06, %v2306_v27  ;;  %6829 = vrcp.f32 %v3578_v50  ;;  %v6822_v37 = vpop.eup %6821 }
 0x341   : > { %v2303_v19 = vpop.xlane.xlu1 %2302 }
 0x342   : > { %v3565_v41 = vadd.f32 1e-06, %v2303_v19  ;;  %6831 = vrcp.f32 %v3566_v56 }
 0x343   : > { %v2339_v33 = vpop.xlane.xlu0 %2338 }
 0x344   : > { %v3577_v21 = vadd.f32 1e-06, %v2339_v33  ;;  %6833 = vrcp.f32 %v3565_v41  ;;  %v6824_v17 = vpop.eup %6823 }
 0x345   : > { %v2309_v44 = vpop.xlane.xlu1 %2308  ;;  %v8395_v61 = vpop.eup %6825 }
 0x346   : > { %v3567_v52 = vadd.f32 1e-06, %v2309_v44  ;;  %6835 = vrcp.f32 %v3577_v21 }
 0x348   : > { %6837 = vrcp.f32 %v3567_v52  ;;  %v6828_v49 = vpop.eup %6827 }
 0x349   : > { %v2312_v24 = vpop.xlane.xlu0 %2311 }
 0x34a   : > { %v3568_v53 = vadd.f32 1e-06, %v2312_v24  ;;  %v8397_v43 = vpop.eup %6829 }
 0x34b   : > { %v2345_v18 = vpop.xlane.xlu1 %2344 }
 0x34c   : > { %v3579_v55 = vadd.f32 1e-06, %v2345_v18  ;;  %6839 = vrcp.f32 %v3568_v53  ;;  %v8401_v12 = vpop.eup %6831  ;;  %v8415_v18 = vrot.slane %v3761_v26, %v9484_v10 }
 0x34d   : > { %v2348_v28 = vpop.xlane.xlu0 %2347 }
 0x34e   : > { %v3580_v20 = vadd.f32 1e-06, %v2348_v28  ;;  %6841 = vrcp.f32 %v3579_v55  ;;  %v8403_v51 = vpop.eup %6833 }
 0x34f   : > { %v2318_v5 = vpop.xlane.xlu1 %2317 }
 0x350   : > { %v3570_v63 = vadd.f32 1e-06, %v2318_v5  ;;  %6843 = vrcp.f32 %v3580_v20  ;;  %v8405_v46 = vpop.eup %6835 }
 0x352   : > { %v2354_v31 = vpop.xlane.xlu0 %2353  ;;  %6845 = vrcp.f32 %v3570_v63  ;;  %v8407_v57 = vpop.eup %6837 }
 0x353   : > { %v2351_v13 = vpop.xlane.xlu1 %2350  ;;  %v3582_v2 = vadd.f32 1e-06, %v2354_v31 }
 0x354   : > { %v3581_v62 = vadd.f32 1e-06, %v2351_v13 }
 0x355   : > { %6847 = vrcp.f32 %v3582_v2 }
 0x356   : > { %v2315_v48 = vpop.xlane.xlu0 %2314  ;;  %6849 = vrcp.f32 %v3581_v62  ;;  %v8410_v45 = vpop.eup %6839 }
 0x357   : > { %v3569_v38 = vadd.f32 1e-06, %v2315_v48 }
 0x358   : > { %v2321_v22 = vpop.xlane.xlu1 %2320  ;;  %v8412_v33 = vpop.eup %6841 }
 0x359   : > { %v3571_v47 = vadd.f32 1e-06, %v2321_v22  ;;  %6851 = vrcp.f32 %v3569_v38 }
 0x35a   : > { %v8417_v28 = vpop.eup %6843 }
 0x35b   : > { %6853 = vrcp.f32 %v3571_v47  ;;  %v3777_v47 = vcombine.high %v8415_v18, %v8415_v18 }
 0x35c   : > { %v2324_v30 = vpop.xlane.xlu0 %2323  ;;  %v8419_v13 = vpop.eup %6845 }
 0x35d   : > { %v2357_v58 = vpop.xlane.xlu1 %2356  ;;  %v3572_v14 = vadd.f32 1e-06, %v2324_v30  ;;  %v9486_v30 = vld [vmem:[#allocation19_spill] sm:$0xff] }
 0x35e   : > { %v3583_v59 = vadd.f32 1e-06, %v2357_v58  ;;  %v8422_v58 = vrot.slane %v3768_v4, %v9486_v30  ;;  %v8430_v56 = vrot.slane %v8415_v18, %v9486_v30 }
 0x35f   : > { %6855 = vrcp.f32 %v3572_v14  ;;  %v8424_v3 = vpop.eup %6847 }
 0x360   : > { %v2360_v6 = vpop.xlane.xlu0 %2359  ;;  %6857 = vrcp.f32 %v3583_v59 }
 0x361   : > { %v2390_v39 = vpop.xlane.xlu1 %2389  ;;  %v3584_v23 = vadd.f32 1e-06, %v2360_v6 }
 0x362   : > { %v3594_v25 = vadd.f32 1e-06, %v2390_v39 }
 0x363   : > { %6859 = vrcp.f32 %v3584_v23 }
 0x364   : > { %v2330_v11 = vpop.xlane.xlu0 %2329  ;;  %6861 = vrcp.f32 %v3594_v25 }
 0x365   : > { %v2327_v54 = vpop.xlane.xlu1 %2326  ;;  %v3574_v0 = vadd.f32 1e-06, %v2330_v11  ;;  %v8426_v11 = vpop.eup %6849 }
 0x366   : > { %v3573_v1 = vadd.f32 1e-06, %v2327_v54  ;;  %v8432_v41 = vpop.eup %6851 }
 0x367   : > { %6863 = vrcp.f32 %v3574_v0  ;;  %v8434_v52 = vpop.eup %6853 }
 0x368   : > { %v2387_v32 = vpop.xlane.xlu0 %2386  ;;  %6865 = vrcp.f32 %v3573_v1 }
 0x369   : > { %v2333_v16 = vpop.xlane.xlu1 %2332  ;;  %v3593_v27 = vadd.f32 1e-06, %v2387_v32 }
 0x36a   : > { %v3575_v44 = vadd.f32 1e-06, %v2333_v16 }
 0x36b   : > { %6867 = vrcp.f32 %v3593_v27 }
 0x36c   : > { %v2336_v35 = vpop.xlane.xlu0 %2335  ;;  %6869 = vrcp.f32 %v3575_v44 }
 0x36d   : > { %v2393_v7 = vpop.xlane.xlu1 %2392  ;;  %v3576_v5 = vadd.f32 1e-06, %v2336_v35  ;;  %v8437_v35 = vpop.eup %6855 }
 0x36e   : > { %v3595_v48 = vadd.f32 1e-06, %v2393_v7  ;;  %v8444_v62 = vpop.eup %6857 }
 0x36f   : > { %6871 = vrcp.f32 %v3576_v5 }
 0x370   : > { %v2396_v40 = vpop.xlane.xlu0 %2395  ;;  %6873 = vrcp.f32 %v3595_v48 }
 0x371   : > { %v2366_v9 = vpop.xlane.xlu1 %2365  ;;  %v3596_v39 = vadd.f32 1e-06, %v2396_v40 }
 0x372   : > { %v3586_v50 = vadd.f32 1e-06, %v2366_v9  ;;  %v8449_v9 = vpop.eup %6859 }
 0x373   : > { %6875 = vrcp.f32 %v3596_v39  ;;  %v8452_v59 = vpop.eup %6861 }
 0x374   : > { %v2402_v60 = vpop.xlane.xlu0 %2401  ;;  %6877 = vrcp.f32 %v3586_v50 }
 0x375   : > { %v2399_v36 = vpop.xlane.xlu1 %2398  ;;  %v3598_v21 = vadd.f32 1e-06, %v2402_v60  ;;  %v8456_v60 = vpop.eup %6863 }
 0x376   : > { %v3597_v16 = vadd.f32 1e-06, %v2399_v36  ;;  %v8461_v27 = vpop.eup %6865 }
 0x377   : > { %6879 = vrcp.f32 %v3598_v21  ;;  %v8464_v5 = vpop.eup %6867 }
 0x378   : > { %v2363_v19 = vpop.xlane.xlu0 %2362  ;;  %6881 = vrcp.f32 %v3597_v16 }
 0x379   : > { %v2369_v24 = vpop.xlane.xlu1 %2368 }
 0x37a   : > { %v6204_v31 = vpop.f32.mrb[32].mxu0 }
 0x37b   : > { %v3690_v22 = vmul.f32 %v6822_v37, %v6204_v31  ;;  %v2577_v6 = vpop.f32.mrb[33].mxu0  ;;  %v8442_v37 = vrot.slane %v3776_v15, %v9486_v30 }
 0x37c   : > { %v2372_v29 = vpop.xlane.xlu0 %2371  ;;  %v3689_v42 = vmul.f32 %v6824_v17, %v2577_v6  ;;  %v3585_v17 = vadd.f32 1e-06, %v2363_v19  ;;  %v8470_v6 = vpop.eup %6869 }
 0x37d   : > { %v2405_v54 = vpop.xlane.xlu1 %2404  ;;  %v3799_v53 = vmul.f32 %v8422_v58, %v3690_v22  ;;  %v3588_v14 = vadd.f32 1e-06, %v2372_v29  ;;  %v8468_v22 = vrot.slane %v3777_v47, %v9486_v30 }
 0x37e   : > { %v6207_v32 = vpop.f32.mrb[34].mxu0  ;;  %v3798_v63 = vmul.f32 %v8422_v58, %v3689_v42  ;;  %v3599_v10 = vadd.f32 1e-06, %v2405_v54  ;;  %6883 = vrcp.f32 %v3585_v17  ;;  %v8473_v42 = vpop.eup %6871 }
 0x37f   : > { %v3692_v55 = vmul.f32 %v6828_v49, %v6207_v32  ;;  %v2587_v20 = vpop.f32.mrb[35].mxu0  ;;  %v3587_v49 = vadd.f32 1e-06, %v2369_v24  ;;  %v3869_v8 = vsel %vm540_vm0, %v3799_v53, 0.0  ;;  %v8477_v32 = vpop.eup %6873 }
 0x380   : > { %v2408_v7 = vpop.xlane.xlu0 %2407  ;;  %v3691_v2 = vmul.f32 %v8395_v61, %v2587_v20  ;;  %v3862_v25 = vsel %vm540_vm0, %v3798_v63, 0.0  ;;  %v8481_v63 = vpop.eup %6875 }
 0x381   : > { %v2438_v38 = vpop.xlane.xlu1 %2437  ;;  %v3801_v40 = vmul.f32 %v8430_v56, %v3692_v55  ;;  %v3600_v19 = vadd.f32 1e-06, %v2408_v7  ;;  %6885 = vrcp.f32 %v3587_v49  ;;  %v8484_v17 = vpop.eup %6877 }
 0x382   : > { %v3800_v61 = vmul.f32 %v8430_v56, %v3691_v2  ;;  %v3610_v31 = vadd.f32 1e-06, %v2438_v38  ;;  %6887 = vrcp.f32 %v3588_v14  ;;  %v8487_v47 = vpop.eup %6879 }
 0x383   : > { %v3870_v34 = vsel %vm540_vm0, %v3801_v40, 0.0  ;;  %v6210_v23 = vpop.f32.mrb[36].mxu0  ;;  %6889 = vrcp.f32 %v3599_v10 }
 0x384   : > { %v3871_v36 = vadd.f32 %v3870_v34, %v3869_v8  ;;  %v3863_v26 = vsel %vm540_vm0, %v3800_v61, 0.0  ;;  %v2378_v0 = vpop.xlane.xlu0 %2377  ;;  %v3694_v1 = vmul.f32 %v8401_v12, %v6210_v23  ;;  %v2597_v4 = vpop.f32.mrb[37].mxu0  ;;  %6891 = vrcp.f32 %v3600_v19 }
 0x385   : > { %v3864_v44 = vadd.f32 %v3863_v26, %v3862_v25  ;;  %v2375_v24 = vpop.xlane.xlu1 %2374  ;;  %v3693_v18 = vmul.f32 %v8403_v51, %v2597_v4  ;;  %v3590_v12 = vadd.f32 1e-06, %v2378_v0  ;;  %6893 = vrcp.f32 %v3610_v31  ;;  %v8491_v8 = vpop.eup %6881 }
 0x386   : > { %v3803_v48 = vmul.f32 %v8442_v37, %v3694_v1  ;;  %v3589_v51 = vadd.f32 1e-06, %v2375_v24 }
 0x387   : > { %v3802_v39 = vmul.f32 %v8442_v37, %v3693_v18  ;;  %6895 = vrcp.f32 %v3590_v12 }
 0x388   : > { %v6213_v29 = vpop.f32.mrb[38].mxu0  ;;  %v3872_v15 = vsel %vm540_vm0, %v3803_v48, 0.0  ;;  %v2435_v50 = vpop.xlane.xlu0 %2434  ;;  %6897 = vrcp.f32 %v3589_v51 }
 0x389   : > { %v3696_v54 = vmul.f32 %v8410_v45, %v6213_v29  ;;  %v2607_v21 = vpop.f32.mrb[39].mxu0  ;;  %v3873_v16 = vadd.f32 %v3872_v15, %v3871_v36  ;;  %v3865_v53 = vsel %vm540_vm0, %v3802_v39, 0.0  ;;  %v2381_v55 = vpop.xlane.xlu1 %2380  ;;  %v3609_v45 = vadd.f32 1e-06, %v2435_v50 }
 0x38a   : > { %v3695_v20 = vmul.f32 %v8407_v57, %v2607_v21  ;;  %v3866_v7 = vadd.f32 %v3865_v53, %v3864_v44  ;;  %v3591_v49 = vadd.f32 1e-06, %v2381_v55  ;;  %v8497_v18 = vpop.eup %6883 }
 0x38b   : > { %v3805_v2 = vmul.f32 %v8468_v22, %v3696_v54  ;;  %6899 = vrcp.f32 %v3609_v45  ;;  %v8501_v48 = vpop.eup %6885 }
 0x38c   : > { %v3804_v38 = vmul.f32 %v8468_v22, %v3695_v20  ;;  %v6220_v40 = vpop.f32.mrb[48].mxu1  ;;  %v2384_v57 = vpop.xlane.xlu0 %2383  ;;  %6901 = vrcp.f32 %v3591_v49 }
 0x38d   : > { %v3874_v14 = vsel %vm540_vm0, %v3805_v2, 0.0  ;;  %v3698_v61 = vmul.f32 %v8419_v13, %v6220_v40  ;;  %v6236_v10 = vpop.f32.mrb[40].mxu0  ;;  %v3592_v25 = vadd.f32 1e-06, %v2384_v57  ;;  %v2441_v36 = vpop.xlane.xlu1 %2440 }
 0x38e   : > { %v3875_v34 = vadd.f32 %v3874_v14, %v3873_v16  ;;  %v3867_v23 = vsel %vm540_vm0, %v3804_v38, 0.0  ;;  %v3706_v26 = vmul.f32 %v8397_v43, %v6236_v10  ;;  %v2847_v0 = vpop.f32.mrb[41].mxu0  ;;  %v3611_v4 = vadd.f32 1e-06, %v2441_v36  ;;  %v2712_v24 = vpop.f32.mrb[49].mxu1 }
 0x38f   : > { %v3868_v1 = vadd.f32 %v3867_v23, %v3866_v7  ;;  %v3807_v19 = vmul.f32 %v8422_v58, %v3698_v61  ;;  %v3705_v44 = vmul.f32 %v8405_v46, %v2847_v0  ;;  %v3697_v31 = vmul.f32 %v8432_v41, %v2712_v24  ;;  %v8505_v29 = vpop.eup %6887 }
 0x390   : > { %v3815_v13 = vmul.f32 %v8422_v58, %v3706_v26  ;;  %v2444_v12 = vpop.xlane.xlu0 %2443  ;;  %v6239_v39 = vpop.f32.mrb[42].mxu0  ;;  %6903 = vrcp.f32 %v3592_v25 }
 0x391   : > { %v3814_v43 = vmul.f32 %v8422_v58, %v3705_v44  ;;  %6334 = vmatprep.mubr.msk.f32.mxu0 %vm540_vm0, %v3868_v1  ;;  %v3612_v46 = vadd.f32 1e-06, %v2444_v12  ;;  %v3806_v51 = vmul.f32 %v8422_v58, %v3697_v31  ;;  %v2414_v15 = vpop.xlane.xlu1 %2413  ;;  %v3708_v50 = vmul.f32 %v8417_v28, %v6239_v39  ;;  %v2857_v54 = vpop.f32.mrb[43].mxu0 }
 0x392   : > { %6335 = vmatmul.mubr.msk.f32.vlgmr.msra.gmra.mrb[64].mxu0 %vm540_vm0, %v3875_v34  ;;  %v8510_v41 = vpop.eup %6889  ;;  %6905 = vrcp.f32 %v3611_v4  ;;  %v3883_v21 = vsel %vm540_vm0, %v3807_v19, 0.0  ;;  %v6223_v16 = vpop.f32.mrb[50].mxu1  ;;  %v3707_v53 = vmul.f32 %v8412_v33, %v2857_v54  ;;  %v3897_v20 = vsel %vm540_vm0, %v3815_v13, 0.0 }
 0x393   : > { %v8514_v55 = vpop.eup %6891  ;;  %v3602_v7 = vadd.f32 1e-06, %v2414_v15  ;;  %v3700_v2 = vmul.f32 %v8437_v35, %v6223_v16  ;;  %v3817_v28 = vmul.f32 %v8430_v56, %v3708_v50  ;;  %v2722_v45 = vpop.f32.mrb[51].mxu1  ;;  %v3890_v40 = vsel %vm540_vm0, %v3814_v43, 0.0 }
 0x394   : > { %v8519_v38 = vpop.eup %6893  ;;  %6907 = vrcp.f32 %v3612_v46  ;;  %v3816_v49 = vmul.f32 %v8430_v56, %v3707_v53  ;;  %v2450_v14 = vpop.xlane.xlu0 %2449  ;;  %v3699_v33 = vmul.f32 %v8434_v52, %v2722_v45  ;;  %v3876_v61 = vsel %vm540_vm0, %v3806_v51, 0.0 }
 0x395   : > { %v8524_v57 = vpop.eup %6895  ;;  %v3809_v10 = vmul.f32 %v8430_v56, %v3700_v2  ;;  %v3898_v35 = vsel %vm540_vm0, %v3817_v28, 0.0  ;;  %v3614_v34 = vadd.f32 1e-06, %v2450_v14  ;;  %v2447_v23 = vpop.xlane.xlu1 %2446  ;;  %6909 = vrcp.f32 %v3602_v7 }
 0x396   : > { %v8529_v25 = vpop.eup %6897  ;;  %v3899_v36 = vadd.f32 %v3898_v35, %v3897_v20  ;;  %v3891_v26 = vsel %vm540_vm0, %v3816_v49, 0.0  ;;  %v3808_v0 = vmul.f32 %v8430_v56, %v3699_v33  ;;  %v3613_v1 = vadd.f32 1e-06, %v2447_v23  ;;  %v6226_v4 = vpop.f32.mrb[52].mxu1 }
 0x397   : > { %v3884_v52 = vsel %vm540_vm0, %v3809_v10, 0.0  ;;  %v3892_v19 = vadd.f32 %v3891_v26, %v3890_v40  ;;  %v3702_v44 = vmul.f32 %v8456_v60, %v6226_v4  ;;  %v6242_v24 = vpop.f32.mrb[44].mxu0  ;;  %v2732_v13 = vpop.f32.mrb[53].mxu1  ;;  %6911 = vrcp.f32 %v3614_v34 }
 0x398   : > { %v3885_v31 = vadd.f32 %v3884_v52, %v3883_v21  ;;  %v3877_v43 = vsel %vm540_vm0, %v3808_v0, 0.0  ;;  %v3710_v12 = vmul.f32 %v8424_v3, %v6242_v24  ;;  %v2867_v39 = vpop.f32.mrb[45].mxu0  ;;  %v2411_v46 = vpop.xlane.xlu0 %2410  ;;  %6913 = vrcp.f32 %v3613_v1 }
 0x399   : > { %v8537_v51 = vpop.eup %6899  ;;  %v3878_v15 = vadd.f32 %v3877_v43, %v3876_v61  ;;  %v3811_v50 = vmul.f32 %v8442_v37, %v3702_v44  ;;  %v3709_v54 = vmul.f32 %v8426_v11, %v2867_v39  ;;  %v3601_v16 = vadd.f32 1e-06, %v2411_v46  ;;  %v2417_v53 = vpop.xlane.xlu1 %2416 }
 0x39a   : > { %v8541_v60 = vpop.eup %6901  ;;  %v3819_v21 = vmul.f32 %v8442_v37, %v3710_v12  ;;  %v3701_v20 = vmul.f32 %v8461_v27, %v2732_v13  ;;  %v3603_v7 = vadd.f32 1e-06, %v2417_v53 }
 0x39b   : > { %v8545_v3 = vpop.eup %6903  ;;  %v3886_v2 = vsel %vm540_vm0, %v3811_v50, 0.0  ;;  %v3818_v28 = vmul.f32 %v8442_v37, %v3709_v54  ;;  %6915 = vrcp.f32 %v3601_v16  ;;  %v6229_v45 = vpop.f32.mrb[54].mxu1 }
 0x39c   : > { %v6245_v40 = vpop.f32.mrb[46].mxu0  ;;  %v8549_v11 = vpop.eup %6905  ;;  %v3887_v49 = vadd.f32 %v3886_v2, %v3885_v31  ;;  %v3900_v14 = vsel %vm540_vm0, %v3819_v21, 0.0  ;;  %v3810_v33 = vmul.f32 %v8442_v37, %v3701_v20  ;;  %6917 = vrcp.f32 %v3603_v7 }
 0x39d   : > { %v2877_v61 = vpop.f32.mrb[47].mxu0  ;;  %v2420_v27 = vpop.xlane.xlu0 %2419  ;;  %v3901_v10 = vadd.f32 %v3900_v14, %v3899_v36  ;;  %v3893_v35 = vsel %vm540_vm0, %v3818_v28, 0.0  ;;  %v3704_v34 = vmul.f32 %v8473_v42, %v6229_v45  ;;  %v3712_v23 = vmul.f32 %v8449_v9, %v6245_v40 }
 0x39e   : > { %v2742_v26 = vpop.f32.mrb[55].mxu1  ;;  %v2453_v0 = vpop.xlane.xlu1 %2452  ;;  %v3894_v4 = vadd.f32 %v3893_v35, %v3892_v19  ;;  %v3879_v52 = vsel %vm540_vm0, %v3810_v33, 0.0  ;;  %v3711_v44 = vmul.f32 %v8444_v62, %v2877_v61  ;;  %v3604_v24 = vadd.f32 1e-06, %v2420_v27 }
 0x39f   : > { %v8556_v1 = vpop.eup %6907  ;;  %v3880_v13 = vadd.f32 %v3879_v52, %v3878_v15  ;;  %v3813_v31 = vmul.f32 %v8468_v22, %v3704_v34  ;;  %v3821_v36 = vmul.f32 %v8468_v22, %v3712_v23  ;;  %v3703_v43 = vmul.f32 %v8470_v6, %v2742_v26  ;;  %v6252_v42 = vpop.f32.mrb[56].mxu1 }
 0x3a0   : > { %v6268_v12 = vpop.f32.mrb[48].mxu0  ;;  %v3820_v9 = vmul.f32 %v8468_v22, %v3711_v44  ;;  %6919 = vrcp.f32 %v3604_v24  ;;  %v3615_v39 = vadd.f32 1e-06, %v2453_v0  ;;  %v3714_v19 = vmul.f32 %v8484_v17, %v6252_v42  ;;  %v8565_v54 = vpop.eup %6909 }
 0x3a1   : > { %v3117_v46 = vpop.f32.mrb[49].mxu0  ;;  %v2456_v50 = vpop.xlane.xlu0 %2455  ;;  %v3888_v62 = vsel %vm540_vm0, %v3813_v31, 0.0  ;;  %v3902_v15 = vsel %vm540_vm0, %v3821_v36, 0.0  ;;  %v3812_v16 = vmul.f32 %v8468_v22, %v3703_v43  ;;  %v3722_v6 = vmul.f32 %v8452_v59, %v6268_v12 }
 0x3a2   : > { %v2982_v53 = vpop.f32.mrb[57].mxu1  ;;  %v2423_v21 = vpop.xlane.xlu1 %2422  ;;  %v3889_v7 = vadd.f32 %v3888_v62, %v3887_v49  ;;  %v3903_v2 = vadd.f32 %v3902_v15, %v3901_v10  ;;  %v3895_v17 = vsel %vm540_vm0, %v3820_v9, 0.0  ;;  %6921 = vrcp.f32 %v3615_v39 }
 0x3a3   : > { %v8571_v20 = vpop.eup %6911  ;;  %v3896_v28 = vadd.f32 %v3895_v17, %v3894_v4  ;;  %v3881_v45 = vsel %vm540_vm0, %v3812_v16, 0.0  ;;  %v3823_v40 = vmul.f32 %v8422_v58, %v3714_v19  ;;  %v3831_v14 = vmul.f32 %v8422_v58, %v3722_v6  ;;  %v6255_v33 = vpop.f32.mrb[58].mxu1 }
 0x3a4   : > { %v8577_v61 = vpop.eup %6913  ;;  %v3882_v59 = vadd.f32 %v3881_v45, %v3880_v13  ;;  %v3721_v27 = vmul.f32 %v8464_v5, %v3117_v46  ;;  %v3616_v35 = vadd.f32 1e-06, %v2456_v50  ;;  %v3713_v49 = vmul.f32 %v8497_v18, %v2982_v53  ;;  %v6271_v10 = vpop.f32.mrb[50].mxu0 }
 0x3a5   : > { %v2426_v34 = vpop.xlane.xlu0 %2425  ;;  %v8581_v23 = vpop.eup %6915  ;;  %v3911_v26 = vsel %vm540_vm0, %v3823_v40, 0.0  ;;  %v3925_v0 = vsel %vm540_vm0, %v3831_v14, 0.0  ;;  %v3605_v4 = vadd.f32 1e-06, %v2423_v21  ;;  %v3716_v52 = vmul.f32 %v8505_v29, %v6255_v33 }
 0x3a6   : > { %v3127_v44 = vpop.f32.mrb[51].mxu0  ;;  %v2992_v24 = vpop.f32.mrb[59].mxu1  ;;  %v3830_v5 = vmul.f32 %v8422_v58, %v3721_v27  ;;  %6923 = vrcp.f32 %v3616_v35  ;;  %v3822_v18 = vmul.f32 %v8422_v58, %v3713_v49  ;;  %v3724_v13 = vmul.f32 %v8481_v63, %v6271_v10  ;;  %6337 = vmatprep.mubr.msk.f32.mxu0 %vm540_vm0, %v3882_v59 }
 0x3a7   : > { %v8586_v31 = vpop.eup %6917  ;;  %v2429_v36 = vpop.xlane.xlu1 %2428  ;;  %6925 = vrcp.f32 %v3605_v4  ;;  %v3825_v43 = vmul.f32 %v8430_v56, %v3716_v52  ;;  %v3723_v42 = vmul.f32 %v8477_v32, %v3127_v44  ;;  %v3606_v29 = vadd.f32 1e-06, %v2426_v34  ;;  %6338 = vmatmul.mubr.msk.f32.gmra.mrb[66].mxu0 %vm540_vm0, %v3889_v7 }
 0x3a8   : > { %v6258_v12 = vpop.f32.mrb[60].mxu1  ;;  %v3918_v9 = vsel %vm540_vm0, %v3830_v5, 0.0  ;;  %v3904_v39 = vsel %vm540_vm0, %v3822_v18, 0.0  ;;  %v3833_v19 = vmul.f32 %v8430_v56, %v3724_v13  ;;  %v3715_v63 = vmul.f32 %v8501_v48, %v2992_v24  ;;  %6340 = vmatprep.mubr.msk.f32.mxu0 %vm540_vm0, %v3896_v28  ;;  %v6274_v46 = vpop.f32.mrb[52].mxu0 }
 0x3a9   : > { %v2432_v50 = vpop.xlane.xlu0 %2431  ;;  %v3912_v62 = vsel %vm540_vm0, %v3825_v43, 0.0  ;;  %v3832_v32 = vmul.f32 %v8430_v56, %v3723_v42  ;;  %6927 = vrcp.f32 %v3606_v29  ;;  %v3607_v15 = vadd.f32 1e-06, %v2429_v36  ;;  %v3137_v16 = vpop.f32.mrb[53].mxu0 }
 0x3aa   : > { %v3002_v6 = vpop.f32.mrb[61].mxu1  ;;  %v8602_v53 = vpop.eup %6919  ;;  %v3913_v21 = vadd.f32 %v3912_v62, %v3911_v26  ;;  %v3926_v7 = vsel %vm540_vm0, %v3833_v19, 0.0  ;;  %v3824_v17 = vmul.f32 %v8430_v56, %v3715_v63  ;;  %v3718_v48 = vmul.f32 %v8524_v57, %v6258_v12 }
 0x3ab   : > { %v2462_v28 = vpop.xlane.xlu1 %2461  ;;  %v3927_v45 = vadd.f32 %v3926_v7, %v3925_v0  ;;  %v3919_v40 = vsel %vm540_vm0, %v3832_v32, 0.0  ;;  %6929 = vrcp.f32 %v3607_v15  ;;  %v3726_v14 = vmul.f32 %v8487_v47, %v6274_v46  ;;  %6341 = vmatmul.mubr.msk.f32.gmra.mrb[68].mxu0 %vm540_vm0, %v3903_v2  ;;  %v6261_v33 = vpop.f32.mrb[62].mxu1 }
 0x3ac   : > { %v8610_v59 = vpop.eup %6921  ;;  %v3920_v27 = vadd.f32 %v3919_v40, %v3918_v9  ;;  %v3905_v35 = vsel %vm540_vm0, %v3824_v17, 0.0  ;;  %v3827_v49 = vmul.f32 %v8442_v37, %v3718_v48  ;;  %v3725_v10 = vmul.f32 %v8491_v8, %v3137_v16  ;;  %v6277_v57 = vpop.f32.mrb[54].mxu0 }
 0x3ad   : > { %v2459_v34 = vpop.xlane.xlu0 %2458  ;;  %v3906_v26 = vadd.f32 %v3905_v35, %v3904_v39  ;;  %v3835_v0 = vmul.f32 %v8442_v37, %v3726_v14  ;;  %v3608_v4 = vadd.f32 1e-06, %v2432_v50  ;;  %v3717_v47 = vmul.f32 %v8529_v25, %v3002_v6  ;;  %v3147_v52 = vpop.f32.mrb[55].mxu0 }
 0x3ae   : > { %v3012_v2 = vpop.f32.mrb[63].mxu1  ;;  %v3914_v44 = vsel %vm540_vm0, %v3827_v49, 0.0  ;;  %v3834_v24 = vmul.f32 %v8442_v37, %v3725_v10  ;;  %v3618_v5 = vadd.f32 1e-06, %v2462_v28  ;;  %v3720_v18 = vmul.f32 %v8545_v3, %v6261_v33 }
 0x3af   : > { %v2465_v13 = vpop.xlane.xlu1 %2464  ;;  %v3915_v36 = vadd.f32 %v3914_v44, %v3913_v21  ;;  %v3928_v8 = vsel %vm540_vm0, %v3835_v0, 0.0  ;;  %6931 = vrcp.f32 %v3608_v4  ;;  %v3826_v43 = vmul.f32 %v8442_v37, %v3717_v47  ;;  %v6284_v42 = vpop.f32.mrb[64].mxu1 }
 0x3b0   : > { %v8622_v29 = vpop.eup %6923  ;;  %v3929_v25 = vadd.f32 %v3928_v8, %v3927_v45  ;;  %v3921_v12 = vsel %vm540_vm0, %v3834_v24, 0.0  ;;  %6933 = vrcp.f32 %v3618_v5  ;;  %v3829_v9 = vmul.f32 %v8468_v22, %v3720_v18  ;;  %v6300_v39 = vpop.f32.mrb[56].mxu0 }
 0x3b1   : > { %v2468_v19 = vpop.xlane.xlu0 %2467  ;;  %v8626_v63 = vpop.eup %6925  ;;  %v3922_v3 = vadd.f32 %v3921_v12, %v3920_v27  ;;  %v3907_v46 = vsel %vm540_vm0, %v3826_v43, 0.0  ;;  %v3728_v50 = vmul.f32 %v8514_v55, %v6277_v57  ;;  %v3727_v62 = vmul.f32 %v8510_v41, %v3147_v52 }
 0x3b2   : > { %v3387_v32 = vpop.f32.mrb[57].mxu0  ;;  %v3252_v15 = vpop.f32.mrb[65].mxu1  ;;  %v3908_v16 = vadd.f32 %v3907_v46, %v3906_v26  ;;  %v3916_v6 = vsel %vm540_vm0, %v3829_v9, 0.0  ;;  %v3617_v21 = vadd.f32 1e-06, %v2459_v34  ;;  %v3719_v7 = vmul.f32 %v8541_v60, %v3012_v2 }
 0x3b3   : > { %v2471_v17 = vpop.xlane.xlu1 %2470  ;;  %v6928_v48 = vpop.eup %6927  ;;  %v3917_v28 = vadd.f32 %v3916_v6, %v3915_v36  ;;  %v3837_v45 = vmul.f32 %v8468_v22, %v3728_v50  ;;  %v3836_v40 = vmul.f32 %v8468_v22, %v3727_v62  ;;  %v3619_v14 = vadd.f32 1e-06, %v2465_v13 }
 0x3b4   : > { %v6287_v33 = vpop.f32.mrb[66].mxu1  ;;  %6935 = vrcp.f32 %v3617_v21  ;;  %v3828_v41 = vmul.f32 %v8468_v22, %v3719_v7  ;;  %v3730_v55 = vmul.f32 %v8565_v54, %v6284_v42  ;;  %v3738_v27 = vmul.f32 %v8519_v38, %v6300_v39  ;;  %v6303_v35 = vpop.f32.mrb[58].mxu0 }
 0x3b5   : > { %v8638_v49 = vpop.eup %6929  ;;  %v3930_v60 = vsel %vm540_vm0, %v3837_v45, 0.0  ;;  %v3923_v10 = vsel %vm540_vm0, %v3836_v40, 0.0  ;;  %6937 = vrcp.f32 %v3619_v14  ;;  %v3737_v57 = vmul.f32 %v8537_v51, %v3387_v32  ;;  %v3397_v34 = vpop.f32.mrb[59].mxu0 }
 0x3b6   : > { %v3262_v26 = vpop.f32.mrb[67].mxu1  ;;  %v3931_v0 = vadd.f32 %v3930_v60, %v3929_v25  ;;  %v3924_v4 = vadd.f32 %v3923_v10, %v3922_v3  ;;  %v3909_v47 = vsel %vm540_vm0, %v3828_v41, 0.0  ;;  %v3839_v54 = vmul.f32 %v8422_v58, %v3730_v55  ;;  %v2474_v24 = vpop.xlane.xlu0 %2473 }
 0x3b7   : > { %v3910_v52 = vadd.f32 %v3909_v47, %v3908_v16  ;;  %v3847_v38 = vmul.f32 %v8422_v58, %v3738_v27  ;;  %v3846_v2 = vmul.f32 %v8422_v58, %v3737_v57  ;;  %v3620_v44 = vadd.f32 1e-06, %v2468_v19  ;;  %v6290_v5 = vpop.f32.mrb[68].mxu1  ;;  %v2477_v8 = vpop.xlane.xlu1 %2476 }
 0x3b8   : > { %v3939_v18 = vsel %vm540_vm0, %v3839_v54, 0.0  ;;  %v3729_v51 = vmul.f32 %v8581_v23, %v3252_v15  ;;  %v3621_v13 = vadd.f32 1e-06, %v2471_v17  ;;  %v3732_v36 = vmul.f32 %v8602_v53, %v6287_v33  ;;  %v6306_v43 = vpop.f32.mrb[60].mxu0  ;;  %v3272_v19 = vpop.f32.mrb[69].mxu1 }
 0x3b9   : > { %v6932_v42 = vpop.eup %6931  ;;  %v3953_v25 = vsel %vm540_vm0, %v3847_v38, 0.0  ;;  %v3946_v12 = vsel %vm540_vm0, %v3846_v2, 0.0  ;;  %6939 = vrcp.f32 %v3620_v44  ;;  %v3740_v9 = vmul.f32 %v8556_v1, %v6303_v35  ;;  %6343 = vmatprep.mubr.msk.f32.mxu0 %vm540_vm0, %v3910_v52  ;;  %v3407_v39 = vpop.f32.mrb[61].mxu0 }
 0x3ba   : > { %v8654_v3 = vpop.eup %6933  ;;  %v3838_v23 = vmul.f32 %v8422_v58, %v3729_v51  ;;  %6941 = vrcp.f32 %v3621_v13  ;;  %v3841_v53 = vmul.f32 %v8430_v56, %v3732_v36  ;;  %v3739_v46 = vmul.f32 %v8549_v11, %v3397_v34  ;;  %6344 = vmatmul.mubr.msk.f32.gmra.mrb[70].mxu0 %vm540_vm0, %v3917_v28 }
 0x3bb   : > { %v3849_v50 = vmul.f32 %v8430_v56, %v3740_v9  ;;  %v3622_v62 = vadd.f32 1e-06, %v2474_v24  ;;  %v3731_v1 = vmul.f32 %v8586_v31, %v3262_v26  ;;  %v3623_v32 = vadd.f32 1e-06, %v2477_v8  ;;  %6346 = vmatprep.mubr.msk.f32.mxu0 %vm540_vm0, %v3924_v4  ;;  %v6293_v15 = vpop.f32.mrb[70].mxu1  ;;  %v2480_v31 = vpop.xlane.xlu0 %2479 }
 0x3bc   : > { %v3932_v16 = vsel %vm540_vm0, %v3838_v23, 0.0  ;;  %v3940_v6 = vsel %vm540_vm0, %v3841_v53, 0.0  ;;  %v3848_v21 = vmul.f32 %v8430_v56, %v3739_v46  ;;  %v3734_v7 = vmul.f32 %v6928_v48, %v6290_v5  ;;  %v6309_v17 = vpop.f32.mrb[62].mxu0  ;;  %v3282_v11 = vpop.f32.mrb[71].mxu1 }
 0x3bd   : > { %v3941_v45 = vadd.f32 %v3940_v6, %v3939_v18  ;;  %v3954_v28 = vsel %vm540_vm0, %v3849_v50, 0.0  ;;  %6943 = vrcp.f32 %v3622_v62  ;;  %v3840_v40 = vmul.f32 %v8430_v56, %v3731_v1  ;;  %v3417_v14 = vpop.f32.mrb[63].mxu0 }
 0x3be   : > { %v6936_v33 = vpop.eup %6935  ;;  %v3955_v41 = vadd.f32 %v3954_v28, %v3953_v25  ;;  %v3947_v55 = vsel %vm540_vm0, %v3848_v21, 0.0  ;;  %6945 = vrcp.f32 %v3623_v32  ;;  %v3843_v27 = vmul.f32 %v8442_v37, %v3734_v7  ;;  %6347 = vmatmul.mubr.msk.f32.gmra.mrb[72].mxu0 %vm540_vm0, %v3931_v0 }
 0x3bf   : > { %v6938_v48 = vpop.eup %6937  ;;  %v3948_v35 = vadd.f32 %v3947_v55, %v3946_v12  ;;  %v3933_v60 = vsel %vm540_vm0, %v3840_v40, 0.0  ;;  %v3742_v10 = vmul.f32 %v8571_v20, %v6306_v43  ;;  %v3741_v57 = vmul.f32 %v8577_v61, %v3407_v39  ;;  %v6316_v34 = vpop.f32.mrb[72].mxu1 }
 0x3c0   : > { %v3934_v26 = vadd.f32 %v3933_v60, %v3932_v16  ;;  %v3942_v4 = vsel %vm540_vm0, %v3843_v27, 0.0  ;;  %v3624_v47 = vadd.f32 1e-06, %v2480_v31  ;;  %v3733_v54 = vmul.f32 %v8626_v63, %v3272_v19  ;;  %v3522_v52 = vpop.f32.mrb[73].mxu1 }
 0x3c1   : > { %v3943_v38 = vadd.f32 %v3942_v4, %v3941_v45  ;;  %v3851_v2 = vmul.f32 %v8442_v37, %v3742_v10  ;;  %v3850_v0 = vmul.f32 %v8442_v37, %v3741_v57  ;;  %v3736_v44 = vmul.f32 %v6932_v42, %v6293_v15 }
 0x3c2   : > { %6947 = vrcp.f32 %v3624_v47  ;;  %v3842_v24 = vmul.f32 %v8442_v37, %v3733_v54  ;;  %v3744_v20 = vmul.f32 %v8622_v29, %v6309_v17  ;;  %v3735_v61 = vmul.f32 %v8638_v49, %v3282_v11 }
 0x3c3   : > { %v6940_v5 = vpop.eup %6939  ;;  %v3956_v18 = vsel %vm540_vm0, %v3851_v2, 0.0  ;;  %v3949_v51 = vsel %vm540_vm0, %v3850_v0, 0.0  ;;  %v3845_v63 = vmul.f32 %v8468_v22, %v3736_v44  ;;  %v3743_v13 = vmul.f32 %v8610_v59, %v3417_v14  ;;  %v6319_v36 = vpop.f32.mrb[74].mxu1 }
 0x3c4   : > { %v6942_v8 = vpop.eup %6941  ;;  %v3957_v43 = vadd.f32 %v3956_v18, %v3955_v41  ;;  %v3950_v42 = vadd.f32 %v3949_v51, %v3948_v35  ;;  %v3935_v25 = vsel %vm540_vm0, %v3842_v24, 0.0  ;;  %v3853_v12 = vmul.f32 %v8468_v22, %v3744_v20  ;;  %v3532_v29 = vpop.f32.mrb[75].mxu1  ;;  %v4557_v20 = vld [vmem:[%s9404_s5] sm:$0xff]  ;;  %v4560_v18 = vld [vmem:[%s9404_s5 + $0x18] sm:$0xff] }
 0x3c5   : > { %v3936_v9 = vadd.f32 %v3935_v25, %v3934_v26  ;;  %v3944_v49 = vsel %vm540_vm0, %v3845_v63, 0.0  ;;  %v3844_v39 = vmul.f32 %v8468_v22, %v3735_v61  ;;  %v3852_v19 = vmul.f32 %v8468_v22, %v3743_v13  ;;  %v4558_v61 = vld [vmem:[%s9404_s5 + $0x8] sm:$0xff]  ;;  %v8731_v63 = vld [vmem:[%s9403_s4] ss:$0 sm:$0xff] }
 0x3c6   : > { %v3945_v23 = vadd.f32 %v3944_v49, %v3943_v38  ;;  %v3958_v53 = vsel %vm540_vm0, %v3853_v12, 0.0  ;;  %v3746_v59 = vmul.f32 %v8654_v3, %v6316_v34  ;;  %v3745_v46 = vmul.f32 %v6936_v33, %v3522_v52  ;;  %v4777_v13 = vld [vmem:[%s9406_s7] sm:$0xff] }
 0x3c7   : > { %v6944_v50 = vpop.eup %6943  ;;  %v3959_v62 = vadd.f32 %v3958_v53, %v3957_v43  ;;  %v3937_v1 = vsel %vm540_vm0, %v3844_v39, 0.0  ;;  %v3951_v32 = vsel %vm540_vm0, %v3852_v19, 0.0  ;;  %v3748_v15 = vmul.f32 %v6940_v5, %v6319_v36  ;;  %v6322_v16 = vpop.f32.mrb[76].mxu1  ;;  %v4778_v36 = vld [vmem:[%s9406_s7 + $0x8] sm:$0xff] }
 0x3c8   : > { %v6946_v6 = vpop.eup %6945  ;;  %v3938_v21 = vadd.f32 %v3937_v1, %v3936_v9  ;;  %v3952_v7 = vadd.f32 %v3951_v32, %v3950_v42  ;;  %v3855_v17 = vmul.f32 %v8422_v58, %v3746_v59  ;;  %v3854_v11 = vmul.f32 %v8422_v58, %v3745_v46  ;;  %v3542_v45 = vpop.f32.mrb[77].mxu1  ;;  %v4780_v42 = vld [vmem:[%s9406_s7 + $0x18] sm:$0xff]  ;;  %v4782_v9 = vld [vmem:[%s9406_s7 + $0x28] sm:$0xff]  ;;  %v6982_v46 = vld [vmem:[%s7377_s23] sm:$0xff] }
 0x3c9   : > { %v3857_v28 = vmul.f32 %v8430_v56, %v3748_v15  ;;  %v3747_v3 = vmul.f32 %v6938_v48, %v3532_v29  ;;  %v3750_v40 = vmul.f32 %v6944_v50, %v6322_v16  ;;  %v3749_v31 = vmul.f32 %v6942_v8, %v3542_v45  ;;  %v4779_v8 = vld [vmem:[%s9406_s7 + $0x10] sm:$0xff]  ;;  %v4781_v29 = vld [vmem:[%s9406_s7 + $0x20] sm:$0xff] }
 0x3ca   : > { %v3967_v14 = vsel %vm540_vm0, %v3855_v17, 0.0  ;;  %6349 = vmatprep.mubr.msk.f32.mxu0 %vm540_vm0, %v3938_v21  ;;  %v3960_v48 = vsel %vm540_vm0, %v3854_v11, 0.0  ;;  %v6526_v5 = vpack.c.bf16 %v4558_v61, %v4557_v20  ;;  %v6534_v43 = vpack.c.bf16 %v4778_v36, %v4777_v13  ;;  %v6986_v36 = vld [vmem:[%s7377_s23 + $0x20] sm:$0xff] }
 0x3cb   : > { %v3968_v33 = vsel %vm540_vm0, %v3857_v28, 0.0  ;;  %v3856_v41 = vmul.f32 %v8430_v56, %v3747_v3  ;;  %6350 = vmatmul.mubr.msk.f32.gmra.mrb[74].mxu0 %vm540_vm0, %v3945_v23  ;;  %v3859_v55 = vmul.f32 %v8442_v37, %v3750_v40  ;;  %v3858_v58 = vmul.f32 %v8442_v37, %v3749_v31  ;;  %v6325_v27 = vpop.f32.mrb[78].mxu1  ;;  %v6981_v23 = vld [vmem:[%s7377_s23 + $0x8] sm:$0xff] }
 0x3cc   : > { %v6948_v35 = vpop.eup %6947  ;;  %v3969_v60 = vadd.f32 %v3968_v33, %v3967_v14  ;;  %6352 = vmatprep.mubr.msk.f32.mxu0 %vm540_vm0, %v3952_v7  ;;  %v3552_v10 = vpop.f32.mrb[79].mxu1  ;;  %6527 = vmatprep.subr.bf16.mxu1 %v6526_v5  ;;  %v6538_v12 = vpack.c.bf16 %v4780_v42, %v4779_v8  ;;  %v6542_v59 = vpack.c.bf16 %v4782_v9, %v4781_v29 }
 0x3cd   : > { %v3961_v57 = vsel %vm540_vm0, %v3856_v41, 0.0  ;;  %v3970_v34 = vsel %vm540_vm0, %v3859_v55, 0.0  ;;  %v3963_v56 = vsel %vm540_vm0, %v3858_v58, 0.0  ;;  %v3752_v26 = vmul.f32 %v6948_v35, %v6325_v27  ;;  %6529 = vmatpush3.bf16.msra.mxu1 %v6526_v5  ;;  %6535 = vmatprep.subr.bf16.mxu0 %v6534_v43 }
 0x3ce   : > { %v3962_v4 = vadd.f32 %v3961_v57, %v3960_v48  ;;  %v3971_v47 = vadd.f32 %v3970_v34, %v3969_v60  ;;  %v3751_v54 = vmul.f32 %v6946_v6, %v3552_v10  ;;  %6537 = vmatpush3.bf16.msra.mxu0 %v6534_v43 }
 0x3cf   : > { %6353 = vmatmul.mubr.msk.f32.gmra.mrb[76].mxu0 %vm540_vm0, %v3959_v62  ;;  %v3861_v37 = vmul.f32 %v8468_v22, %v3752_v26  ;;  %6539 = vmatprep.subr.bf16.mxu0 %v6538_v12  ;;  %v6983_v26 = vld [vmem:[%s7377_s23 + $0x18] sm:$0xff] }
 0x3d0   : > { %v3964_v52 = vadd.f32 %v3963_v56, %v3962_v4  ;;  %v3860_v38 = vmul.f32 %v8468_v22, %v3751_v54  ;;  %v4559_v22 = vld [vmem:[%s9404_s5 + $0x10] sm:$0xff] }
 0x3d1   : > { %v3972_v2 = vsel %vm540_vm0, %v3861_v37, 0.0  ;;  %v6530_v51 = vpack.c.bf16 %v4560_v18, %v4559_v22  ;;  %v6985_v18 = vld [vmem:[%s7377_s23 + $0x28] sm:$0xff] }
 0x3d2   : > { %v3973_v0 = vadd.f32 %v3972_v2, %v3971_v47  ;;  %v3965_v44 = vsel %vm540_vm0, %v3860_v38, 0.0  ;;  %6541 = vmatpush3.bf16.msra.mxu0 %v6538_v12  ;;  %v6984_v47 = vld [vmem:[%s7377_s23 + $0x10] sm:$0xff] }
 0x3d3   : > { %v3966_v24 = vadd.f32 %v3965_v44, %v3964_v52  ;;  %6531 = vmatprep.subr.bf16.mxu1 %v6530_v51  ;;  %6543 = vmatprep.subr.bf16.mxu0 %v6542_v59 }
 0x3d4   : > { %6533 = vmatpush3.bf16.msra.mxu1 %v6530_v51 }
 0x3d5   : > { %6355 = vmatprep.mubr.msk.f32.mxu0 %vm540_vm0, %v3966_v24 }
 0x3d6   : > { %6356 = vmatmul.mubr.msk.f32.gmra.mrb[78].mxu0 %vm540_vm0, %v3973_v0 }
 0x3d7   : > { %6545 = vmatpush3.bf16.msra.mxu0 %v6542_v59 }
 0x465   : > { %v6336_v25 = vpop.f32.mrb[64].mxu0 }
 0x466   : > { %v4105_v49 = vadd.f32 %v6336_v25, %v8731_v63  ;;  %v4099_v39 = vpop.f32.mrb[65].mxu0 }
 0x467   : > { %v4100_v19 = vadd.f32 %v8731_v63, %v4099_v39 }
 0x468   : > { %v8754_v53 = vadd.f32 %v6981_v23, %v4105_v49 }
 0x469   : > { %v8757_v50 = vadd.f32 %v6982_v46, %v4100_v19 }
 0x46a   : > { %v4195_v62 = vsel %vm540_vm0, %v8754_v53, 0.0  ;;  %v4276_v1 = vmul.f32 %v8754_v53, %v8754_v53 }
 0x46b   : > { %v4194_v32 = vsel %vm540_vm0, %v8757_v50, 0.0  ;;  %v4275_v15 = vmul.f32 %v8757_v50, %v8757_v50 }
 0x46c   : > { %v4292_v16 = vsel %vm540_vm0, %v4276_v1, 0.0  ;;  %v4196_v6 = vadd.f32 %v4195_v62, %v4194_v32 }
 0x46d   : > { %v4291_v21 = vsel %vm540_vm0, %v4275_v15, 0.0  ;;  %v8808_v15 = vld [vmem:[%s9408_s9] sm:$0x1] }
 0x46e   : > { %v4197_v7 = vrot.slane %v4196_v6, 4  ;;  %v4293_v17 = vadd.f32 %v4292_v16, %v4291_v21 }
 0x470   : > { %v4198_v11 = vadd.f32 %v4197_v7, %v4196_v6  ;;  %v4294_v45 = vrot.slane %v4293_v17, 4 }
 0x472   : > { %v4199_v28 = vrot.slane %v4198_v11, 2  ;;  %v4295_v3 = vadd.f32 %v4294_v45, %v4293_v17 }
 0x474   : > { %v4200_v40 = vadd.f32 %v4199_v28, %v4198_v11  ;;  %v4296_v31 = vrot.slane %v4295_v3, 2 }
 0x476   : > { %v4201_v14 = vrot.slane %v4200_v40, 1  ;;  %v4297_v33 = vadd.f32 %v4296_v31, %v4295_v3 }
 0x478   : > { %v4202_v41 = vadd.f32 %v4201_v14, %v4200_v40  ;;  %v4298_v55 = vrot.slane %v4297_v33, 1 }
 0x47a   : > { %v4267_v58 = vmul.f32 0.0625, %v4202_v41  ;;  %v4299_v27 = vadd.f32 %v4298_v55, %v4297_v33  ;;  %v6339_v35 = vpop.f32.mrb[66].mxu0 }
 0x47b   : > { %v4115_v10 = vadd.f32 %v6339_v35, %v8731_v63  ;;  %v4109_v57 = vpop.f32.mrb[67].mxu0 }
 0x47c   : > { %v4363_v48 = vmul.f32 0.0625, %v4299_v27  ;;  %v4371_v60 = vmul.f32 %v4267_v58, %v4267_v58  ;;  %v4110_v34 = vadd.f32 %v8731_v63, %v4109_v57 }
 0x47d   : > { %v8772_v4 = vadd.f32 %v6983_v26, %v4115_v10 }
 0x47e   : > { %v4379_v56 = vsub.f32 %v4363_v48, %v4371_v60  ;;  %v8775_v54 = vadd.f32 %v6984_v47, %v4110_v34  ;;  %v6342_v37 = vpop.f32.mrb[68].mxu0 }
 0x47f   : > { %v4204_v38 = vsel %vm540_vm0, %v8772_v4, 0.0  ;;  %v4278_v2 = vmul.f32 %v8772_v4, %v8772_v4  ;;  %v4125_v0 = vadd.f32 %v6342_v37, %v8731_v63  ;;  %v4119_v44 = vpop.f32.mrb[69].mxu0  ;;  %v6987_v37 = vld [vmem:[%s7377_s23 + $0x38] sm:$0xff] }
 0x480   : > { %v4388_v52 = vadd.f32 1e-05, %v4379_v56  ;;  %v4203_v24 = vsel %vm540_vm0, %v8775_v54, 0.0  ;;  %v4277_v20 = vmul.f32 %v8775_v54, %v8775_v54  ;;  %v4120_v61 = vadd.f32 %v8731_v63, %v4119_v44 }
 0x481   : > { %v4301_v5 = vsel %vm540_vm0, %v4278_v2, 0.0  ;;  %v4205_v22 = vadd.f32 %v4204_v38, %v4203_v24  ;;  %v8789_v51 = vadd.f32 %v6985_v18, %v4125_v0 }
 0x482   : > { %6949 = vrsqrt.f32 %v4388_v52  ;;  %v4300_v13 = vsel %vm540_vm0, %v4277_v20, 0.0  ;;  %v8793_v8 = vadd.f32 %v6986_v36, %v4120_v61 }
 0x483   : > { %v4206_v43 = vrot.slane %v4205_v22, 4  ;;  %v4302_v42 = vadd.f32 %v4301_v5, %v4300_v13  ;;  %v4213_v25 = vsel %vm540_vm0, %v8789_v51, 0.0  ;;  %v4280_v12 = vmul.f32 %v8789_v51, %v8789_v51 }
 0x484   : > { %v4212_v29 = vsel %vm540_vm0, %v8793_v8, 0.0  ;;  %v4279_v9 = vmul.f32 %v8793_v8, %v8793_v8 }
 0x485   : > { %v4207_v49 = vadd.f32 %v4206_v43, %v4205_v22  ;;  %v4303_v39 = vrot.slane %v4302_v42, 4  ;;  %v4310_v19 = vsel %vm540_vm0, %v4280_v12, 0.0  ;;  %v4214_v23 = vadd.f32 %v4213_v25, %v4212_v29  ;;  %v6989_v29 = vld [vmem:[%s7377_s23 + $0x48] sm:$0xff] }
 0x486   : > { %v4309_v59 = vsel %vm540_vm0, %v4279_v9, 0.0 }
 0x487   : > { %v4208_v46 = vrot.slane %v4207_v49, 2  ;;  %v4304_v62 = vadd.f32 %v4303_v39, %v4302_v42  ;;  %v4215_v1 = vrot.slane %v4214_v23, 4  ;;  %v4311_v32 = vadd.f32 %v4310_v19, %v4309_v59  ;;  %v8847_v59 = vld [vmem:[%s9409_s10] sm:$0x1] }
 0x489   : > { %v4209_v16 = vadd.f32 %v4208_v46, %v4207_v49  ;;  %v4305_v6 = vrot.slane %v4304_v62, 2  ;;  %v4216_v21 = vadd.f32 %v4215_v1, %v4214_v23  ;;  %v4312_v7 = vrot.slane %v4311_v32, 4 }
 0x48b   : > { %v4210_v11 = vrot.slane %v4209_v16, 1  ;;  %v4306_v45 = vadd.f32 %v4305_v6, %v4304_v62  ;;  %v4217_v28 = vrot.slane %v4216_v21, 2  ;;  %v4313_v3 = vadd.f32 %v4312_v7, %v4311_v32  ;;  %v6990_v32 = vld [vmem:[%s7377_s23 + $0x40] sm:$0xff] }
 0x48c   : > { %v6950_v17 = vpop.eup %6949 }
 0x48d   : > { %v4404_v40 = vmul.f32 %v6950_v17, %v8808_v15  ;;  %v4211_v31 = vadd.f32 %v4210_v11, %v4209_v16  ;;  %v4307_v14 = vrot.slane %v4306_v45, 1  ;;  %v4218_v33 = vadd.f32 %v4217_v28, %v4216_v21  ;;  %v6345_v55 = vpop.f32.mrb[70].mxu0 }
 0x48e   : > { %v4314_v41 = vrot.slane %v4313_v3, 2  ;;  %v4135_v48 = vadd.f32 %v6345_v55, %v8731_v63  ;;  %v4129_v60 = vpop.f32.mrb[71].mxu0 }
 0x48f   : > { %v4423_v27 = vrot.slane %v4404_v40, %v9486_v30  ;;  %v4477_v35 = vmul.f32 %v4404_v40, %v4267_v58  ;;  %v8813_v10 = vmul.f32 0.0625, %v4211_v31  ;;  %v4308_v57 = vadd.f32 %v4307_v14, %v4306_v45 }
 0x490   : > { %v4219_v34 = vrot.slane %v4218_v33, 1  ;;  %v4315_v56 = vadd.f32 %v4314_v41, %v4313_v3  ;;  %v8818_v52 = vadd.f32 %v6987_v37, %v4135_v48  ;;  %v4130_v38 = vadd.f32 %v8731_v63, %v4129_v60 }
 0x491   : > { %v4460_v26 = vmul.f32 %v4423_v27, %v8757_v50  ;;  %v4461_v47 = vmul.f32 %v4423_v27, %v8754_v53  ;;  %v4364_v2 = vmul.f32 0.0625, %v4308_v57  ;;  %v4372_v58 = vmul.f32 %v8813_v10, %v8813_v10  ;;  %v6348_v24 = vpop.f32.mrb[72].mxu0  ;;  %v6988_v53 = vld [vmem:[%s7377_s23 + $0x30] sm:$0xff] }
 0x492   : > { %v4220_v0 = vadd.f32 %v4219_v34, %v4218_v33  ;;  %v4316_v44 = vrot.slane %v4315_v56, 1  ;;  %v4222_v20 = vsel %vm540_vm0, %v8818_v52, 0.0  ;;  %v4282_v50 = vmul.f32 %v8818_v52, %v8818_v52  ;;  %v4139_v22 = vpop.f32.mrb[73].mxu0 }
 0x493   : > { %v8828_v61 = vadd.f32 %v6988_v53, %v4130_v38  ;;  %v4145_v5 = vadd.f32 %v6348_v24, %v8731_v63  ;;  %v4380_v18 = vsub.f32 %v4364_v2, %v4372_v58  ;;  %v4140_v43 = vadd.f32 %v8731_v63, %v4139_v22 }
 0x494   : > { %v8831_v13 = vmul.f32 0.0625, %v4220_v0  ;;  %v4317_v36 = vadd.f32 %v4316_v44, %v4315_v56  ;;  %v4319_v42 = vsel %vm540_vm0, %v4282_v50, 0.0  ;;  %v4485_v28 = vsub.f32 %v8847_v59, %v4477_v35 }
 0x495   : > { %v4221_v25 = vsel %vm540_vm0, %v8828_v61, 0.0  ;;  %v4281_v12 = vmul.f32 %v8828_v61, %v8828_v61  ;;  %v8840_v9 = vadd.f32 %v6989_v29, %v4145_v5  ;;  %v4389_v49 = vadd.f32 1e-05, %v4380_v18  ;;  %v6991_v18 = vld [vmem:[%s7377_s23 + $0x58] sm:$0xff] }
 0x496   : > { %v4365_v39 = vmul.f32 0.0625, %v4317_v36  ;;  %v4373_v19 = vmul.f32 %v8831_v13, %v8831_v13  ;;  %v4223_v23 = vadd.f32 %v4222_v20, %v4221_v25  ;;  %v8855_v16 = vadd.f32 %v6990_v32, %v4140_v43  ;;  %v6992_v25 = vld [vmem:[%s7377_s23 + $0x50] sm:$0xff] }
 0x497   : > { %v4318_v46 = vsel %vm540_vm0, %v4281_v12, 0.0  ;;  %v4231_v62 = vsel %vm540_vm0, %v8840_v9, 0.0  ;;  %v4284_v1 = vmul.f32 %v8840_v9, %v8840_v9  ;;  %6951 = vrsqrt.f32 %v4389_v49 }
 0x498   : > { %v4381_v6 = vsub.f32 %v4365_v39, %v4373_v19  ;;  %v4224_v21 = vrot.slane %v4223_v23, 4  ;;  %v4320_v7 = vadd.f32 %v4319_v42, %v4318_v46  ;;  %v4230_v11 = vsel %vm540_vm0, %v8855_v16, 0.0 }
 0x499   : > { %v4328_v17 = vsel %vm540_vm0, %v4284_v1, 0.0  ;;  %v4283_v45 = vmul.f32 %v8855_v16, %v8855_v16  ;;  %v4232_v14 = vadd.f32 %v4231_v62, %v4230_v11  ;;  %v4504_v41 = vrot.slane %v4485_v28, %v9486_v30 }
 0x49a   : > { %v4390_v3 = vadd.f32 1e-05, %v4381_v6  ;;  %v4225_v40 = vadd.f32 %v4224_v21, %v4223_v23  ;;  %v4321_v31 = vrot.slane %v4320_v7, 4 }
 0x49b   : > { %v4327_v33 = vsel %vm540_vm0, %v4283_v45, 0.0  ;;  %v4233_v48 = vrot.slane %v4232_v14, 4  ;;  %v8865_v57 = vadd.f32 %v4504_v41, %v4460_v26  ;;  %v8867_v34 = vadd.f32 %v4504_v41, %v4461_v47 }
 0x49c   : > { %6953 = vrsqrt.f32 %v4390_v3  ;;  %v4226_v55 = vrot.slane %v4225_v40, 2  ;;  %v4322_v27 = vadd.f32 %v4321_v31, %v4320_v7  ;;  %v4329_v60 = vadd.f32 %v4328_v17, %v4327_v33 }
 0x49d   : > { %v4234_v35 = vadd.f32 %v4233_v48, %v4232_v14  ;;  %6366 = vmatprep.mubr.msk.f32.mxu1 %vm540_vm0, %v8865_v57 }
 0x49e   : > { %v4227_v56 = vadd.f32 %v4226_v55, %v4225_v40  ;;  %v4323_v37 = vrot.slane %v4322_v27, 2  ;;  %v4330_v38 = vrot.slane %v4329_v60, 4  ;;  %v6351_v2 = vpop.f32.mrb[74].mxu0  ;;  %6367 = vmatmul.mubr.msk.f32.vlgmr.msra.gmra.mrb[80].mxu1 %vm540_vm0, %v8867_v34 }
 0x49f   : > { %v4235_v44 = vrot.slane %v4234_v35, 2  ;;  %v4155_v24 = vadd.f32 %v6351_v2, %v8731_v63  ;;  %v4149_v20 = vpop.f32.mrb[75].mxu0 }
 0x4a0   : > { %v4228_v58 = vrot.slane %v4227_v56, 1  ;;  %v4324_v0 = vadd.f32 %v4323_v37, %v4322_v27  ;;  %v4331_v26 = vadd.f32 %v4330_v38, %v4329_v60  ;;  %v4150_v47 = vadd.f32 %v8731_v63, %v4149_v20 }
 0x4a1   : > { %v6952_v50 = vpop.eup %6951  ;;  %v4236_v22 = vadd.f32 %v4235_v44, %v4234_v35  ;;  %v8876_v36 = vadd.f32 %v6991_v18, %v4155_v24  ;;  %v6994_v18 = vld [vmem:[%s7377_s23 + $0x60] sm:$0xff] }
 0x4a2   : > { %v4229_v53 = vadd.f32 %v4228_v58, %v4227_v56  ;;  %v4325_v5 = vrot.slane %v4324_v0, 1  ;;  %v4405_v43 = vmul.f32 %v6952_v50, %v8808_v15  ;;  %v4332_v42 = vrot.slane %v4331_v26, 2  ;;  %v6354_v29 = vpop.f32.mrb[76].mxu0 }
 0x4a3   : > { %v8880_v12 = vadd.f32 %v6992_v25, %v4150_v47  ;;  %v4237_v19 = vrot.slane %v4236_v22, 1  ;;  %v4240_v23 = vsel %vm540_vm0, %v8876_v36, 0.0  ;;  %v4159_v46 = vpop.f32.mrb[77].mxu0  ;;  %v4286_v6 = vmul.f32 %v8876_v36, %v8876_v36 }
 0x4a4   : > { %v8882_v49 = vmul.f32 0.0625, %v4229_v53  ;;  %v4326_v39 = vadd.f32 %v4325_v5, %v4324_v0  ;;  %v8887_v62 = vrot.slane %v4405_v43, %v9486_v30  ;;  %v4478_v1 = vmul.f32 %v4405_v43, %v8813_v10  ;;  %v6993_v0 = vld [vmem:[%s7377_s23 + $0x68] sm:$0xff] }
 0x4a5   : > { %v4333_v32 = vadd.f32 %v4332_v42, %v4331_v26  ;;  %v4238_v11 = vadd.f32 %v4237_v19, %v4236_v22  ;;  %v4239_v45 = vsel %vm540_vm0, %v8880_v12, 0.0  ;;  %v4337_v10 = vsel %vm540_vm0, %v4286_v6, 0.0  ;;  %v6995_v42 = vld [vmem:[%s7377_s23 + $0x78] sm:$0xff] }
 0x4a6   : > { %v6954_v21 = vpop.eup %6953  ;;  %v4366_v7 = vmul.f32 0.0625, %v4326_v39  ;;  %v4374_v17 = vmul.f32 %v8882_v49, %v8882_v49  ;;  %v4462_v28 = vmul.f32 %v8887_v62, %v8775_v54  ;;  %v4241_v33 = vadd.f32 %v4240_v23, %v4239_v45 }
 0x4a7   : > { %v4406_v3 = vmul.f32 %v6954_v21, %v8808_v15  ;;  %v4334_v40 = vrot.slane %v4333_v32, 1  ;;  %v8900_v14 = vmul.f32 0.0625, %v4238_v11  ;;  %v4285_v41 = vmul.f32 %v8880_v12, %v8880_v12 }
 0x4a8   : > { %v4382_v31 = vsub.f32 %v4366_v7, %v4374_v17  ;;  %v4165_v48 = vadd.f32 %v6354_v29, %v8731_v63  ;;  %v4242_v37 = vrot.slane %v4241_v33, 4  ;;  %v4160_v26 = vadd.f32 %v8731_v63, %v4159_v46 }
 0x4a9   : > { %v8905_v55 = vrot.slane %v4406_v3, %v9486_v30  ;;  %v8908_v27 = vmul.f32 %v4406_v3, %v8831_v13  ;;  %v4335_v54 = vadd.f32 %v4334_v40, %v4333_v32  ;;  %v4375_v56 = vmul.f32 %v8900_v14, %v8900_v14  ;;  %v6357_v38 = vpop.f32.mrb[78].mxu0 }
 0x4aa   : > { %v4391_v60 = vadd.f32 1e-05, %v4382_v31  ;;  %v4336_v35 = vsel %vm540_vm0, %v4285_v41, 0.0  ;;  %v8919_v44 = vadd.f32 %v6993_v0, %v4165_v48  ;;  %v4169_v24 = vpop.f32.mrb[79].mxu0  ;;  %v4243_v20 = vadd.f32 %v4242_v37, %v4241_v33 }
 0x4ab   : > { %v8916_v2 = vmul.f32 %v8905_v55, %v8793_v8  ;;  %v4367_v58 = vmul.f32 0.0625, %v4335_v54  ;;  %v4338_v13 = vadd.f32 %v4337_v10, %v4336_v35  ;;  %v4175_v47 = vadd.f32 %v6357_v38, %v8731_v63 }
 0x4ac   : > { %6955 = vrsqrt.f32 %v4391_v60  ;;  %v4249_v5 = vsel %vm540_vm0, %v8919_v44, 0.0  ;;  %v4288_v8 = vmul.f32 %v8919_v44, %v8919_v44  ;;  %v4244_v22 = vrot.slane %v4243_v20, 2 }
 0x4ad   : > { %v4383_v50 = vsub.f32 %v4367_v58, %v4375_v56  ;;  %v4339_v53 = vrot.slane %v4338_v13, 4  ;;  %v8928_v43 = vadd.f32 %v6994_v18, %v4160_v26  ;;  %v8931_v25 = vadd.f32 %v6995_v42, %v4175_v47 }
 0x4ae   : > { %v4170_v29 = vadd.f32 %v8731_v63, %v4169_v24  ;;  %v4346_v23 = vsel %vm540_vm0, %v4288_v8, 0.0  ;;  %v4486_v46 = vsub.f32 %v8847_v59, %v4478_v1  ;;  %v4245_v32 = vadd.f32 %v4244_v22, %v4243_v20  ;;  %v6996_v1 = vld [vmem:[%s7377_s23 + $0x70] sm:$0xff]  ;;  %s5395_s23 = sshll.u32 %s9178_s14, 4  ;;  %s9351_s23 = int_to_ptr.vmem [resolvable:$true] %s5395_s23 }
 0x4af   : > { %v4392_v39 = vadd.f32 1e-05, %v4383_v50  ;;  %v4340_v19 = vadd.f32 %v4339_v53, %v4338_v13  ;;  %v4248_v6 = vsel %vm540_vm0, %v8928_v43, 0.0  ;;  %v4287_v21 = vmul.f32 %v8928_v43, %v8928_v43  ;;  %s7057_s16 = scalar_lea.vmem %s9351_s23, 2048  ;;  %p7064_p5 = scmp.lt.s32.totalorder %s9351_s23, %s7062_s0 }
 0x4b0   : > { %v4258_v7 = vsel %vm540_vm0, %v8931_v25, 0.0  ;;  %v4250_v11 = vadd.f32 %v4249_v5, %v4248_v6  ;;  %v4290_v63 = vmul.f32 %v8931_v25, %v8931_v25  ;;  %v4246_v45 = vrot.slane %v4245_v32, 1  ;;  %p7058_p13 = scmp.ne.s32.totalorder %s9351_s23, %s7057_s16  ;;  %p7065_p7 = scmp.lt.s32.totalorder %s7063_s20, %s7057_s16 }
 0x4b1   : > { %6957 = vrsqrt.f32 %v4392_v39  ;;  %v4341_v17 = vrot.slane %v4340_v19, 2  ;;  %v4345_v3 = vsel %vm540_vm0, %v4287_v21, 0.0  ;;  %v8946_v40 = vadd.f32 %v6996_v1, %v4170_v29 }
 0x4b2   : > { %v4508_v10 = vrot.slane %v4486_v46, %v9486_v30  ;;  %v4251_v33 = vrot.slane %v4250_v11, 4  ;;  %v4347_v41 = vadd.f32 %v4346_v23, %v4345_v3  ;;  %v4355_v54 = vsel %vm540_vm0, %v4290_v63, 0.0  ;;  %p7059_p12 = pnand %p7058_p13, %p9489_p1  ;;  %p7066_p9 = por %p7065_p7, %p7064_p5 }
 0x4b3   : > { %v4342_v31 = vadd.f32 %v4341_v17, %v4340_v19  ;;  %v4247_v48 = vadd.f32 %v4246_v45, %v4245_v32  ;;  %v4257_v60 = vsel %vm540_vm0, %v8946_v40, 0.0  ;;  %v4289_v56 = vmul.f32 %v8946_v40, %v8946_v40 }
 0x4b4   : > { %v8954_v37 = vadd.f32 %v4508_v10, %v4462_v28  ;;  %v4252_v38 = vadd.f32 %v4251_v33, %v4250_v11  ;;  %v4348_v58 = vrot.slane %v4347_v41, 4  ;;  %v4259_v13 = vadd.f32 %v4258_v7, %v4257_v60  ;;  %p7060_p10 = pneg %p7059_p12 }
 0x4b5   : > { %v4343_v35 = vrot.slane %v4342_v31, 1  ;;  %v8956_v24 = vmul.f32 0.0625, %v4247_v48  ;;  %v4354_v20 = vsel %vm540_vm0, %v4289_v56, 0.0  ;;  %v4463_v26 = vmul.f32 %v8887_v62, %v8772_v4 }
 0x4b6   : > { %v6956_v0 = vpop.eup %6955  ;;  %6369 = vmatprep.mubr.msk.f32.mxu1 %vm540_vm0, %v8954_v37  ;;  %v4487_v47 = vsub.f32 %v8847_v59, %v8908_v27  ;;  %v4253_v53 = vrot.slane %v4252_v38, 2  ;;  %v4349_v5 = vadd.f32 %v4348_v58, %v4347_v41  ;;  %v4260_v22 = vrot.slane %v4259_v13, 4  ;;  %p7067_p11 = pnand %p7066_p9, %p7060_p10 }
 0x4b7   : > { %v4407_v28 = vmul.f32 %v6956_v0, %v8808_v15  ;;  %v4344_v50 = vadd.f32 %v4343_v35, %v4342_v31  ;;  %v4376_v8 = vmul.f32 %v8956_v24, %v8956_v24  ;;  %v4356_v18 = vadd.f32 %v4355_v54, %v4354_v20 }
 0x4b8   : > { %v8968_v42 = vadd.f32 %v4508_v10, %v4463_v26  ;;  %v4254_v62 = vadd.f32 %v4253_v53, %v4252_v38  ;;  %v4350_v19 = vrot.slane %v4349_v5, 2  ;;  %v4261_v27 = vadd.f32 %v4260_v22, %v4259_v13 }
 0x4b9   : > { %v4435_v29 = vrot.slane %v4407_v28, %v9486_v30  ;;  %v4480_v39 = vmul.f32 %v4407_v28, %v8882_v49  ;;  %v4368_v4 = vmul.f32 0.0625, %v4344_v50  ;;  %v4357_v23 = vrot.slane %v4356_v18, 4 }
 0x4ba   : > { %6370 = vmatmul.mubr.msk.f32.gmra.mrb[82].mxu1 %vm540_vm0, %v8968_v42  ;;  %v4512_v46 = vrot.slane %v4487_v47, %v9486_v30  ;;  %v4255_v7 = vrot.slane %v4254_v62, 1  ;;  %v4465_v17 = vmul.f32 %v8905_v55, %v8789_v51  ;;  %v4351_v11 = vadd.f32 %v4350_v19, %v4349_v5 }
 0x4bb   : > { %v6958_v32 = vpop.eup %6957  ;;  %v4466_v6 = vmul.f32 %v4435_v29, %v8828_v61  ;;  %v4384_v21 = vsub.f32 %v4368_v4, %v4376_v8  ;;  %v4262_v63 = vrot.slane %v4261_v27, 2  ;;  %v4358_v45 = vadd.f32 %v4357_v23, %v4356_v18 }
 0x4bc   : > { %v4408_v49 = vmul.f32 %v6958_v32, %v8808_v15  ;;  %v4256_v1 = vadd.f32 %v4255_v7, %v4254_v62  ;;  %v8980_v10 = vadd.f32 %v4512_v46, %v8916_v2  ;;  %v8982_v31 = vadd.f32 %v4512_v46, %v4465_v17 }
 0x4bd   : > { %v4393_v3 = vadd.f32 1e-05, %v4384_v21  ;;  %v4352_v41 = vrot.slane %v4351_v11, 1  ;;  %v4263_v54 = vadd.f32 %v4262_v63, %v4261_v27  ;;  %v4359_v55 = vrot.slane %v4358_v45, 2 }
 0x4be   : > { %v4439_v33 = vrot.slane %v4408_v49, %v9486_v30  ;;  %v4481_v61 = vmul.f32 %v4408_v49, %v8900_v14  ;;  %v4273_v51 = vmul.f32 0.0625, %v4256_v1  ;;  %6372 = vmatprep.mubr.msk.f32.mxu1 %vm540_vm0, %v8980_v10  ;;  %v4488_v48 = vsub.f32 %v8847_v59, %v4480_v39 }
 0x4bf   : > { %6959 = vrsqrt.f32 %v4393_v3  ;;  %v4353_v2 = vadd.f32 %v4352_v41, %v4351_v11  ;;  %v4264_v56 = vrot.slane %v4263_v54, 1  ;;  %6373 = vmatmul.mubr.msk.f32.gmra.mrb[84].mxu1 %vm540_vm0, %v8982_v31  ;;  %v4467_v35 = vmul.f32 %v4435_v29, %v8818_v52 }
 0x4c0   : > { %v4468_v60 = vmul.f32 %v4439_v33, %v8855_v16  ;;  %v4377_v14 = vmul.f32 %v4273_v51, %v4273_v51  ;;  %v4360_v38 = vadd.f32 %v4359_v55, %v4358_v45  ;;  %v4516_v58 = vrot.slane %v4488_v48, %v9486_v30 }
 0x4c1   : > { %v4489_v13 = vsub.f32 %v8847_v59, %v4481_v61  ;;  %v4369_v0 = vmul.f32 0.0625, %v4353_v2  ;;  %v4265_v20 = vadd.f32 %v4264_v56, %v4263_v54  ;;  %v4469_v26 = vmul.f32 %v4439_v33, %v8840_v9  ;;  %v5748_v2 = vld [vmem:[%s9405_s6] ss:$0 sm:$0xff] }
 0x4c2   : > { %v4361_v47 = vrot.slane %v4360_v38, 1  ;;  %v8996_v28 = vadd.f32 %v4516_v58, %v4466_v6  ;;  %v8998_v16 = vadd.f32 %v4516_v58, %v4467_v35 }
 0x4c3   : > { %v4520_v50 = vrot.slane %v4489_v13, %v9486_v30  ;;  %v4385_v53 = vsub.f32 %v4369_v0, %v4377_v14  ;;  %v4274_v5 = vmul.f32 0.0625, %v4265_v20 }
 0x4c4   : > { %v4362_v52 = vadd.f32 %v4361_v47, %v4360_v38  ;;  %6375 = vmatprep.mubr.msk.f32.mxu1 %vm540_vm0, %v8996_v28 }
 0x4c5   : > { %v9003_v8 = vadd.f32 %v4520_v50, %v4468_v60  ;;  %v9005_v22 = vadd.f32 %v4520_v50, %v4469_v26  ;;  %v4394_v18 = vadd.f32 1e-05, %v4385_v53  ;;  %v4378_v29 = vmul.f32 %v4274_v5, %v4274_v5  ;;  %6376 = vmatmul.mubr.msk.f32.gmra.mrb[86].mxu1 %vm540_vm0, %v8998_v16 }
 0x4c6   : > { %v4370_v9 = vmul.f32 0.0625, %v4362_v52 }
 0x4c7   : > { %6378 = vmatprep.mubr.msk.f32.mxu1 %vm540_vm0, %v9003_v8  ;;  %6961 = vrsqrt.f32 %v4394_v18 }
 0x4c8   : > { %v4386_v4 = vsub.f32 %v4370_v9, %v4378_v29 }
 0x4c9   : > { %v6960_v39 = vpop.eup %6959  ;;  %6379 = vmatmul.mubr.msk.f32.gmra.mrb[88].mxu1 %vm540_vm0, %v9005_v22 }
 0x4ca   : > { %v4409_v62 = vmul.f32 %v6960_v39, %v8808_v15  ;;  %v4395_v19 = vadd.f32 1e-05, %v4386_v4 }
 0x4cc   : > { %v4443_v27 = vrot.slane %v4409_v62, %v9486_v30  ;;  %v4482_v23 = vmul.f32 %v4409_v62, %v8956_v24  ;;  %6963 = vrsqrt.f32 %v4395_v19 }
 0x4ce   : > { %v4470_v46 = vmul.f32 %v4443_v27, %v8880_v12  ;;  %v4490_v32 = vsub.f32 %v8847_v59, %v4482_v23  ;;  %v4471_v6 = vmul.f32 %v4443_v27, %v8876_v36 }
 0x4d0   : > { %v4524_v21 = vrot.slane %v4490_v32, %v9486_v30 }
 0x4d1   : > { %v6962_v7 = vpop.eup %6961 }
 0x4d2   : > { %v9020_v17 = vadd.f32 %v4524_v21, %v4470_v46  ;;  %v9022_v49 = vadd.f32 %v4524_v21, %v4471_v6  ;;  %v4410_v11 = vmul.f32 %v6962_v7, %v8808_v15 }
 0x4d4   : > { %6381 = vmatprep.mubr.msk.f32.mxu1 %vm540_vm0, %v9020_v17  ;;  %v4447_v24 = vrot.slane %v4410_v11, %v9486_v30  ;;  %v4483_v63 = vmul.f32 %v4410_v11, %v4273_v51 }
 0x4d5   : > { %6382 = vmatmul.mubr.msk.f32.gmra.mrb[90].mxu1 %vm540_vm0, %v9022_v49 }
 0x4d6   : > { %v6964_v12 = vpop.eup %6963  ;;  %v4472_v36 = vmul.f32 %v4447_v24, %v8928_v43  ;;  %v4491_v45 = vsub.f32 %v8847_v59, %v4483_v63  ;;  %v4473_v3 = vmul.f32 %v4447_v24, %v8919_v44 }
 0x4d7   : > { %v4411_v1 = vmul.f32 %v6964_v12, %v8808_v15 }
 0x4d8   : > { %v4528_v33 = vrot.slane %v4491_v45, %v9486_v30 }
 0x4d9   : > { %v4451_v61 = vrot.slane %v4411_v1, %v9486_v30  ;;  %v4484_v41 = vmul.f32 %v4411_v1, %v4274_v5 }
 0x4da   : > { %v9036_v54 = vadd.f32 %v4528_v33, %v4472_v36  ;;  %v9038_v51 = vadd.f32 %v4528_v33, %v4473_v3 }
 0x4db   : > { %v4474_v55 = vmul.f32 %v4451_v61, %v8946_v40  ;;  %v4492_v48 = vsub.f32 %v8847_v59, %v4484_v41  ;;  %v4475_v43 = vmul.f32 %v4451_v61, %v8931_v25  ;;  %v4783_v59 = vld [vmem:[%s9406_s7 + $0x30] sm:$0xff]  ;;  %v4784_v25 = vld [vmem:[%s9406_s7 + $0x38] sm:$0xff] }
 0x4dc   : > { %6384 = vmatprep.mubr.msk.f32.mxu1 %vm540_vm0, %v9036_v54  ;;  %v6546_v40 = vpack.c.bf16 %v4784_v25, %v4783_v59 }
 0x4dd   : > { %6385 = vmatmul.mubr.msk.f32.gmra.mrb[92].mxu1 %vm540_vm0, %v9038_v51  ;;  %v4532_v15 = vrot.slane %v4492_v48, %v9486_v30 }
 0x4de   : > { %6547 = vmatprep.subr.bf16.mxu0 %v6546_v40 }
 0x4df   : > { %v9048_v44 = vadd.f32 %v4532_v15, %v4474_v55  ;;  %v9050_v60 = vadd.f32 %v4532_v15, %v4475_v43  ;;  %6549 = vmatpush3.bf16.msra.mxu0 %v6546_v40 }
 0x4e1   : > { %6387 = vmatprep.mubr.msk.f32.mxu1 %vm540_vm0, %v9048_v44 }
 0x4e2   : > { %6388 = vmatmul.mubr.msk.f32.gmra.mrb[94].mxu1 %vm540_vm0, %v9050_v60 }
 0x571   : > { %v6368_v56 = vpop.f32.mrb[80].mxu1 }
 0x572   : > { %v4688_v35 = vadd.f32 %v6368_v56, %v5748_v2  ;;  %v4682_v14 = vpop.f32.mrb[81].mxu1 }
 0x573   : > { %v4683_v38 = vadd.f32 %v5748_v2, %v4682_v14  ;;  %v9084_v14 = vld [vmem:[%s9407_s8] ss:$0 sm:$0xff] }
 0x574   : > { %v4762_v13 = vmax.f32 %v4688_v35, 0.0 }
 0x575   : > { %v4761_v58 = vmax.f32 %v4683_v38, 0.0 }
 0x577   : > { %6406 = vmatprep.mubr.msk.f32.mxu0 %vm4792_vm6, %v4761_v58 }
 0x578   : > { %6407 = vmatmul.mubr.msk.f32.vlgmr.msra.gmra.mrb[80].mxu0 %vm4792_vm6, %v4762_v13 }
 0x58d   : > { %v6371_v0 = vpop.f32.mrb[82].mxu1 }
 0x58e   : > { %v4698_v20 = vadd.f32 %v6371_v0, %v5748_v2  ;;  %v4692_v26 = vpop.f32.mrb[83].mxu1 }
 0x58f   : > { %v4693_v47 = vadd.f32 %v5748_v2, %v4692_v26 }
 0x590   : > { %v4764_v53 = vmax.f32 %v4698_v20, 0.0 }
 0x591   : > { %v4763_v50 = vmax.f32 %v4693_v47, 0.0 }
 0x592   : > { %v6374_v5 = vpop.f32.mrb[84].mxu1 }
 0x593   : > { %6409 = vmatprep.mubr.msk.f32.mxu0 %vm4792_vm6, %v4763_v50  ;;  %v4708_v52 = vadd.f32 %v6374_v5, %v5748_v2  ;;  %v4702_v18 = vpop.f32.mrb[85].mxu1 }
 0x594   : > { %6410 = vmatmul.mubr.msk.f32.gmra.mrb[82].mxu0 %vm4792_vm6, %v4764_v53  ;;  %v4703_v29 = vadd.f32 %v5748_v2, %v4702_v18 }
 0x595   : > { %v4766_v39 = vmax.f32 %v4708_v52, 0.0 }
 0x596   : > { %v4765_v9 = vmax.f32 %v4703_v29, 0.0 }
 0x598   : > { %6412 = vmatprep.mubr.msk.f32.mxu0 %vm4792_vm6, %v4765_v9  ;;  %v6377_v4 = vpop.f32.mrb[86].mxu1 }
 0x599   : > { %6413 = vmatmul.mubr.msk.f32.gmra.mrb[84].mxu0 %vm4792_vm6, %v4766_v39  ;;  %v4718_v62 = vadd.f32 %v6377_v4, %v5748_v2  ;;  %v4712_v19 = vpop.f32.mrb[87].mxu1 }
 0x59a   : > { %v4713_v27 = vadd.f32 %v5748_v2, %v4712_v19 }
 0x59b   : > { %v4768_v32 = vmax.f32 %v4718_v62, 0.0 }
 0x59c   : > { %v4767_v23 = vmax.f32 %v4713_v27, 0.0  ;;  %v6380_v46 = vpop.f32.mrb[88].mxu1 }
 0x59d   : > { %v4728_v6 = vadd.f32 %v6380_v46, %v5748_v2  ;;  %v4722_v21 = vpop.f32.mrb[89].mxu1 }
 0x59e   : > { %v4723_v7 = vadd.f32 %v5748_v2, %v4722_v21  ;;  %6415 = vmatprep.mubr.msk.f32.mxu0 %vm4792_vm6, %v4767_v23 }
 0x59f   : > { %6416 = vmatmul.mubr.msk.f32.gmra.mrb[86].mxu0 %vm4792_vm6, %v4768_v32  ;;  %v4770_v24 = vmax.f32 %v4728_v6, 0.0 }
 0x5a0   : > { %v4769_v11 = vmax.f32 %v4723_v7, 0.0 }
 0x5a2   : > { %6418 = vmatprep.mubr.msk.f32.mxu0 %vm4792_vm6, %v4769_v11 }
 0x5a3   : > { %6419 = vmatmul.mubr.msk.f32.gmra.mrb[88].mxu0 %vm4792_vm6, %v4770_v24 }
 0x5a8   : > { %v6383_v63 = vpop.f32.mrb[90].mxu1 }
 0x5a9   : > { %v4738_v12 = vadd.f32 %v6383_v63, %v5748_v2  ;;  %v4732_v36 = vpop.f32.mrb[91].mxu1 }
 0x5aa   : > { %v4733_v45 = vadd.f32 %v5748_v2, %v4732_v36 }
 0x5ab   : > { %v4772_v1 = vmax.f32 %v4738_v12, 0.0 }
 0x5ac   : > { %v4771_v3 = vmax.f32 %v4733_v45, 0.0 }
 0x5ae   : > { %6421 = vmatprep.mubr.msk.f32.mxu0 %vm4792_vm6, %v4771_v3 }
 0x5af   : > { %6422 = vmatmul.mubr.msk.f32.gmra.mrb[90].mxu0 %vm4792_vm6, %v4772_v1 }
 0x5b0   : > { %v6386_v33 = vpop.f32.mrb[92].mxu1 }
 0x5b1   : > { %v4748_v61 = vadd.f32 %v6386_v33, %v5748_v2  ;;  %v4742_v41 = vpop.f32.mrb[93].mxu1 }
 0x5b2   : > { %v4743_v55 = vadd.f32 %v5748_v2, %v4742_v41 }
 0x5b3   : > { %v4774_v43 = vmax.f32 %v4748_v61, 0.0 }
 0x5b4   : > { %v4773_v48 = vmax.f32 %v4743_v55, 0.0 }
 0x5b5   : > { %v6389_v15 = vpop.f32.mrb[94].mxu1 }
 0x5b6   : > { %6424 = vmatprep.mubr.msk.f32.mxu0 %vm4792_vm6, %v4773_v48  ;;  %v4758_v59 = vadd.f32 %v6389_v15, %v5748_v2  ;;  %v4752_v25 = vpop.f32.mrb[95].mxu1 }
 0x5b7   : > { %6425 = vmatmul.mubr.msk.f32.gmra.mrb[92].mxu0 %vm4792_vm6, %v4774_v43  ;;  %v4753_v40 = vadd.f32 %v5748_v2, %v4752_v25 }
 0x5b8   : > { %v4776_v35 = vmax.f32 %v4758_v59, 0.0 }
 0x5b9   : > { %v4775_v56 = vmax.f32 %v4753_v40, 0.0 }
 0x5bb   : > { %6427 = vmatprep.mubr.msk.f32.mxu0 %vm4792_vm6, %v4775_v56 }
 0x5bc   : > { %6428 = vmatmul.mubr.msk.f32.gmra.mrb[94].mxu0 %vm4792_vm6, %v4776_v35 }
 0x64b   : > { %v6408_v38 = vpop.f32.mrb[80].mxu0 }
 0x64c   : > { %v4913_v58 = vadd.f32 %v6408_v38, %v9084_v14  ;;  %v4907_v13 = vpop.f32.mrb[81].mxu0 }
 0x64d   : > { %v4908_v0 = vadd.f32 %v9084_v14, %v4907_v13  ;;  %v9133_v13 = vld [vmem:[%s9410_s11] sm:$0x1] }
 0x64e   : > { %v9089_v20 = vadd.f32 %v4913_v58, %v8867_v34 }
 0x64f   : > { %v9092_v2 = vadd.f32 %v4908_v0, %v8865_v57 }
 0x650   : > { %v5003_v26 = vsel %vm540_vm0, %v9089_v20, 0.0  ;;  %v5083_v47 = vmul.f32 %v9089_v20, %v9089_v20 }
 0x651   : > { %v5002_v50 = vsel %vm540_vm0, %v9092_v2, 0.0  ;;  %v5082_v53 = vmul.f32 %v9092_v2, %v9092_v2 }
 0x652   : > { %v5099_v5 = vsel %vm540_vm0, %v5083_v47, 0.0  ;;  %v5004_v52 = vadd.f32 %v5003_v26, %v5002_v50 }
 0x653   : > { %v5098_v34 = vsel %vm540_vm0, %v5082_v53, 0.0 }
 0x654   : > { %v5005_v18 = vrot.slane %v5004_v52, 4  ;;  %v5100_v57 = vadd.f32 %v5099_v5, %v5098_v34 }
 0x656   : > { %v5006_v29 = vadd.f32 %v5005_v18, %v5004_v52  ;;  %v5101_v9 = vrot.slane %v5100_v57, 4 }
 0x658   : > { %v5007_v39 = vrot.slane %v5006_v29, 2  ;;  %v5102_v4 = vadd.f32 %v5101_v9, %v5100_v57 }
 0x65a   : > { %v5008_v62 = vadd.f32 %v5007_v39, %v5006_v29  ;;  %v5103_v19 = vrot.slane %v5102_v4, 2 }
 0x65c   : > { %v5009_v27 = vrot.slane %v5008_v62, 1  ;;  %v5104_v23 = vadd.f32 %v5103_v19, %v5102_v4  ;;  %v9151_v19 = vld [vmem:[%s9411_s12] sm:$0x1] }
 0x65e   : > { %v5010_v46 = vadd.f32 %v5009_v27, %v5008_v62  ;;  %v5105_v32 = vrot.slane %v5104_v23, 1 }
 0x660   : > { %v5074_v6 = vmul.f32 0.0625, %v5010_v46  ;;  %v5106_v21 = vadd.f32 %v5105_v32, %v5104_v23 }
 0x662   : > { %v5170_v7 = vmul.f32 0.0625, %v5106_v21  ;;  %v5178_v11 = vmul.f32 %v5074_v6, %v5074_v6 }
 0x664   : > { %v5186_v24 = vsub.f32 %v5170_v7, %v5178_v11 }
 0x666   : > { %v5195_v12 = vadd.f32 1e-05, %v5186_v24 }
 0x667   : > { %v6411_v63 = vpop.f32.mrb[82].mxu0 }
 0x668   : > { %v4923_v36 = vadd.f32 %v6411_v63, %v9084_v14  ;;  %v4917_v45 = vpop.f32.mrb[83].mxu0  ;;  %6965 = vrsqrt.f32 %v5195_v12 }
 0x669   : > { %v4918_v3 = vadd.f32 %v9084_v14, %v4917_v45 }
 0x66a   : > { %v9107_v1 = vadd.f32 %v4923_v36, %v8968_v42 }
 0x66b   : > { %v9110_v33 = vadd.f32 %v4918_v3, %v8954_v37 }
 0x66c   : > { %v5012_v61 = vsel %vm540_vm0, %v9107_v1, 0.0  ;;  %v5085_v41 = vmul.f32 %v9107_v1, %v9107_v1  ;;  %v6414_v43 = vpop.f32.mrb[84].mxu0 }
 0x66d   : > { %v5011_v55 = vsel %vm540_vm0, %v9110_v33, 0.0  ;;  %v5084_v48 = vmul.f32 %v9110_v33, %v9110_v33  ;;  %v4933_v59 = vadd.f32 %v6414_v43, %v9084_v14  ;;  %v4927_v37 = vpop.f32.mrb[85].mxu0 }
 0x66e   : > { %v5108_v15 = vsel %vm540_vm0, %v5085_v41, 0.0  ;;  %v5013_v42 = vadd.f32 %v5012_v61, %v5011_v55  ;;  %v4928_v40 = vadd.f32 %v9084_v14, %v4927_v37 }
 0x66f   : > { %v5107_v25 = vsel %vm540_vm0, %v5084_v48, 0.0  ;;  %v9125_v38 = vadd.f32 %v4933_v59, %v8982_v31 }
 0x670   : > { %v5014_v56 = vrot.slane %v5013_v42, 4  ;;  %v5109_v35 = vadd.f32 %v5108_v15, %v5107_v25  ;;  %v9128_v58 = vadd.f32 %v4928_v40, %v8980_v10 }
 0x671   : > { %v5021_v47 = vsel %vm540_vm0, %v9125_v38, 0.0  ;;  %v5087_v50 = vmul.f32 %v9125_v38, %v9125_v38 }
 0x672   : > { %v5015_v0 = vadd.f32 %v5014_v56, %v5013_v42  ;;  %v5110_v26 = vrot.slane %v5109_v35, 4  ;;  %v5020_v31 = vsel %vm540_vm0, %v9128_v58, 0.0  ;;  %v5086_v10 = vmul.f32 %v9128_v58, %v9128_v58  ;;  %v6417_v53 = vpop.f32.mrb[86].mxu0  ;;  %v6966_v5 = vpop.eup %6965 }
 0x673   : > { %v5117_v18 = vsel %vm540_vm0, %v5087_v50, 0.0  ;;  %v5022_v57 = vadd.f32 %v5021_v47, %v5020_v31  ;;  %v4937_v29 = vpop.f32.mrb[87].mxu0  ;;  %v5211_v9 = vmul.f32 %v6966_v5, %v9133_v13  ;;  %v4943_v4 = vadd.f32 %v6417_v53, %v9084_v14 }
 0x674   : > { %v5016_v52 = vrot.slane %v5015_v0, 2  ;;  %v5111_v34 = vadd.f32 %v5110_v26, %v5109_v35  ;;  %v5116_v39 = vsel %vm540_vm0, %v5086_v10, 0.0  ;;  %v4938_v62 = vadd.f32 %v9084_v14, %v4937_v29 }
 0x675   : > { %v5023_v46 = vrot.slane %v5022_v57, 4  ;;  %v5118_v32 = vadd.f32 %v5117_v18, %v5116_v39  ;;  %v5230_v21 = vrot.slane %v5211_v9, %v9486_v30  ;;  %v5284_v7 = vmul.f32 %v5211_v9, %v5074_v6 }
 0x676   : > { %v5017_v27 = vadd.f32 %v5016_v52, %v5015_v0  ;;  %v5112_v23 = vrot.slane %v5111_v34, 2  ;;  %v9155_v11 = vadd.f32 %v4943_v4, %v8998_v16  ;;  %v9158_v24 = vadd.f32 %v4938_v62, %v8996_v28  ;;  %v6420_v63 = vpop.f32.mrb[88].mxu0 }
 0x677   : > { %v5024_v45 = vadd.f32 %v5023_v46, %v5022_v57  ;;  %v5119_v3 = vrot.slane %v5118_v32, 4  ;;  %v4947_v61 = vpop.f32.mrb[89].mxu0  ;;  %v5267_v41 = vmul.f32 %v5230_v21, %v9092_v2  ;;  %v5268_v55 = vmul.f32 %v5230_v21, %v9089_v20 }
 0x678   : > { %v5018_v12 = vrot.slane %v5017_v27, 1  ;;  %v5113_v36 = vadd.f32 %v5112_v23, %v5111_v34  ;;  %v5292_v48 = vsub.f32 %v9151_v19, %v5284_v7  ;;  %v5030_v6 = vsel %vm540_vm0, %v9155_v11, 0.0 }
 0x679   : > { %v5025_v15 = vrot.slane %v5024_v45, 2  ;;  %v5120_v28 = vadd.f32 %v5119_v3, %v5118_v32  ;;  %v5089_v59 = vmul.f32 %v9155_v11, %v9155_v11  ;;  %v5029_v2 = vsel %vm540_vm0, %v9158_v24, 0.0 }
 0x67a   : > { %v5019_v16 = vadd.f32 %v5018_v12, %v5017_v27  ;;  %v5114_v43 = vrot.slane %v5113_v36, 1  ;;  %v5311_v42 = vrot.slane %v5292_v48, %v9486_v30  ;;  %v5088_v20 = vmul.f32 %v9158_v24, %v9158_v24 }
 0x67b   : > { %v5026_v40 = vadd.f32 %v5025_v15, %v5024_v45  ;;  %v5121_v56 = vrot.slane %v5120_v28, 2  ;;  %v5126_v26 = vsel %vm540_vm0, %v5089_v59, 0.0  ;;  %v5031_v47 = vadd.f32 %v5030_v6, %v5029_v2 }
 0x67c   : > { %v9172_v37 = vmul.f32 0.0625, %v5019_v16  ;;  %v5115_v25 = vadd.f32 %v5114_v43, %v5113_v36  ;;  %v5348_v35 = vadd.f32 %v5311_v42, %v5267_v41  ;;  %v5349_v0 = vadd.f32 %v5311_v42, %v5268_v55 }
 0x67d   : > { %v5027_v10 = vrot.slane %v5026_v40, 1  ;;  %v5122_v53 = vadd.f32 %v5121_v56, %v5120_v28  ;;  %v5032_v5 = vrot.slane %v5031_v47, 4  ;;  %v5125_v52 = vsel %vm540_vm0, %v5088_v20, 0.0 }
 0x67e   : > { %v5171_v50 = vmul.f32 0.0625, %v5115_v25  ;;  %v5179_v31 = vmul.f32 %v9172_v37, %v9172_v37  ;;  %5364 = vst.msk [vmem:[%s9178_s14] sm:$0xff] %vm540_vm0, %v5348_v35  ;;  %5365 = vst.msk [vmem:[%s9178_s14 + $0x8] sm:$0xff] %vm540_vm0, %v5349_v0  ;;  %v4953_v34 = vadd.f32 %v6420_v63, %v9084_v14  ;;  %v4948_v18 = vadd.f32 %v9084_v14, %v4947_v61 }
 0x67f   : > { %v5028_v29 = vadd.f32 %v5027_v10, %v5026_v40  ;;  %v5123_v9 = vrot.slane %v5122_v53, 1  ;;  %v5127_v39 = vadd.f32 %v5126_v26, %v5125_v52  ;;  %v5033_v4 = vadd.f32 %v5032_v5, %v5031_v47 }
 0x680   : > { %v5187_v57 = vsub.f32 %v5171_v50, %v5179_v31  ;;  %v9188_v62 = vadd.f32 %v4953_v34, %v9005_v22  ;;  %v9191_v27 = vadd.f32 %v4948_v18, %v9003_v8 }
 0x681   : > { %v9193_v46 = vmul.f32 0.0625, %v5028_v29  ;;  %v5124_v32 = vadd.f32 %v5123_v9, %v5122_v53  ;;  %v5128_v21 = vrot.slane %v5127_v39, 4  ;;  %v5034_v63 = vrot.slane %v5033_v4, 2 }
 0x682   : > { %v5196_v23 = vadd.f32 1e-05, %v5187_v57  ;;  %v6423_v7 = vpop.f32.mrb[90].mxu0  ;;  %v5039_v12 = vsel %vm540_vm0, %v9188_v62, 0.0  ;;  %v5091_v36 = vmul.f32 %v9188_v62, %v9188_v62  ;;  %v5038_v22 = vsel %vm540_vm0, %v9191_v27, 0.0 }
 0x683   : > { %v4957_v45 = vpop.f32.mrb[91].mxu0  ;;  %v5172_v8 = vmul.f32 0.0625, %v5124_v32  ;;  %v5180_v3 = vmul.f32 %v9193_v46, %v9193_v46  ;;  %v5129_v61 = vadd.f32 %v5128_v21, %v5127_v39  ;;  %v5035_v41 = vadd.f32 %v5034_v63, %v5033_v4 }
 0x684   : > { %6967 = vrsqrt.f32 %v5196_v23  ;;  %v5135_v55 = vsel %vm540_vm0, %v5091_v36, 0.0  ;;  %v5040_v48 = vadd.f32 %v5039_v12, %v5038_v22  ;;  %v5090_v6 = vmul.f32 %v9191_v27, %v9191_v27 }
 0x685   : > { %v5188_v16 = vsub.f32 %v5172_v8, %v5180_v3  ;;  %v5130_v43 = vrot.slane %v5129_v61, 2  ;;  %v4963_v15 = vadd.f32 %v6423_v7, %v9084_v14  ;;  %v4958_v28 = vadd.f32 %v9084_v14, %v4957_v45 }
 0x686   : > { %v5036_v42 = vrot.slane %v5035_v41, 1  ;;  %v5041_v59 = vrot.slane %v5040_v48, 4  ;;  %v5134_v2 = vsel %vm540_vm0, %v5090_v6, 0.0 }
 0x687   : > { %v5197_v20 = vadd.f32 1e-05, %v5188_v16  ;;  %v5131_v25 = vadd.f32 %v5130_v43, %v5129_v61  ;;  %v5136_v40 = vadd.f32 %v5135_v55, %v5134_v2  ;;  %v9210_v56 = vadd.f32 %v4963_v15, %v9022_v49 }
 0x688   : > { %v5037_v35 = vadd.f32 %v5036_v42, %v5035_v41  ;;  %v5042_v0 = vadd.f32 %v5041_v59, %v5040_v48  ;;  %v9213_v26 = vadd.f32 %v4958_v28, %v9020_v17 }
 0x689   : > { %6969 = vrsqrt.f32 %v5197_v20  ;;  %v5132_v47 = vrot.slane %v5131_v25, 1  ;;  %v5137_v50 = vrot.slane %v5136_v40, 4  ;;  %v5048_v31 = vsel %vm540_vm0, %v9210_v56, 0.0 }
 0x68a   : > { %v9217_v10 = vmul.f32 0.0625, %v5037_v35  ;;  %v5043_v53 = vrot.slane %v5042_v0, 2  ;;  %v5093_v5 = vmul.f32 %v9210_v56, %v9210_v56  ;;  %v5047_v49 = vsel %vm540_vm0, %v9213_v26, 0.0  ;;  %v6426_v52 = vpop.f32.mrb[92].mxu0 }
 0x68b   : > { %v5133_v34 = vadd.f32 %v5132_v47, %v5131_v25  ;;  %v5138_v18 = vadd.f32 %v5137_v50, %v5136_v40  ;;  %v5049_v17 = vadd.f32 %v5048_v31, %v5047_v49  ;;  %v5092_v57 = vmul.f32 %v9213_v26, %v9213_v26  ;;  %v4967_v29 = vpop.f32.mrb[93].mxu0 }
 0x68c   : > { %v5181_v9 = vmul.f32 %v9217_v10, %v9217_v10  ;;  %v5044_v39 = vadd.f32 %v5043_v53, %v5042_v0  ;;  %v5144_v4 = vsel %vm540_vm0, %v5093_v5, 0.0  ;;  %v4973_v23 = vadd.f32 %v6426_v52, %v9084_v14 }
 0x68d   : > { %v5173_v21 = vmul.f32 0.0625, %v5133_v34  ;;  %v5139_v7 = vrot.slane %v5138_v18, 2  ;;  %v5050_v63 = vrot.slane %v5049_v17, 4  ;;  %v5143_v12 = vsel %vm540_vm0, %v5092_v57, 0.0 }
 0x68e   : > { %v6968_v32 = vpop.eup %6967  ;;  %v5045_v22 = vrot.slane %v5044_v39, 1  ;;  %v5145_v45 = vadd.f32 %v5144_v4, %v5143_v12  ;;  %v9232_v8 = vadd.f32 %v4973_v23, %v9038_v51  ;;  %v4968_v55 = vadd.f32 %v9084_v14, %v4967_v29 }
 0x68f   : > { %v5212_v36 = vmul.f32 %v6968_v32, %v9133_v13  ;;  %v5189_v3 = vsub.f32 %v5173_v21, %v5181_v9  ;;  %v5140_v61 = vadd.f32 %v5139_v7, %v5138_v18  ;;  %v5051_v41 = vadd.f32 %v5050_v63, %v5049_v17  ;;  %v6429_v48 = vpop.f32.mrb[94].mxu0 }
 0x690   : > { %v5046_v43 = vadd.f32 %v5045_v22, %v5044_v39  ;;  %v5146_v15 = vrot.slane %v5145_v45, 4  ;;  %v4977_v28 = vpop.f32.mrb[95].mxu0  ;;  %v5057_v51 = vsel %vm540_vm0, %v9232_v8, 0.0  ;;  %v9251_v34 = vadd.f32 %v4968_v55, %v9036_v54 }
 0x691   : > { %v5234_v6 = vrot.slane %v5212_v36, %v9486_v30  ;;  %v5285_v16 = vmul.f32 %v5212_v36, %v9172_v37  ;;  %v5198_v42 = vadd.f32 1e-05, %v5189_v3  ;;  %v5141_v59 = vrot.slane %v5140_v61, 1 }
 0x692   : > { %v5052_v2 = vrot.slane %v5051_v41, 2  ;;  %v9242_v35 = vmul.f32 0.0625, %v5046_v43  ;;  %v5147_v50 = vadd.f32 %v5146_v15, %v5145_v45  ;;  %v5056_v7 = vsel %vm540_vm0, %v9251_v34, 0.0 }
 0x693   : > { %v5269_v20 = vmul.f32 %v5234_v6, %v9110_v33  ;;  %v5270_v25 = vmul.f32 %v5234_v6, %v9107_v1  ;;  %v5293_v40 = vsub.f32 %v9151_v19, %v5285_v16  ;;  %v6970_v0 = vpop.eup %6969  ;;  %6971 = vrsqrt.f32 %v5198_v42 }
 0x694   : > { %v5142_v37 = vadd.f32 %v5141_v59, %v5140_v61  ;;  %v5053_v47 = vadd.f32 %v5052_v2, %v5051_v41  ;;  %v5213_v53 = vmul.f32 %v6970_v0, %v9133_v13  ;;  %v5182_v33 = vmul.f32 %v9242_v35, %v9242_v35 }
 0x695   : > { %v5315_v31 = vrot.slane %v5293_v40, %v9486_v30  ;;  %v5095_v1 = vmul.f32 %v9232_v8, %v9232_v8  ;;  %v5148_v52 = vrot.slane %v5147_v50, 2  ;;  %v5058_v36 = vadd.f32 %v5057_v51, %v5056_v7 }
 0x696   : > { %v5174_v5 = vmul.f32 0.0625, %v5142_v37  ;;  %v5054_v49 = vrot.slane %v5053_v47, 1  ;;  %v5238_v57 = vrot.slane %v5213_v53, %v9486_v30  ;;  %v5286_v29 = vmul.f32 %v5213_v53, %v9193_v46 }
 0x697   : > { %v5350_v18 = vadd.f32 %v5315_v31, %v5269_v20  ;;  %v5351_v17 = vadd.f32 %v5315_v31, %v5270_v25  ;;  %v5149_v4 = vadd.f32 %v5148_v52, %v5147_v50  ;;  %v5153_v23 = vsel %vm540_vm0, %v5095_v1, 0.0 }
 0x698   : > { %v5190_v9 = vsub.f32 %v5174_v5, %v5182_v33  ;;  %v5055_v39 = vadd.f32 %v5054_v49, %v5053_v47  ;;  %v5271_v32 = vmul.f32 %v5238_v57, %v9128_v58  ;;  %v5272_v54 = vmul.f32 %v5238_v57, %v9125_v38 }
 0x699   : > { %5366 = vst.msk [vmem:[%s9178_s14 + $0x10] sm:$0xff] %vm540_vm0, %v5350_v18  ;;  %5367 = vst.msk [vmem:[%s9178_s14 + $0x18] sm:$0xff] %vm540_vm0, %v5351_v17  ;;  %v5294_v21 = vsub.f32 %v9151_v19, %v5286_v29  ;;  %v5150_v12 = vrot.slane %v5149_v4, 1  ;;  %v5094_v45 = vmul.f32 %v9251_v34, %v9251_v34  ;;  %v4983_v58 = vadd.f32 %v6429_v48, %v9084_v14 }
 0x69a   : > { %v5199_v63 = vadd.f32 1e-05, %v5190_v9  ;;  %v9265_v46 = vmul.f32 0.0625, %v5055_v39  ;;  %v4978_v38 = vadd.f32 %v9084_v14, %v4977_v28  ;;  %v5059_v41 = vrot.slane %v5058_v36, 4 }
 0x69b   : > { %v5319_v22 = vrot.slane %v5294_v21, %v9486_v30  ;;  %v5151_v3 = vadd.f32 %v5150_v12, %v5149_v4  ;;  %v5152_v16 = vsel %vm540_vm0, %v5094_v45, 0.0  ;;  %v9276_v43 = vadd.f32 %v4983_v58, %v9050_v60 }
 0x69c   : > { %6973 = vrsqrt.f32 %v5199_v63  ;;  %v5183_v61 = vmul.f32 %v9265_v46, %v9265_v46  ;;  %v5060_v59 = vadd.f32 %v5059_v41, %v5058_v36  ;;  %v5154_v48 = vadd.f32 %v5153_v23, %v5152_v16 }
 0x69d   : > { %v5352_v55 = vadd.f32 %v5319_v22, %v5271_v32  ;;  %v5353_v6 = vadd.f32 %v5319_v22, %v5272_v54  ;;  %v6972_v15 = vpop.eup %6971  ;;  %v5175_v42 = vmul.f32 0.0625, %v5151_v3  ;;  %v9279_v2 = vadd.f32 %v4978_v38, %v9048_v44 }
 0x69e   : > { %v5214_v14 = vmul.f32 %v6972_v15, %v9133_v13  ;;  %v5066_v28 = vsel %vm540_vm0, %v9276_v43, 0.0  ;;  %v5097_v60 = vmul.f32 %v9276_v43, %v9276_v43  ;;  %v5061_v20 = vrot.slane %v5060_v59, 2 }
 0x69f   : > { %5368 = vst.msk [vmem:[%s9178_s14 + $0x20] sm:$0xff] %vm540_vm0, %v5352_v55  ;;  %5369 = vst.msk [vmem:[%s9178_s14 + $0x28] sm:$0xff] %vm540_vm0, %v5353_v6  ;;  %v5191_v51 = vsub.f32 %v5175_v42, %v5183_v61  ;;  %v5155_v25 = vrot.slane %v5154_v48, 4  ;;  %v5065_v40 = vsel %vm540_vm0, %v9279_v2, 0.0  ;;  %v5096_v33 = vmul.f32 %v9279_v2, %v9279_v2 }
 0x6a0   : > { %v5242_v44 = vrot.slane %v5214_v14, %v9486_v30  ;;  %v5287_v0 = vmul.f32 %v5214_v14, %v9217_v10  ;;  %v5162_v37 = vsel %vm540_vm0, %v5097_v60, 0.0  ;;  %v5067_v47 = vadd.f32 %v5066_v28, %v5065_v40 }
 0x6a1   : > { %v5200_v50 = vadd.f32 1e-05, %v5191_v51  ;;  %v5062_v31 = vadd.f32 %v5061_v20, %v5060_v59  ;;  %v5156_v53 = vadd.f32 %v5155_v25, %v5154_v48  ;;  %v5161_v17 = vsel %vm540_vm0, %v5096_v33, 0.0 }
 0x6a2   : > { %v5273_v1 = vmul.f32 %v5242_v44, %v9158_v24  ;;  %v5274_v5 = vmul.f32 %v5242_v44, %v9155_v11  ;;  %v5295_v49 = vsub.f32 %v9151_v19, %v5287_v0  ;;  %v5068_v52 = vrot.slane %v5067_v47, 4 }
 0x6a3   : > { %6975 = vrsqrt.f32 %v5200_v50  ;;  %v5063_v18 = vrot.slane %v5062_v31, 1  ;;  %v5157_v10 = vrot.slane %v5156_v53, 2  ;;  %v5163_v9 = vadd.f32 %v5162_v37, %v5161_v17 }
 0x6a4   : > { %v5323_v57 = vrot.slane %v5295_v49, %v9486_v30  ;;  %v5069_v29 = vadd.f32 %v5068_v52, %v5067_v47 }
 0x6a5   : > { %v5064_v4 = vadd.f32 %v5063_v18, %v5062_v31  ;;  %v5158_v23 = vadd.f32 %v5157_v10, %v5156_v53  ;;  %v5164_v63 = vrot.slane %v5163_v9, 4 }
 0x6a6   : > { %v6974_v39 = vpop.eup %6973  ;;  %v5354_v24 = vadd.f32 %v5323_v57, %v5273_v1  ;;  %v5355_v32 = vadd.f32 %v5323_v57, %v5274_v5  ;;  %v5070_v54 = vrot.slane %v5069_v29, 2 }
 0x6a7   : > { %v5215_v11 = vmul.f32 %v6974_v39, %v9133_v13  ;;  %v5080_v21 = vmul.f32 0.0625, %v5064_v4  ;;  %v5159_v7 = vrot.slane %v5158_v23, 1  ;;  %v5165_v38 = vadd.f32 %v5164_v63, %v5163_v9 }
 0x6a8   : > { %5370 = vst.msk [vmem:[%s9178_s14 + $0x30] sm:$0xff] %vm540_vm0, %v5354_v24  ;;  %5371 = vst.msk [vmem:[%s9178_s14 + $0x38] sm:$0xff] %vm540_vm0, %v5355_v32  ;;  %v5071_v22 = vadd.f32 %v5070_v54, %v5069_v29 }
 0x6a9   : > { %v5246_v12 = vrot.slane %v5215_v11, %v9486_v30  ;;  %v5288_v36 = vmul.f32 %v5215_v11, %v9242_v35  ;;  %v5160_v45 = vadd.f32 %v5159_v7, %v5158_v23  ;;  %v5184_v58 = vmul.f32 %v5080_v21, %v5080_v21 }
 0x6aa   : > { %v5072_v55 = vrot.slane %v5071_v22, 1  ;;  %v5166_v16 = vrot.slane %v5165_v38, 2 }
 0x6ab   : > { %v5275_v3 = vmul.f32 %v5246_v12, %v9191_v27  ;;  %v5276_v61 = vmul.f32 %v5246_v12, %v9188_v62  ;;  %v5296_v41 = vsub.f32 %v9151_v19, %v5288_v36  ;;  %v5176_v6 = vmul.f32 0.0625, %v5160_v45 }
 0x6ac   : > { %v5073_v42 = vadd.f32 %v5072_v55, %v5071_v22  ;;  %v5167_v48 = vadd.f32 %v5166_v16, %v5165_v38 }
 0x6ad   : > { %v5327_v15 = vrot.slane %v5296_v41, %v9486_v30  ;;  %v6976_v59 = vpop.eup %6975  ;;  %v5192_v35 = vsub.f32 %v5176_v6, %v5184_v58 }
 0x6ae   : > { %v5216_v60 = vmul.f32 %v6976_v59, %v9133_v13  ;;  %v5081_v27 = vmul.f32 0.0625, %v5073_v42  ;;  %v5168_v62 = vrot.slane %v5167_v48, 1 }
 0x6af   : > { %v5356_v14 = vadd.f32 %v5327_v15, %v5275_v3  ;;  %v5357_v28 = vadd.f32 %v5327_v15, %v5276_v61  ;;  %v5201_v51 = vadd.f32 1e-05, %v5192_v35 }
 0x6b0   : > { %v5250_v20 = vrot.slane %v5216_v60, %v9486_v30  ;;  %v5289_v25 = vmul.f32 %v5216_v60, %v9265_v46  ;;  %v5169_v40 = vadd.f32 %v5168_v62, %v5167_v48  ;;  %v5185_v44 = vmul.f32 %v5081_v27, %v5081_v27 }
 0x6b1   : > { %5372 = vst.msk [vmem:[%s9178_s14 + $0x40] sm:$0xff] %vm540_vm0, %v5356_v14  ;;  %5373 = vst.msk [vmem:[%s9178_s14 + $0x48] sm:$0xff] %vm540_vm0, %v5357_v28  ;;  %6977 = vrsqrt.f32 %v5201_v51 }
 0x6b2   : > { %v5277_v0 = vmul.f32 %v5250_v20, %v9213_v26  ;;  %v5278_v37 = vmul.f32 %v5250_v20, %v9210_v56  ;;  %v5297_v47 = vsub.f32 %v9151_v19, %v5289_v25  ;;  %v5177_v50 = vmul.f32 0.0625, %v5169_v40 }
 0x6b4   : > { %v5331_v31 = vrot.slane %v5297_v47, %v9486_v30  ;;  %v5193_v53 = vsub.f32 %v5177_v50, %v5185_v44 }
 0x6b6   : > { %v5358_v33 = vadd.f32 %v5331_v31, %v5277_v0  ;;  %v5359_v1 = vadd.f32 %v5331_v31, %v5278_v37  ;;  %v5202_v5 = vadd.f32 1e-05, %v5193_v53 }
 0x6b8   : > { %5374 = vst.msk [vmem:[%s9178_s14 + $0x50] sm:$0xff] %vm540_vm0, %v5358_v33  ;;  %5375 = vst.msk [vmem:[%s9178_s14 + $0x58] sm:$0xff] %vm540_vm0, %v5359_v1  ;;  %6979 = vrsqrt.f32 %v5202_v5 }
 0x6bb   : > { %v6978_v46 = vpop.eup %6977 }
 0x6bc   : > { %v5217_v26 = vmul.f32 %v6978_v46, %v9133_v13 }
 0x6be   : > { %v5254_v56 = vrot.slane %v5217_v26, %v9486_v30  ;;  %v5290_v49 = vmul.f32 %v5217_v26, %v5080_v21 }
 0x6c0   : > { %v5279_v52 = vmul.f32 %v5254_v56, %v9251_v34  ;;  %v5280_v18 = vmul.f32 %v5254_v56, %v9232_v8  ;;  %v5298_v10 = vsub.f32 %v9151_v19, %v5290_v49 }
 0x6c2   : > { %v5335_v17 = vrot.slane %v5298_v10, %v9486_v30  ;;  %v6980_v57 = vpop.eup %6979 }
 0x6c3   : > { %v5218_v39 = vmul.f32 %v6980_v57, %v9133_v13 }
 0x6c4   : > { %v5360_v29 = vadd.f32 %v5335_v17, %v5279_v52  ;;  %v5361_v9 = vadd.f32 %v5335_v17, %v5280_v18 }
 0x6c5   : > { %v5258_v34 = vrot.slane %v5218_v39, %v9486_v30  ;;  %v5291_v4 = vmul.f32 %v5218_v39, %v5081_v27 }
 0x6c6   : > { %5376 = vst.msk [vmem:[%s9178_s14 + $0x60] sm:$0xff] %vm540_vm0, %v5360_v29  ;;  %5377 = vst.msk [vmem:[%s9178_s14 + $0x68] sm:$0xff] %vm540_vm0, %v5361_v9 }
 0x6c7   : > { %v5281_v8 = vmul.f32 %v5258_v34, %v9279_v2  ;;  %v5282_v23 = vmul.f32 %v5258_v34, %v9276_v43  ;;  %v5299_v24 = vsub.f32 %v9151_v19, %v5291_v4 }
 0x6c9   : > { %v5339_v13 = vrot.slane %v5299_v24, %v9486_v30 }
 0x6cb   : > { %v5362_v32 = vadd.f32 %v5339_v13, %v5281_v8  ;;  %v5363_v2 = vadd.f32 %v5339_v13, %v5282_v23 }
 0x6cd   : > { %5378 = vst.msk [vmem:[%s9178_s14 + $0x70] sm:$0xff] %vm540_vm0, %v5362_v32  ;;  %5379 = vst.msk [vmem:[%s9178_s14 + $0x78] sm:$0xff] %vm540_vm0, %v5363_v2 }
 0x6ce   : > { %7070 = shalt.err (!%p7067_p11)
}
 0x6cf   : > { %s7071_s22 = scalar_lea.hbm %s9349_s24, 2048  ;;  %s7075_s14 = scalar_lea.hbm %s9488_s19, 4096 }
 0x6d0   : > { %p7072_p3 = scmp.ne.s32.totalorder %s9349_s24, %s7071_s22  ;;  %p7076_p2 = scmp.lt.u32.totalorder %s9349_s24, %s9488_s19 }
 0x6d1   : > { %p7077_p4 = scmp.lt.u32.totalorder %s7075_s14, %s7071_s22  ;;  %p7079_p13 = scmp.lt.u32.totalorder %s7071_s22, %s9349_s24 }
 0x6d2   : > { %p7073_p8 = pnand %p7072_p3, %p9489_p1 }
 0x6d3   : > { %p7078_p6 = por %p7077_p4, %p7076_p2 }
 0x6d4   : > { %p7074_p0 = pneg %p7073_p8 }
 0x6d5   : > { %p7080_p12 = por %p7079_p13, %p7078_p6 }
 0x6d7   : > { %p7081_p10 = pnand %p7080_p12, %p7074_p0 }
 0x6d9   : > { %7084 = shalt.err (!%p7081_p10)
}
 0x6da   : > { %s7138_s21 = smov 128   ;;  %s7139_s16 = smov 8  }
 0x6db   : > { %6558 = dma.vmem_to_hbm [thread:$0]  (%p9489_p1), %s9351_s23, 2048, %s9349_s24, %s5381_s29, %s7138_s21, %s7138_s21, %s7139_s16  }
 0x6dc PF: > { %s9490_s27 = sld [smem:[#allocation11_spill]]  ;;  %s9491_s0 = sld [smem:[#allocation16_spill]] }
 0x6dd   : > { %p9493_p7 = scmp.ge.s32.totalorder %s7127_s28, 2 }
 0x6e2   : > { %s5410_s20 = sand.u32 1, %s9490_s27   ;;  %p9492_p5 = scmp.ne.s32.totalorder %s9491_s0, 0 }
 0x6e3   : > { %s5411_s22 = scalar_lea.sflag [#allocation4], %s5410_s20 }
 0x6e4   : > { %p6568_p9 = pnand %p9493_p7, %p9492_p5 }
 0x6e6   : > { %7110 = dma.done.wait (!%p6568_p9), %s5411_s22, 2048  }
 0x6e7   : > { %7112 = vsyncadd (!%p6568_p9), %s5411_s22, 4294965248  ;;  %s9494_s28 = sld [smem:[#allocation13_spill]]  ;;  %s9495_s15 = sld [smem:[#allocation12_spill]] }
 0x6e8   : > { %s9496_s27 = sld [smem:[#allocation14_spill]]  ;;  %s9497_s25 = smov %s7119_s26 }
 0x6ed   : > { %p29_p11 = scmp.ge.s32.totalorder %s9494_s28, 4   ;;  %s9498_s26 = smov %s9495_s15 }
 0x6ef   :  { %31 = sbr.rel (!%p29_p11) target bundleno = 10 (0xa), region = 130 }
 0x6f6   :  { %5416 = vsyncpa [#allocation3], 1 }
 0x6f7   :  { %5418 = vsyncpa [#allocation3 + $0x1], 1 }
 0x6f8   :  { %5419 = vsyncpa [#allocation6], 1 }
 0x6f9   :  { %5421 = vsyncpa [#allocation6 + $0x1], 1 }
 0x6fa   :  { %5422 = vsyncpa [#allocation4], 1 }
 0x6fb   :  { %5424 = vsyncpa [#allocation4 + $0x1], 1 }

</bundles_post_ra>
